<compile_context>
chip_gen: v7x
topology: tpu7x:2x2x1
jax: 0.10.0
libtpu: 0.0.40
codegen_flags: <defaults>
</compile_context>

<pallas_src>
import jax
import jax.numpy as jnp
from jax import lax
from jax.experimental import pallas as pl
from jax.experimental.pallas import tpu as pltpu


# ------------------------- fused ResBlock kernel body ------------------------
def _make_resblock_kernel(C, K, dils, Tt, T_true, leaky, compute_dtype,
                          out_dtype, has_acc, out_scale):
    pad2 = (K - 1) // 2
    pads1 = [(K - 1) * d // 2 for d in dils]          # == (K*d - d)//2 of the module
    halos = [p1 + pad2 for p1 in pads1]               # halo consumed by branch j
    H = sum(halos)                                    # total halo each side
    W0 = Tt + 2 * H                                   # input window width
    n_br = len(dils)

    def kernel(*refs):
        xp_ref, xc_ref, xn_ref = refs[0], refs[1], refs[2]
        idx = 3
        acc_ref = None
        if has_acc:
            acc_ref = refs[idx]
            idx += 1
        w_refs = refs[idx:idx + 4 * n_br]
        o_ref = refs[-1]

        t0 = pl.program_id(1) * Tt                    # global start of this time tile

        xp = xp_ref[0]                                # (C, 128) chunk left of the tile
        xc = xc_ref[0]                                # (C, Tt)  current tile
        xn = xn_ref[0]                                # (C, 128) chunk right of the tile

        # Window covering global time [t0 - H, t0 + Tt + H).
        x = jnp.concatenate([xp[:, 128 - H:], xc, xn[:, :H]], axis=-1)
        x = x.astype(jnp.float32)

        # Global positions of every lane of the window (for zero-pad emulation).
        pos = t0 - H + lax.broadcasted_iota(jnp.int32, (1, W0), 1)

        off, W = 0, W0                                # current window = pos[off:off+W]
        for j, d in enumerate(dils):
            pad1, h = pads1[j], halos[j]
            Wmid = W - 2 * pad1                       # conv1 output width
            Wout = W - 2 * h                          # conv2 output width
            w1_ref, b1_ref, w2_ref, b2_ref = w_refs[4 * j:4 * j + 4]

            # Zero outside [0, T): implements conv1's zero padding and kills
            # clamped-halo / padded-tail garbage.  (Only bites on edge tiles.)
            p_in = pos[:, off:off + W]
            xm = jnp.where((p_in >= 0) & (p_in < T_true), x, 0.0)
            xa = jnp.where(xm >= 0, xm, leaky * xm).astype(compute_dtype)

            # conv1 (dilation d): K accumulating MXU dots on shifted slices.
            acc1 = jnp.dot(w1_ref[0], xa[:, 0:Wmid],
                           preferred_element_type=jnp.float32)
            for k in range(1, K):
                acc1 = acc1 + jnp.dot(w1_ref[k], xa[:, k * d:k * d + Wmid],
                                      preferred_element_type=jnp.float32)
            hid = acc1 + b1_ref[...]

            # conv2's zero padding acts on conv1's output -> mask to [0, T).
            p_mid = pos[:, off + pad1:off + pad1 + Wmid]
            hm = jnp.where((p_mid >= 0) & (p_mid < T_true), hid, 0.0)
            ha = jnp.where(hm >= 0, hm, leaky * hm).astype(compute_dtype)

            # conv2 (dilation 1).
            acc2 = jnp.dot(w2_ref[0], ha[:, 0:Wout],
                           preferred_element_type=jnp.float32)
            for k in range(1, K):
                acc2 = acc2 + jnp.dot(w2_ref[k], ha[:, k:k + Wout],
                                      preferred_element_type=jnp.float32)
            y = acc2 + b2_ref[...]

            # Residual (masked branch input, cropped to the new window).
            x = y + xm[:, h:h + Wout]
            off += h
            W = Wout

        # x is now (C, Tt) covering [t0, t0 + Tt).
        if has_acc:
            x = x + acc_ref[0].astype(jnp.float32)
        if out_scale != 1.0:
            x = x * out_scale
        o_ref[0] = x.astype(out_dtype)

    return kernel, H


# ----------------------------- ResBlock pallas_call --------------------------
def fused_resblock(x, acc, branch_weights, *, K, dils, Tt, T_true, leaky,
                   out_scale, compute_dtype):
    """x: (B, C, T_eff) NCW.  acc: None or (B, C, T_eff) running MRF sum.
    branch_weights: [(w1 (K,C,C), b1 (C,1), w2 (K,C,C), b2 (C,1)), ...]."""
    B, C, T_eff = x.shape
    n_t = T_eff // Tt
    nb = Tt // 128
    n_128 = T_eff // 128
    has_acc = acc is not None

    kernel, H = _make_resblock_kernel(C, K, dils, Tt, T_true, leaky,
                                      compute_dtype, x.dtype, has_acc, out_scale)
    assert H <= 128, "ResBlock halo must fit a single 128-lane chunk"

    # Inputs: 128-lane halo chunks (clamped at the edges; masked in-kernel),
    # the current tile, optional accumulator tile, then VMEM-resident weights.
    in_specs = [
        pl.BlockSpec((1, C, 128),
                     lambda b, t: (b, 0, jnp.maximum(t * nb - 1, 0))),
        pl.BlockSpec((1, C, Tt), lambda b, t: (b, 0, t)),
        pl.BlockSpec((1, C, 128),
                     lambda b, t: (b, 0, jnp.minimum((t + 1) * nb, n_128 - 1))),
    ]
    inputs = [x, x, x]
    if has_acc:
        in_specs.append(pl.BlockSpec((1, C, Tt), lambda b, t: (b, 0, t)))
        inputs.append(acc)
    w_spec = pl.BlockSpec((K, C, C), lambda b, t: (0, 0, 0))
    b_spec = pl.BlockSpec((C, 1), lambda b, t: (0, 0))
    for (w1, b1, w2, b2) in branch_weights:
        in_specs += [w_spec, b_spec, w_spec, b_spec]
        inputs += [w1, b1, w2, b2]

    # Scheduler hints / VMEM budget from actual block sizes.
    n_br = len(dils)
    cdt = int(jnp.dtype(compute_dtype).itemsize)
    flops = 4 * K * C * C * B * T_eff * n_br            # 2 convs * 2*K*C*C MACs / elem
    w_bytes = sum(int(w1.size) * cdt + int(b1.size) * 4 +
                  int(w2.size) * cdt + int(b2.size) * 4
                  for (w1, b1, w2, b2) in branch_weights)
    bytes_accessed = (4 * B * C * T_eff * (2 + int(has_acc))   # x [+acc] read, out write
                      + 4 * B * n_t * 2 * C * 128              # halo chunks
                      + w_bytes)
    W0 = Tt + 2 * H
    vmem_est = (2 * (2 * C * 128 + (2 + int(has_acc)) * C * Tt) * 4   # dbl-buffered tiles
                + 2 * w_bytes                                          # dbl-buffered weights
                + 14 * C * W0 * 4                                      # in-kernel temporaries
                + (4 << 20))                                           # headroom
    vmem_limit = int(min(max(vmem_est, 32 << 20), 64 << 20))

    return pl.pallas_call(
        kernel,
        out_shape=jax.ShapeDtypeStruct((B, C, T_eff), x.dtype),
        grid=(B, n_t),
        in_specs=in_specs,
        out_specs=pl.BlockSpec((1, C, Tt), lambda b, t: (b, 0, t)),
        compiler_params=pltpu.CompilerParams(
            dimension_semantics=("parallel", "parallel"),
            vmem_limit_bytes=vmem_limit),
        cost_estimate=pl.CostEstimate(flops=flops, transcendentals=0,
                                      bytes_accessed=bytes_accessed),
    )(*inputs)


# --------------------------------- MRF forward -------------------------------
def _prep_conv(w_oik, bias, compute_dtype):
    # PyTorch Conv1d weight (Cout, Cin, K) -> per-tap (K, Cout, Cin) matrices.
    wt = jnp.transpose(w_oik, (2, 0, 1)).astype(compute_dtype)
    return wt, bias.reshape(-1, 1).astype(jnp.float32)


def _choose_time_tile(T, C):
    # Biggest lane-dense time tile; small-C configs go big to amortize
    # per-step pipeline overhead, large-C configs stay VMEM-safe.
    cands = (512, 256) if C >= 256 else (2048, 1024, 512, 256)
    for cand in cands:
        if T >= cand:
            return cand
    return 128


def mrf_forward(x_ncw, params, leaky=0.1, compute_dtype=jnp.float32):
    """x_ncw: (B, C, T) -- PyTorch NCW convention.  Returns (B, C, T)."""
    B, C, T = x_ncw.shape
    Tt = _choose_time_tile(T, C)
    n_t = -(-T // Tt)
    T_eff = n_t * Tt
    x = x_ncw if T_eff == T else jnp.pad(x_ncw, ((0, 0), (0, 0), (0, T_eff - T)))

    n_blocks = len(params)
    acc = None
    for i, block in enumerate(params):
        K = block[0][0]
        dils = [d for (_ks, d, _w1, _b1, _w2, _b2) in block]
        branch_weights = []
        for (_ks, _d, w1, b1, w2, b2) in block:
            w1t, b1c = _prep_conv(w1, b1, compute_dtype)
            w2t, b2c = _prep_conv(w2, b2, compute_dtype)
            branch_weights.append((w1t, b1c, w2t, b2c))
        scale = 1.0 / n_blocks if i == n_blocks - 1 else 1.0
        acc = fused_resblock(x, acc, branch_weights, K=K, dils=dils, Tt=Tt,
                             T_true=T, leaky=leaky, out_scale=scale,
                             compute_dtype=compute_dtype)
    out = acc
    return out[:, :, :T] if T_eff != T else out


# ----------------------- deterministic parameter init ------------------------
def init_mrf_params(key, channels, kernel_sizes=(3, 7, 11),
                    dilations=((1, 3, 5), (1, 3, 5), (1, 3, 5))):
    params = []
    for ks, dils in zip(kernel_sizes, dilations):
        branches = []
        for d in dils:
            key, k1, k2, k3, k4 = jax.random.split(key, 5)
            w1 = 0.1 * jax.random.normal(k1, (channels, channels, ks), jnp.float32)
            b1 = 0.1 * jax.random.normal(k2, (channels,), jnp.float32)
            w2 = 0.1 * jax.random.normal(k3, (channels, channels, ks), jnp.float32)
            b2 = 0.1 * jax.random.normal(k4, (channels,), jnp.float32)
            branches.append((ks, d, w1, b1, w2, b2))
        params.append(branches)
    return params


# ------------------------------ pure-JAX reference ---------------------------
def _ref_conv(x_ncw, w_oik, b, d, leaky):
    x = jnp.where(x_ncw >= 0, x_ncw, leaky * x_ncw)
    K = w_oik.shape[-1]
    pad = (K - 1) * d // 2
    y = lax.conv_general_dilated(
        x, w_oik, window_strides=(1,), padding=[(pad, pad)],
        rhs_dilation=(d,), dimension_numbers=('NCH', 'OIH', 'NCH'))
    return y + b[None, :, None]


def _ref_mrf(x_ncw, params, leaky=0.1):
    out = 0.0
    for block in params:
        xb = x_ncw
        for (ks, d, w1, b1, w2, b2) in block:
            xt = _ref_conv(xb, w1, b1, d, leaky)
            xt = _ref_conv(xt, w2, b2, 1, leaky)
            xb = xt + xb
        out = out + xb
    return out / len(params)


if __name__ == "__main__":
    key = jax.random.PRNGKey(0)
    kx, kx2, kp = jax.random.split(key, 3)

    B, C = 2, 32
    params = init_mrf_params(kp, channels=C)

    # Case 1: small input, single time tile (all-boundary path).
    x = jax.random.normal(kx, (B, C, 64), jnp.float32)       # PyTorch-style NCW
    out = jax.block_until_ready(mrf_forward(x, params, leaky=0.1))
    ref = jax.block_until_ready(_ref_mrf(x, params, leaky=0.1))
    assert out.shape == (B, C, 64)
    err = float(jnp.max(jnp.abs(out - ref)))
    assert jnp.allclose(out, ref, rtol=1e-3, atol=1e-3), f"max abs err = {err}"

    # Case 2: multi-tile input (exercises real 128-lane halo exchange + tail pad).
    x2 = jax.random.normal(kx2, (B, C, 300), jnp.float32)
    out2 = jax.block_until_ready(mrf_forward(x2, params, leaky=0.1))
    ref2 = jax.block_until_ready(_ref_mrf(x2, params, leaky=0.1))
    assert out2.shape == (B, C, 300)
    err2 = float(jnp.max(jnp.abs(out2 - ref2)))
    assert jnp.allclose(out2, ref2, rtol=1e-3, atol=1e-3), f"max abs err = {err2}"

    print("KERNEL_OK")
</pallas_src>

<mosaic_0001>
module attributes {stable_mosaic.version = 11 : i64} {
  func.func @kernel(%arg0: i32, %arg1: i32, %arg2: memref<1x32x128xf32, #tpu.memory_space<vmem>>, %arg3: memref<1x32x128xf32, #tpu.memory_space<vmem>>, %arg4: memref<1x32x128xf32, #tpu.memory_space<vmem>>, %arg5: memref<3x32x32xf32, #tpu.memory_space<vmem>>, %arg6: memref<32x1xf32, #tpu.memory_space<vmem>>, %arg7: memref<3x32x32xf32, #tpu.memory_space<vmem>>, %arg8: memref<32x1xf32, #tpu.memory_space<vmem>>, %arg9: memref<3x32x32xf32, #tpu.memory_space<vmem>>, %arg10: memref<32x1xf32, #tpu.memory_space<vmem>>, %arg11: memref<3x32x32xf32, #tpu.memory_space<vmem>>, %arg12: memref<32x1xf32, #tpu.memory_space<vmem>>, %arg13: memref<3x32x32xf32, #tpu.memory_space<vmem>>, %arg14: memref<32x1xf32, #tpu.memory_space<vmem>>, %arg15: memref<3x32x32xf32, #tpu.memory_space<vmem>>, %arg16: memref<32x1xf32, #tpu.memory_space<vmem>>, %arg17: memref<1x32x128xf32, #tpu.memory_space<vmem>>) attributes {dimension_semantics = [#tpu.dimension_semantics<parallel>, #tpu.dimension_semantics<parallel>], iteration_bounds = array<i64: 2, 1>, scalar_prefetch = 0 : i64, scratch_operands = 0 : i64, tpu.core_type = #tpu.core_type<tc>, window_params = [{transform_indices = @transform_0, window_bounds = array<i64: 1, 32, 128>}, {transform_indices = @transform_1, window_bounds = array<i64: 1, 32, 128>}, {transform_indices = @transform_2, window_bounds = array<i64: 1, 32, 128>}, {pipeline_mode = #tpu.pipeline_mode<synchronous>, transform_indices = @transform_3, window_bounds = array<i64: 3, 32, 32>}, {pipeline_mode = #tpu.pipeline_mode<synchronous>, transform_indices = @transform_4, window_bounds = array<i64: 32, 1>}, {pipeline_mode = #tpu.pipeline_mode<synchronous>, transform_indices = @transform_5, window_bounds = array<i64: 3, 32, 32>}, {pipeline_mode = #tpu.pipeline_mode<synchronous>, transform_indices = @transform_6, window_bounds = array<i64: 32, 1>}, {pipeline_mode = #tpu.pipeline_mode<synchronous>, transform_indices = @transform_7, window_bounds = array<i64: 3, 32, 32>}, {pipeline_mode = #tpu.pipeline_mode<synchronous>, transform_indices = @transform_8, window_bounds = array<i64: 32, 1>}, {pipeline_mode = #tpu.pipeline_mode<synchronous>, transform_indices = @transform_9, window_bounds = array<i64: 3, 32, 32>}, {pipeline_mode = #tpu.pipeline_mode<synchronous>, transform_indices = @transform_10, window_bounds = array<i64: 32, 1>}, {pipeline_mode = #tpu.pipeline_mode<synchronous>, transform_indices = @transform_11, window_bounds = array<i64: 3, 32, 32>}, {pipeline_mode = #tpu.pipeline_mode<synchronous>, transform_indices = @transform_12, window_bounds = array<i64: 32, 1>}, {pipeline_mode = #tpu.pipeline_mode<synchronous>, transform_indices = @transform_13, window_bounds = array<i64: 3, 32, 32>}, {pipeline_mode = #tpu.pipeline_mode<synchronous>, transform_indices = @transform_14, window_bounds = array<i64: 32, 1>}, {transform_indices = @transform_15, window_bounds = array<i64: 1, 32, 128>}]} {
    %c128_i32 = arith.constant 128 : i32
    %0 = arith.muli %arg1, %c128_i32 : i32
    %c0 = arith.constant 0 : index
    %c0_0 = arith.constant 0 : index
    %c0_1 = arith.constant 0 : index
    %1 = vector.load %arg2[%c0, %c0_0, %c0_1] : memref<1x32x128xf32, #tpu.memory_space<vmem>>, vector<1x32x128xf32>
    %2 = vector.shape_cast %1 : vector<1x32x128xf32> to vector<32x128xf32>
    %c0_2 = arith.constant 0 : index
    %c0_3 = arith.constant 0 : index
    %c0_4 = arith.constant 0 : index
    %3 = vector.load %arg3[%c0_2, %c0_3, %c0_4] : memref<1x32x128xf32, #tpu.memory_space<vmem>>, vector<1x32x128xf32>
    %4 = vector.shape_cast %3 : vector<1x32x128xf32> to vector<32x128xf32>
    %c0_5 = arith.constant 0 : index
    %c0_6 = arith.constant 0 : index
    %c0_7 = arith.constant 0 : index
    %5 = vector.load %arg4[%c0_5, %c0_6, %c0_7] : memref<1x32x128xf32, #tpu.memory_space<vmem>>, vector<1x32x128xf32>
    %6 = vector.shape_cast %5 : vector<1x32x128xf32> to vector<32x128xf32>
    %7 = vector.extract_strided_slice %2 {offsets = [0, 116], sizes = [32, 12], strides = [1, 1]} : vector<32x128xf32> to vector<32x12xf32>
    %8 = vector.extract_strided_slice %6 {offsets = [0, 0], sizes = [32, 12], strides = [1, 1]} : vector<32x128xf32> to vector<32x12xf32>
    %9 = tpu.concatenate %7, %4, %8 in 1 : vector<32x12xf32>, vector<32x128xf32>, vector<32x12xf32> -> vector<32x152xf32>
    %c12_i32 = arith.constant 12 : i32
    %10 = arith.subi %0, %c12_i32 : i32
    %11 = tpu.iota {dimensions = array<i32: 1>} : vector<1x152xi32>
    %12 = vector.broadcast %10 : i32 to vector<1x152xi32>
    %13 = arith.addi %12, %11 : vector<1x152xi32>
    %c0_i32 = arith.constant 0 : i32
    %14 = vector.broadcast %c0_i32 : i32 to vector<1x152xi32>
    %15 = arith.cmpi sge, %13, %14 : vector<1x152xi32>
    %c64_i32 = arith.constant 64 : i32
    %16 = vector.broadcast %c64_i32 : i32 to vector<1x152xi32>
    %17 = arith.cmpi slt, %13, %16 : vector<1x152xi32>
    %18 = arith.andi %15, %17 : vector<1x152xi1>
    %cst = arith.constant 0.000000e+00 : f32
    %19 = vector.shape_cast %18 : vector<1x152xi1> to vector<1x152xi1>
    %20 = vector.broadcast %19 : vector<1x152xi1> to vector<32x152xi1>
    %21 = vector.broadcast %cst : f32 to vector<32x152xf32>
    %22 = arith.select %20, %9, %21 : vector<32x152xi1>, vector<32x152xf32>
    %cst_8 = arith.constant 0.000000e+00 : f32
    %23 = vector.broadcast %cst_8 : f32 to vector<32x152xf32>
    %24 = arith.cmpf oge, %22, %23 : vector<32x152xf32>
    %cst_9 = arith.constant 1.000000e-01 : f32
    %25 = vector.broadcast %cst_9 : f32 to vector<32x152xf32>
    %26 = arith.mulf %25, %22 : vector<32x152xf32>
    %27 = arith.select %24, %22, %26 : vector<32x152xi1>, vector<32x152xf32>
    %c0_10 = arith.constant 0 : index
    %c0_11 = arith.constant 0 : index
    %c0_12 = arith.constant 0 : index
    %28 = vector.load %arg5[%c0_10, %c0_11, %c0_12] : memref<3x32x32xf32, #tpu.memory_space<vmem>>, vector<1x32x32xf32>
    %29 = vector.shape_cast %28 : vector<1x32x32xf32> to vector<32x32xf32>
    %30 = vector.extract_strided_slice %27 {offsets = [0, 0], sizes = [32, 150], strides = [1, 1]} : vector<32x152xf32> to vector<32x150xf32>
    %cst_13 = arith.constant dense<0.000000e+00> : vector<32x150xf32>
    %31 = tpu.matmul %29, %30, %cst_13 {dimension_numbers = #tpu.dot_dimension_numbers<[1], [0], [0], [1], [0, 0, 1, 1], [], []>} : vector<32x32xf32>, vector<32x150xf32>, vector<32x150xf32> -> vector<32x150xf32>
    %c1 = arith.constant 1 : index
    %c0_14 = arith.constant 0 : index
    %c0_15 = arith.constant 0 : index
    %32 = vector.load %arg5[%c1, %c0_14, %c0_15] : memref<3x32x32xf32, #tpu.memory_space<vmem>>, vector<1x32x32xf32>
    %33 = vector.shape_cast %32 : vector<1x32x32xf32> to vector<32x32xf32>
    %34 = vector.extract_strided_slice %27 {offsets = [0, 1], sizes = [32, 150], strides = [1, 1]} : vector<32x152xf32> to vector<32x150xf32>
    %cst_16 = arith.constant dense<0.000000e+00> : vector<32x150xf32>
    %35 = tpu.matmul %33, %34, %cst_16 {dimension_numbers = #tpu.dot_dimension_numbers<[1], [0], [0], [1], [0, 0, 1, 1], [], []>} : vector<32x32xf32>, vector<32x150xf32>, vector<32x150xf32> -> vector<32x150xf32>
    %36 = arith.addf %31, %35 : vector<32x150xf32>
    %c2 = arith.constant 2 : index
    %c0_17 = arith.constant 0 : index
    %c0_18 = arith.constant 0 : index
    %37 = vector.load %arg5[%c2, %c0_17, %c0_18] : memref<3x32x32xf32, #tpu.memory_space<vmem>>, vector<1x32x32xf32>
    %38 = vector.shape_cast %37 : vector<1x32x32xf32> to vector<32x32xf32>
    %39 = vector.extract_strided_slice %27 {offsets = [0, 2], sizes = [32, 150], strides = [1, 1]} : vector<32x152xf32> to vector<32x150xf32>
    %cst_19 = arith.constant dense<0.000000e+00> : vector<32x150xf32>
    %40 = tpu.matmul %38, %39, %cst_19 {dimension_numbers = #tpu.dot_dimension_numbers<[1], [0], [0], [1], [0, 0, 1, 1], [], []>} : vector<32x32xf32>, vector<32x150xf32>, vector<32x150xf32> -> vector<32x150xf32>
    %41 = arith.addf %36, %40 : vector<32x150xf32>
    %c0_20 = arith.constant 0 : index
    %c0_21 = arith.constant 0 : index
    %42 = vector.load %arg6[%c0_20, %c0_21] : memref<32x1xf32, #tpu.memory_space<vmem>>, vector<32x1xf32>
    %43 = vector.broadcast %42 : vector<32x1xf32> to vector<32x150xf32>
    %44 = arith.addf %41, %43 : vector<32x150xf32>
    %45 = vector.extract_strided_slice %13 {offsets = [0, 1], sizes = [1, 150], strides = [1, 1]} : vector<1x152xi32> to vector<1x150xi32>
    %c0_i32_22 = arith.constant 0 : i32
    %46 = vector.broadcast %c0_i32_22 : i32 to vector<1x150xi32>
    %47 = arith.cmpi sge, %45, %46 : vector<1x150xi32>
    %c64_i32_23 = arith.constant 64 : i32
    %48 = vector.broadcast %c64_i32_23 : i32 to vector<1x150xi32>
    %49 = arith.cmpi slt, %45, %48 : vector<1x150xi32>
    %50 = arith.andi %47, %49 : vector<1x150xi1>
    %cst_24 = arith.constant 0.000000e+00 : f32
    %51 = vector.shape_cast %50 : vector<1x150xi1> to vector<1x150xi1>
    %52 = vector.broadcast %51 : vector<1x150xi1> to vector<32x150xi1>
    %53 = vector.broadcast %cst_24 : f32 to vector<32x150xf32>
    %54 = arith.select %52, %44, %53 : vector<32x150xi1>, vector<32x150xf32>
    %cst_25 = arith.constant 0.000000e+00 : f32
    %55 = vector.broadcast %cst_25 : f32 to vector<32x150xf32>
    %56 = arith.cmpf oge, %54, %55 : vector<32x150xf32>
    %cst_26 = arith.constant 1.000000e-01 : f32
    %57 = vector.broadcast %cst_26 : f32 to vector<32x150xf32>
    %58 = arith.mulf %57, %54 : vector<32x150xf32>
    %59 = arith.select %56, %54, %58 : vector<32x150xi1>, vector<32x150xf32>
    %c0_27 = arith.constant 0 : index
    %c0_28 = arith.constant 0 : index
    %c0_29 = arith.constant 0 : index
    %60 = vector.load %arg7[%c0_27, %c0_28, %c0_29] : memref<3x32x32xf32, #tpu.memory_space<vmem>>, vector<1x32x32xf32>
    %61 = vector.shape_cast %60 : vector<1x32x32xf32> to vector<32x32xf32>
    %62 = vector.extract_strided_slice %59 {offsets = [0, 0], sizes = [32, 148], strides = [1, 1]} : vector<32x150xf32> to vector<32x148xf32>
    %cst_30 = arith.constant dense<0.000000e+00> : vector<32x148xf32>
    %63 = tpu.matmul %61, %62, %cst_30 {dimension_numbers = #tpu.dot_dimension_numbers<[1], [0], [0], [1], [0, 0, 1, 1], [], []>} : vector<32x32xf32>, vector<32x148xf32>, vector<32x148xf32> -> vector<32x148xf32>
    %c1_31 = arith.constant 1 : index
    %c0_32 = arith.constant 0 : index
    %c0_33 = arith.constant 0 : index
    %64 = vector.load %arg7[%c1_31, %c0_32, %c0_33] : memref<3x32x32xf32, #tpu.memory_space<vmem>>, vector<1x32x32xf32>
    %65 = vector.shape_cast %64 : vector<1x32x32xf32> to vector<32x32xf32>
    %66 = vector.extract_strided_slice %59 {offsets = [0, 1], sizes = [32, 148], strides = [1, 1]} : vector<32x150xf32> to vector<32x148xf32>
    %cst_34 = arith.constant dense<0.000000e+00> : vector<32x148xf32>
    %67 = tpu.matmul %65, %66, %cst_34 {dimension_numbers = #tpu.dot_dimension_numbers<[1], [0], [0], [1], [0, 0, 1, 1], [], []>} : vector<32x32xf32>, vector<32x148xf32>, vector<32x148xf32> -> vector<32x148xf32>
    %68 = arith.addf %63, %67 : vector<32x148xf32>
    %c2_35 = arith.constant 2 : index
    %c0_36 = arith.constant 0 : index
    %c0_37 = arith.constant 0 : index
    %69 = vector.load %arg7[%c2_35, %c0_36, %c0_37] : memref<3x32x32xf32, #tpu.memory_space<vmem>>, vector<1x32x32xf32>
    %70 = vector.shape_cast %69 : vector<1x32x32xf32> to vector<32x32xf32>
    %71 = vector.extract_strided_slice %59 {offsets = [0, 2], sizes = [32, 148], strides = [1, 1]} : vector<32x150xf32> to vector<32x148xf32>
    %cst_38 = arith.constant dense<0.000000e+00> : vector<32x148xf32>
    %72 = tpu.matmul %70, %71, %cst_38 {dimension_numbers = #tpu.dot_dimension_numbers<[1], [0], [0], [1], [0, 0, 1, 1], [], []>} : vector<32x32xf32>, vector<32x148xf32>, vector<32x148xf32> -> vector<32x148xf32>
    %73 = arith.addf %68, %72 : vector<32x148xf32>
    %c0_39 = arith.constant 0 : index
    %c0_40 = arith.constant 0 : index
    %74 = vector.load %arg8[%c0_39, %c0_40] : memref<32x1xf32, #tpu.memory_space<vmem>>, vector<32x1xf32>
    %75 = vector.broadcast %74 : vector<32x1xf32> to vector<32x148xf32>
    %76 = arith.addf %73, %75 : vector<32x148xf32>
    %77 = vector.extract_strided_slice %22 {offsets = [0, 2], sizes = [32, 148], strides = [1, 1]} : vector<32x152xf32> to vector<32x148xf32>
    %78 = arith.addf %76, %77 : vector<32x148xf32>
    %79 = vector.extract_strided_slice %13 {offsets = [0, 2], sizes = [1, 148], strides = [1, 1]} : vector<1x152xi32> to vector<1x148xi32>
    %c0_i32_41 = arith.constant 0 : i32
    %80 = vector.broadcast %c0_i32_41 : i32 to vector<1x148xi32>
    %81 = arith.cmpi sge, %79, %80 : vector<1x148xi32>
    %c64_i32_42 = arith.constant 64 : i32
    %82 = vector.broadcast %c64_i32_42 : i32 to vector<1x148xi32>
    %83 = arith.cmpi slt, %79, %82 : vector<1x148xi32>
    %84 = arith.andi %81, %83 : vector<1x148xi1>
    %cst_43 = arith.constant 0.000000e+00 : f32
    %85 = vector.shape_cast %84 : vector<1x148xi1> to vector<1x148xi1>
    %86 = vector.broadcast %85 : vector<1x148xi1> to vector<32x148xi1>
    %87 = vector.broadcast %cst_43 : f32 to vector<32x148xf32>
    %88 = arith.select %86, %78, %87 : vector<32x148xi1>, vector<32x148xf32>
    %cst_44 = arith.constant 0.000000e+00 : f32
    %89 = vector.broadcast %cst_44 : f32 to vector<32x148xf32>
    %90 = arith.cmpf oge, %88, %89 : vector<32x148xf32>
    %cst_45 = arith.constant 1.000000e-01 : f32
    %91 = vector.broadcast %cst_45 : f32 to vector<32x148xf32>
    %92 = arith.mulf %91, %88 : vector<32x148xf32>
    %93 = arith.select %90, %88, %92 : vector<32x148xi1>, vector<32x148xf32>
    %c0_46 = arith.constant 0 : index
    %c0_47 = arith.constant 0 : index
    %c0_48 = arith.constant 0 : index
    %94 = vector.load %arg9[%c0_46, %c0_47, %c0_48] : memref<3x32x32xf32, #tpu.memory_space<vmem>>, vector<1x32x32xf32>
    %95 = vector.shape_cast %94 : vector<1x32x32xf32> to vector<32x32xf32>
    %96 = vector.extract_strided_slice %93 {offsets = [0, 0], sizes = [32, 142], strides = [1, 1]} : vector<32x148xf32> to vector<32x142xf32>
    %cst_49 = arith.constant dense<0.000000e+00> : vector<32x142xf32>
    %97 = tpu.matmul %95, %96, %cst_49 {dimension_numbers = #tpu.dot_dimension_numbers<[1], [0], [0], [1], [0, 0, 1, 1], [], []>} : vector<32x32xf32>, vector<32x142xf32>, vector<32x142xf32> -> vector<32x142xf32>
    %c1_50 = arith.constant 1 : index
    %c0_51 = arith.constant 0 : index
    %c0_52 = arith.constant 0 : index
    %98 = vector.load %arg9[%c1_50, %c0_51, %c0_52] : memref<3x32x32xf32, #tpu.memory_space<vmem>>, vector<1x32x32xf32>
    %99 = vector.shape_cast %98 : vector<1x32x32xf32> to vector<32x32xf32>
    %100 = vector.extract_strided_slice %93 {offsets = [0, 3], sizes = [32, 142], strides = [1, 1]} : vector<32x148xf32> to vector<32x142xf32>
    %cst_53 = arith.constant dense<0.000000e+00> : vector<32x142xf32>
    %101 = tpu.matmul %99, %100, %cst_53 {dimension_numbers = #tpu.dot_dimension_numbers<[1], [0], [0], [1], [0, 0, 1, 1], [], []>} : vector<32x32xf32>, vector<32x142xf32>, vector<32x142xf32> -> vector<32x142xf32>
    %102 = arith.addf %97, %101 : vector<32x142xf32>
    %c2_54 = arith.constant 2 : index
    %c0_55 = arith.constant 0 : index
    %c0_56 = arith.constant 0 : index
    %103 = vector.load %arg9[%c2_54, %c0_55, %c0_56] : memref<3x32x32xf32, #tpu.memory_space<vmem>>, vector<1x32x32xf32>
    %104 = vector.shape_cast %103 : vector<1x32x32xf32> to vector<32x32xf32>
    %105 = vector.extract_strided_slice %93 {offsets = [0, 6], sizes = [32, 142], strides = [1, 1]} : vector<32x148xf32> to vector<32x142xf32>
    %cst_57 = arith.constant dense<0.000000e+00> : vector<32x142xf32>
    %106 = tpu.matmul %104, %105, %cst_57 {dimension_numbers = #tpu.dot_dimension_numbers<[1], [0], [0], [1], [0, 0, 1, 1], [], []>} : vector<32x32xf32>, vector<32x142xf32>, vector<32x142xf32> -> vector<32x142xf32>
    %107 = arith.addf %102, %106 : vector<32x142xf32>
    %c0_58 = arith.constant 0 : index
    %c0_59 = arith.constant 0 : index
    %108 = vector.load %arg10[%c0_58, %c0_59] : memref<32x1xf32, #tpu.memory_space<vmem>>, vector<32x1xf32>
    %109 = vector.broadcast %108 : vector<32x1xf32> to vector<32x142xf32>
    %110 = arith.addf %107, %109 : vector<32x142xf32>
    %111 = vector.extract_strided_slice %13 {offsets = [0, 5], sizes = [1, 142], strides = [1, 1]} : vector<1x152xi32> to vector<1x142xi32>
    %c0_i32_60 = arith.constant 0 : i32
    %112 = vector.broadcast %c0_i32_60 : i32 to vector<1x142xi32>
    %113 = arith.cmpi sge, %111, %112 : vector<1x142xi32>
    %c64_i32_61 = arith.constant 64 : i32
    %114 = vector.broadcast %c64_i32_61 : i32 to vector<1x142xi32>
    %115 = arith.cmpi slt, %111, %114 : vector<1x142xi32>
    %116 = arith.andi %113, %115 : vector<1x142xi1>
    %cst_62 = arith.constant 0.000000e+00 : f32
    %117 = vector.shape_cast %116 : vector<1x142xi1> to vector<1x142xi1>
    %118 = vector.broadcast %117 : vector<1x142xi1> to vector<32x142xi1>
    %119 = vector.broadcast %cst_62 : f32 to vector<32x142xf32>
    %120 = arith.select %118, %110, %119 : vector<32x142xi1>, vector<32x142xf32>
    %cst_63 = arith.constant 0.000000e+00 : f32
    %121 = vector.broadcast %cst_63 : f32 to vector<32x142xf32>
    %122 = arith.cmpf oge, %120, %121 : vector<32x142xf32>
    %cst_64 = arith.constant 1.000000e-01 : f32
    %123 = vector.broadcast %cst_64 : f32 to vector<32x142xf32>
    %124 = arith.mulf %123, %120 : vector<32x142xf32>
    %125 = arith.select %122, %120, %124 : vector<32x142xi1>, vector<32x142xf32>
    %c0_65 = arith.constant 0 : index
    %c0_66 = arith.constant 0 : index
    %c0_67 = arith.constant 0 : index
    %126 = vector.load %arg11[%c0_65, %c0_66, %c0_67] : memref<3x32x32xf32, #tpu.memory_space<vmem>>, vector<1x32x32xf32>
    %127 = vector.shape_cast %126 : vector<1x32x32xf32> to vector<32x32xf32>
    %128 = vector.extract_strided_slice %125 {offsets = [0, 0], sizes = [32, 140], strides = [1, 1]} : vector<32x142xf32> to vector<32x140xf32>
    %cst_68 = arith.constant dense<0.000000e+00> : vector<32x140xf32>
    %129 = tpu.matmul %127, %128, %cst_68 {dimension_numbers = #tpu.dot_dimension_numbers<[1], [0], [0], [1], [0, 0, 1, 1], [], []>} : vector<32x32xf32>, vector<32x140xf32>, vector<32x140xf32> -> vector<32x140xf32>
    %c1_69 = arith.constant 1 : index
    %c0_70 = arith.constant 0 : index
    %c0_71 = arith.constant 0 : index
    %130 = vector.load %arg11[%c1_69, %c0_70, %c0_71] : memref<3x32x32xf32, #tpu.memory_space<vmem>>, vector<1x32x32xf32>
    %131 = vector.shape_cast %130 : vector<1x32x32xf32> to vector<32x32xf32>
    %132 = vector.extract_strided_slice %125 {offsets = [0, 1], sizes = [32, 140], strides = [1, 1]} : vector<32x142xf32> to vector<32x140xf32>
    %cst_72 = arith.constant dense<0.000000e+00> : vector<32x140xf32>
    %133 = tpu.matmul %131, %132, %cst_72 {dimension_numbers = #tpu.dot_dimension_numbers<[1], [0], [0], [1], [0, 0, 1, 1], [], []>} : vector<32x32xf32>, vector<32x140xf32>, vector<32x140xf32> -> vector<32x140xf32>
    %134 = arith.addf %129, %133 : vector<32x140xf32>
    %c2_73 = arith.constant 2 : index
    %c0_74 = arith.constant 0 : index
    %c0_75 = arith.constant 0 : index
    %135 = vector.load %arg11[%c2_73, %c0_74, %c0_75] : memref<3x32x32xf32, #tpu.memory_space<vmem>>, vector<1x32x32xf32>
    %136 = vector.shape_cast %135 : vector<1x32x32xf32> to vector<32x32xf32>
    %137 = vector.extract_strided_slice %125 {offsets = [0, 2], sizes = [32, 140], strides = [1, 1]} : vector<32x142xf32> to vector<32x140xf32>
    %cst_76 = arith.constant dense<0.000000e+00> : vector<32x140xf32>
    %138 = tpu.matmul %136, %137, %cst_76 {dimension_numbers = #tpu.dot_dimension_numbers<[1], [0], [0], [1], [0, 0, 1, 1], [], []>} : vector<32x32xf32>, vector<32x140xf32>, vector<32x140xf32> -> vector<32x140xf32>
    %139 = arith.addf %134, %138 : vector<32x140xf32>
    %c0_77 = arith.constant 0 : index
    %c0_78 = arith.constant 0 : index
    %140 = vector.load %arg12[%c0_77, %c0_78] : memref<32x1xf32, #tpu.memory_space<vmem>>, vector<32x1xf32>
    %141 = vector.broadcast %140 : vector<32x1xf32> to vector<32x140xf32>
    %142 = arith.addf %139, %141 : vector<32x140xf32>
    %143 = vector.extract_strided_slice %88 {offsets = [0, 4], sizes = [32, 140], strides = [1, 1]} : vector<32x148xf32> to vector<32x140xf32>
    %144 = arith.addf %142, %143 : vector<32x140xf32>
    %145 = vector.extract_strided_slice %13 {offsets = [0, 6], sizes = [1, 140], strides = [1, 1]} : vector<1x152xi32> to vector<1x140xi32>
    %c0_i32_79 = arith.constant 0 : i32
    %146 = vector.broadcast %c0_i32_79 : i32 to vector<1x140xi32>
    %147 = arith.cmpi sge, %145, %146 : vector<1x140xi32>
    %c64_i32_80 = arith.constant 64 : i32
    %148 = vector.broadcast %c64_i32_80 : i32 to vector<1x140xi32>
    %149 = arith.cmpi slt, %145, %148 : vector<1x140xi32>
    %150 = arith.andi %147, %149 : vector<1x140xi1>
    %cst_81 = arith.constant 0.000000e+00 : f32
    %151 = vector.shape_cast %150 : vector<1x140xi1> to vector<1x140xi1>
    %152 = vector.broadcast %151 : vector<1x140xi1> to vector<32x140xi1>
    %153 = vector.broadcast %cst_81 : f32 to vector<32x140xf32>
    %154 = arith.select %152, %144, %153 : vector<32x140xi1>, vector<32x140xf32>
    %cst_82 = arith.constant 0.000000e+00 : f32
    %155 = vector.broadcast %cst_82 : f32 to vector<32x140xf32>
    %156 = arith.cmpf oge, %154, %155 : vector<32x140xf32>
    %cst_83 = arith.constant 1.000000e-01 : f32
    %157 = vector.broadcast %cst_83 : f32 to vector<32x140xf32>
    %158 = arith.mulf %157, %154 : vector<32x140xf32>
    %159 = arith.select %156, %154, %158 : vector<32x140xi1>, vector<32x140xf32>
    %c0_84 = arith.constant 0 : index
    %c0_85 = arith.constant 0 : index
    %c0_86 = arith.constant 0 : index
    %160 = vector.load %arg13[%c0_84, %c0_85, %c0_86] : memref<3x32x32xf32, #tpu.memory_space<vmem>>, vector<1x32x32xf32>
    %161 = vector.shape_cast %160 : vector<1x32x32xf32> to vector<32x32xf32>
    %162 = vector.extract_strided_slice %159 {offsets = [0, 0], sizes = [32, 130], strides = [1, 1]} : vector<32x140xf32> to vector<32x130xf32>
    %cst_87 = arith.constant dense<0.000000e+00> : vector<32x130xf32>
    %163 = tpu.matmul %161, %162, %cst_87 {dimension_numbers = #tpu.dot_dimension_numbers<[1], [0], [0], [1], [0, 0, 1, 1], [], []>} : vector<32x32xf32>, vector<32x130xf32>, vector<32x130xf32> -> vector<32x130xf32>
    %c1_88 = arith.constant 1 : index
    %c0_89 = arith.constant 0 : index
    %c0_90 = arith.constant 0 : index
    %164 = vector.load %arg13[%c1_88, %c0_89, %c0_90] : memref<3x32x32xf32, #tpu.memory_space<vmem>>, vector<1x32x32xf32>
    %165 = vector.shape_cast %164 : vector<1x32x32xf32> to vector<32x32xf32>
    %166 = vector.extract_strided_slice %159 {offsets = [0, 5], sizes = [32, 130], strides = [1, 1]} : vector<32x140xf32> to vector<32x130xf32>
    %cst_91 = arith.constant dense<0.000000e+00> : vector<32x130xf32>
    %167 = tpu.matmul %165, %166, %cst_91 {dimension_numbers = #tpu.dot_dimension_numbers<[1], [0], [0], [1], [0, 0, 1, 1], [], []>} : vector<32x32xf32>, vector<32x130xf32>, vector<32x130xf32> -> vector<32x130xf32>
    %168 = arith.addf %163, %167 : vector<32x130xf32>
    %c2_92 = arith.constant 2 : index
    %c0_93 = arith.constant 0 : index
    %c0_94 = arith.constant 0 : index
    %169 = vector.load %arg13[%c2_92, %c0_93, %c0_94] : memref<3x32x32xf32, #tpu.memory_space<vmem>>, vector<1x32x32xf32>
    %170 = vector.shape_cast %169 : vector<1x32x32xf32> to vector<32x32xf32>
    %171 = vector.extract_strided_slice %159 {offsets = [0, 10], sizes = [32, 130], strides = [1, 1]} : vector<32x140xf32> to vector<32x130xf32>
    %cst_95 = arith.constant dense<0.000000e+00> : vector<32x130xf32>
    %172 = tpu.matmul %170, %171, %cst_95 {dimension_numbers = #tpu.dot_dimension_numbers<[1], [0], [0], [1], [0, 0, 1, 1], [], []>} : vector<32x32xf32>, vector<32x130xf32>, vector<32x130xf32> -> vector<32x130xf32>
    %173 = arith.addf %168, %172 : vector<32x130xf32>
    %c0_96 = arith.constant 0 : index
    %c0_97 = arith.constant 0 : index
    %174 = vector.load %arg14[%c0_96, %c0_97] : memref<32x1xf32, #tpu.memory_space<vmem>>, vector<32x1xf32>
    %175 = vector.broadcast %174 : vector<32x1xf32> to vector<32x130xf32>
    %176 = arith.addf %173, %175 : vector<32x130xf32>
    %177 = vector.extract_strided_slice %13 {offsets = [0, 11], sizes = [1, 130], strides = [1, 1]} : vector<1x152xi32> to vector<1x130xi32>
    %c0_i32_98 = arith.constant 0 : i32
    %178 = vector.broadcast %c0_i32_98 : i32 to vector<1x130xi32>
    %179 = arith.cmpi sge, %177, %178 : vector<1x130xi32>
    %c64_i32_99 = arith.constant 64 : i32
    %180 = vector.broadcast %c64_i32_99 : i32 to vector<1x130xi32>
    %181 = arith.cmpi slt, %177, %180 : vector<1x130xi32>
    %182 = arith.andi %179, %181 : vector<1x130xi1>
    %cst_100 = arith.constant 0.000000e+00 : f32
    %183 = vector.shape_cast %182 : vector<1x130xi1> to vector<1x130xi1>
    %184 = vector.broadcast %183 : vector<1x130xi1> to vector<32x130xi1>
    %185 = vector.broadcast %cst_100 : f32 to vector<32x130xf32>
    %186 = arith.select %184, %176, %185 : vector<32x130xi1>, vector<32x130xf32>
    %cst_101 = arith.constant 0.000000e+00 : f32
    %187 = vector.broadcast %cst_101 : f32 to vector<32x130xf32>
    %188 = arith.cmpf oge, %186, %187 : vector<32x130xf32>
    %cst_102 = arith.constant 1.000000e-01 : f32
    %189 = vector.broadcast %cst_102 : f32 to vector<32x130xf32>
    %190 = arith.mulf %189, %186 : vector<32x130xf32>
    %191 = arith.select %188, %186, %190 : vector<32x130xi1>, vector<32x130xf32>
    %c0_103 = arith.constant 0 : index
    %c0_104 = arith.constant 0 : index
    %c0_105 = arith.constant 0 : index
    %192 = vector.load %arg15[%c0_103, %c0_104, %c0_105] : memref<3x32x32xf32, #tpu.memory_space<vmem>>, vector<1x32x32xf32>
    %193 = vector.shape_cast %192 : vector<1x32x32xf32> to vector<32x32xf32>
    %194 = vector.extract_strided_slice %191 {offsets = [0, 0], sizes = [32, 128], strides = [1, 1]} : vector<32x130xf32> to vector<32x128xf32>
    %cst_106 = arith.constant dense<0.000000e+00> : vector<32x128xf32>
    %195 = tpu.matmul %193, %194, %cst_106 {dimension_numbers = #tpu.dot_dimension_numbers<[1], [0], [0], [1], [0, 0, 1, 1], [], []>} : vector<32x32xf32>, vector<32x128xf32>, vector<32x128xf32> -> vector<32x128xf32>
    %c1_107 = arith.constant 1 : index
    %c0_108 = arith.constant 0 : index
    %c0_109 = arith.constant 0 : index
    %196 = vector.load %arg15[%c1_107, %c0_108, %c0_109] : memref<3x32x32xf32, #tpu.memory_space<vmem>>, vector<1x32x32xf32>
    %197 = vector.shape_cast %196 : vector<1x32x32xf32> to vector<32x32xf32>
    %198 = vector.extract_strided_slice %191 {offsets = [0, 1], sizes = [32, 128], strides = [1, 1]} : vector<32x130xf32> to vector<32x128xf32>
    %cst_110 = arith.constant dense<0.000000e+00> : vector<32x128xf32>
    %199 = tpu.matmul %197, %198, %cst_110 {dimension_numbers = #tpu.dot_dimension_numbers<[1], [0], [0], [1], [0, 0, 1, 1], [], []>} : vector<32x32xf32>, vector<32x128xf32>, vector<32x128xf32> -> vector<32x128xf32>
    %200 = arith.addf %195, %199 : vector<32x128xf32>
    %c2_111 = arith.constant 2 : index
    %c0_112 = arith.constant 0 : index
    %c0_113 = arith.constant 0 : index
    %201 = vector.load %arg15[%c2_111, %c0_112, %c0_113] : memref<3x32x32xf32, #tpu.memory_space<vmem>>, vector<1x32x32xf32>
    %202 = vector.shape_cast %201 : vector<1x32x32xf32> to vector<32x32xf32>
    %203 = vector.extract_strided_slice %191 {offsets = [0, 2], sizes = [32, 128], strides = [1, 1]} : vector<32x130xf32> to vector<32x128xf32>
    %cst_114 = arith.constant dense<0.000000e+00> : vector<32x128xf32>
    %204 = tpu.matmul %202, %203, %cst_114 {dimension_numbers = #tpu.dot_dimension_numbers<[1], [0], [0], [1], [0, 0, 1, 1], [], []>} : vector<32x32xf32>, vector<32x128xf32>, vector<32x128xf32> -> vector<32x128xf32>
    %205 = arith.addf %200, %204 : vector<32x128xf32>
    %c0_115 = arith.constant 0 : index
    %c0_116 = arith.constant 0 : index
    %206 = vector.load %arg16[%c0_115, %c0_116] : memref<32x1xf32, #tpu.memory_space<vmem>>, vector<32x1xf32>
    %207 = vector.broadcast %206 : vector<32x1xf32> to vector<32x128xf32>
    %208 = arith.addf %205, %207 : vector<32x128xf32>
    %209 = vector.extract_strided_slice %154 {offsets = [0, 6], sizes = [32, 128], strides = [1, 1]} : vector<32x140xf32> to vector<32x128xf32>
    %210 = arith.addf %208, %209 : vector<32x128xf32>
    %c0_117 = arith.constant 0 : index
    %c0_118 = arith.constant 0 : index
    %c0_119 = arith.constant 0 : index
    %211 = vector.load %arg17[%c0_117, %c0_118, %c0_119] : memref<1x32x128xf32, #tpu.memory_space<vmem>>, vector<1x32x128xf32>
    %212 = vector.shape_cast %211 : vector<1x32x128xf32> to vector<32x128xf32>
    %213 = vector.shape_cast %210 : vector<32x128xf32> to vector<1x32x128xf32>
    tpu.vector_store %arg17[%c0_117, %c0_118, %c0_119], %213 {strides = array<i32>} : memref<1x32x128xf32, #tpu.memory_space<vmem>>, vector<1x32x128xf32>,
    return
  }
  func.func @transform_0(%arg0: i32, %arg1: i32) -> (i32, i32, i32) {
    %c1_i32 = arith.constant 1 : i32
    %0 = arith.muli %arg1, %c1_i32 : i32
    %c1_i32_0 = arith.constant 1 : i32
    %1 = arith.subi %0, %c1_i32_0 : i32
    %c0_i32 = arith.constant 0 : i32
    %2 = arith.maxsi %1, %c0_i32 : i32
    %c0_i32_1 = arith.constant 0 : i32
    %c0_i32_2 = arith.constant 0 : i32
    return %arg0, %c0_i32_1, %2 : i32, i32, i32
  }
  func.func @transform_1(%arg0: i32, %arg1: i32) -> (i32, i32, i32) {
    %c0_i32 = arith.constant 0 : i32
    %c0_i32_0 = arith.constant 0 : i32
    return %arg0, %c0_i32, %arg1 : i32, i32, i32
  }
  func.func @transform_2(%arg0: i32, %arg1: i32) -> (i32, i32, i32) {
    %c1_i32 = arith.constant 1 : i32
    %0 = arith.addi %arg1, %c1_i32 : i32
    %c1_i32_0 = arith.constant 1 : i32
    %1 = arith.muli %0, %c1_i32_0 : i32
    %c0_i32 = arith.constant 0 : i32
    %2 = arith.minsi %1, %c0_i32 : i32
    %c0_i32_1 = arith.constant 0 : i32
    %c0_i32_2 = arith.constant 0 : i32
    return %arg0, %c0_i32_1, %2 : i32, i32, i32
  }
  func.func @transform_3(%arg0: i32, %arg1: i32) -> (i32, i32, i32) {
    %c0_i32 = arith.constant 0 : i32
    %c0_i32_0 = arith.constant 0 : i32
    %c0_i32_1 = arith.constant 0 : i32
    %c0_i32_2 = arith.constant 0 : i32
    return %c0_i32, %c0_i32_0, %c0_i32_1 : i32, i32, i32
  }
  func.func @transform_4(%arg0: i32, %arg1: i32) -> (i32, i32) {
    %c0_i32 = arith.constant 0 : i32
    %c0_i32_0 = arith.constant 0 : i32
    %c0_i32_1 = arith.constant 0 : i32
    return %c0_i32, %c0_i32_0 : i32, i32
  }
  func.func @transform_5(%arg0: i32, %arg1: i32) -> (i32, i32, i32) {
    %c0_i32 = arith.constant 0 : i32
    %c0_i32_0 = arith.constant 0 : i32
    %c0_i32_1 = arith.constant 0 : i32
    %c0_i32_2 = arith.constant 0 : i32
    return %c0_i32, %c0_i32_0, %c0_i32_1 : i32, i32, i32
  }
  func.func @transform_6(%arg0: i32, %arg1: i32) -> (i32, i32) {
    %c0_i32 = arith.constant 0 : i32
    %c0_i32_0 = arith.constant 0 : i32
    %c0_i32_1 = arith.constant 0 : i32
    return %c0_i32, %c0_i32_0 : i32, i32
  }
  func.func @transform_7(%arg0: i32, %arg1: i32) -> (i32, i32, i32) {
    %c0_i32 = arith.constant 0 : i32
    %c0_i32_0 = arith.constant 0 : i32
    %c0_i32_1 = arith.constant 0 : i32
    %c0_i32_2 = arith.constant 0 : i32
    return %c0_i32, %c0_i32_0, %c0_i32_1 : i32, i32, i32
  }
  func.func @transform_8(%arg0: i32, %arg1: i32) -> (i32, i32) {
    %c0_i32 = arith.constant 0 : i32
    %c0_i32_0 = arith.constant 0 : i32
    %c0_i32_1 = arith.constant 0 : i32
    return %c0_i32, %c0_i32_0 : i32, i32
  }
  func.func @transform_9(%arg0: i32, %arg1: i32) -> (i32, i32, i32) {
    %c0_i32 = arith.constant 0 : i32
    %c0_i32_0 = arith.constant 0 : i32
    %c0_i32_1 = arith.constant 0 : i32
    %c0_i32_2 = arith.constant 0 : i32
    return %c0_i32, %c0_i32_0, %c0_i32_1 : i32, i32, i32
  }
  func.func @transform_10(%arg0: i32, %arg1: i32) -> (i32, i32) {
    %c0_i32 = arith.constant 0 : i32
    %c0_i32_0 = arith.constant 0 : i32
    %c0_i32_1 = arith.constant 0 : i32
    return %c0_i32, %c0_i32_0 : i32, i32
  }
  func.func @transform_11(%arg0: i32, %arg1: i32) -> (i32, i32, i32) {
    %c0_i32 = arith.constant 0 : i32
    %c0_i32_0 = arith.constant 0 : i32
    %c0_i32_1 = arith.constant 0 : i32
    %c0_i32_2 = arith.constant 0 : i32
    return %c0_i32, %c0_i32_0, %c0_i32_1 : i32, i32, i32
  }
  func.func @transform_12(%arg0: i32, %arg1: i32) -> (i32, i32) {
    %c0_i32 = arith.constant 0 : i32
    %c0_i32_0 = arith.constant 0 : i32
    %c0_i32_1 = arith.constant 0 : i32
    return %c0_i32, %c0_i32_0 : i32, i32
  }
  func.func @transform_13(%arg0: i32, %arg1: i32) -> (i32, i32, i32) {
    %c0_i32 = arith.constant 0 : i32
    %c0_i32_0 = arith.constant 0 : i32
    %c0_i32_1 = arith.constant 0 : i32
    %c0_i32_2 = arith.constant 0 : i32
    return %c0_i32, %c0_i32_0, %c0_i32_1 : i32, i32, i32
  }
  func.func @transform_14(%arg0: i32, %arg1: i32) -> (i32, i32) {
    %c0_i32 = arith.constant 0 : i32
    %c0_i32_0 = arith.constant 0 : i32
    %c0_i32_1 = arith.constant 0 : i32
    return %c0_i32, %c0_i32_0 : i32, i32
  }
  func.func @transform_15(%arg0: i32, %arg1: i32) -> (i32, i32, i32) {
    %c0_i32 = arith.constant 0 : i32
    %c0_i32_0 = arith.constant 0 : i32
    return %arg0, %c0_i32, %arg1 : i32, i32, i32
  }
}

</mosaic_0001>

<bundles_post_ra>
// kernel: tpu_custom_call.1
= control target key start
LH: loop header
LB: loop body
LE: loop exit
PB: predicated region body
PF: predicated region fallthrough
CT: control target
= control target key end

     0   :  { %s6383_s0 = inlined_call_operand.hbm [shape: f32[2,32,128], index: 0, kind: input, shape index: {}]   ;;  %s6384_s1 = inlined_call_operand.hbm [shape: f32[2,32,128], index: 1, kind: input, shape index: {}]   ;;  %s6385_s2 = inlined_call_operand.hbm [shape: f32[2,32,128], index: 2, kind: input, shape index: {}]   ;;  %s6386_s3 = inlined_call_operand.vmem [shape: f32[3,32,32], index: 3, kind: input, shape index: {}]   ;;  %s6387_s4 = inlined_call_operand.vmem [shape: f32[32,1], index: 4, kind: input, shape index: {}]   ;;  %s6388_s5 = inlined_call_operand.vmem [shape: f32[3,32,32], index: 5, kind: input, shape index: {}]   ;;  %s6389_s6 = inlined_call_operand.vmem [shape: f32[32,1], index: 6, kind: input, shape index: {}]   ;;  %s6390_s7 = inlined_call_operand.hbm [shape: f32[3,32,32], index: 7, kind: input, shape index: {}]   ;;  %s6391_s8 = inlined_call_operand.vmem [shape: f32[32,1], index: 8, kind: input, shape index: {}]   ;;  %s6392_s9 = inlined_call_operand.hbm [shape: f32[3,32,32], index: 9, kind: input, shape index: {}]   ;;  %s6393_s10 = inlined_call_operand.vmem [shape: f32[32,1], index: 10, kind: input, shape index: {}]   ;;  %s6394_s11 = inlined_call_operand.hbm [shape: f32[3,32,32], index: 11, kind: input, shape index: {}]   ;;  %s6395_s12 = inlined_call_operand.vmem [shape: f32[32,1], index: 12, kind: input, shape index: {}]   ;;  %s6396_s13 = inlined_call_operand.hbm [shape: f32[3,32,32], index: 13, kind: input, shape index: {}]   ;;  %s6397_s14 = inlined_call_operand.vmem [shape: f32[32,1], index: 14, kind: input, shape index: {}]   ;;  %s6398_s15 = inlined_call_operand.hbm [shape: f32[2,32,128], index: 15, kind: output, shape index: {}]  }
   0x1   :  { %6433 = sst [smem:[#allocation28_spill]] %s6384_s1 }
   0x2   :  { %6434 = sst [smem:[#allocation29_spill]] %s6386_s3 }
   0x3   :  { %6435 = sst [smem:[#allocation30_spill]] %s6387_s4 }
   0x4   :  { %6436 = sst [smem:[#allocation31_spill]] %s6388_s5 }
   0x5   :  { %6437 = sst [smem:[#allocation32_spill]] %s6389_s6 }
   0x6   :  { %6438 = sst [smem:[#allocation33_spill]] %s6390_s7 }
   0x7   :  { %6439 = sst [smem:[#allocation34_spill]] %s6391_s8 }
   0x8   :  { %6440 = sst [smem:[#allocation35_spill]] %s6393_s10 }
   0x9   :  { %6441 = sst [smem:[#allocation36_spill]] %s6394_s11 }
   0xa   :  { %6442 = sst [smem:[#allocation37_spill]] %s6395_s12 }
   0xb   :  { %6443 = sst [smem:[#allocation38_spill]] %s6397_s14 }
   0xc   :  { %6444 = sst [smem:[#allocation39_spill]] %s6398_s15 }
   0xd   :  { %20 = vsyncpa [#allocation3], 0 }
   0xe   :  { %22 = vsyncpa [#allocation3 + $0x1], 0 }
   0xf   :  { %23 = vsyncpa [#allocation6], 0 }
  0x10   :  { %25 = vsyncpa [#allocation6 + $0x1], 0 }
  0x11   :  { %26 = vsyncpa [#allocation9], 0 }
  0x12   :  { %27 = vsyncpa [#allocation12], 0 }
  0x13   :  { %28 = vsyncpa [#allocation4], 0 }
  0x14   :  { %30 = vsyncpa [#allocation4 + $0x1], 0  ;;  %s5402_s18 = smov 0   ;;  %s5404_s19 = smov 0  }
  0x15   :  { %s5406_s20 = smov 0   ;;  %s5408_s21 = smov 0  }
  0x16   :  { %s5410_s22 = smov 0   ;;  %s5412_s23 = smov 0  }
  0x17 LB: > { %6445 = sst [smem:[#allocation20_spill]] %s5269_s18  ;;  %s5433_s24 = sadd.s32 4294967295, %s5289_s23   ;;  %s5289_s23 = sphi %s5412_s23, %s36_s23   ;;  %s5285_s22 = sphi %s5410_s22, %s6501_s22   ;;  %s5281_s21 = sphi %s5408_s21, %s6500_s21   ;;  %s5277_s20 = sphi %s5406_s20, %s6504_s20   ;;  %s5273_s19 = sphi %s5404_s19, %s6503_s19   ;;  %s5269_s18 = sphi %s5402_s18, %s6502_s18  }
  0x18   : > { %6446 = sst [smem:[#allocation21_spill]] %s5281_s21  ;;  %s4119_s25 = sadd.s32 4294967294, %s5289_s23  }
  0x19   : > { %6447 = sst [smem:[#allocation22_spill]] %s5285_s22  ;;  %p76_p0 = scmp.ne.s32.totalorder %s5273_s19, %s5269_s18 }
  0x1a   : > { %6448 = sst [smem:[#allocation23_spill]] %s5289_s23  ;;  %p6404_p1 = scmp.eq.s32.totalorder %s5433_s24, 0 }
  0x1b   : > { %p422_p3 = scmp.eq.s32.totalorder %s4119_s25, 1  ;;  %p4120_p5 = scmp.ge.s32.totalorder %s5289_s23, 1 }
  0x1c   : > { %p5442_p4 = por %p6404_p1, %p76_p0  ;;  %p429_p7 = scmp.lt.s32.totalorder %s5289_s23, 3 }
  0x1d   : > { %p5447_p6 = por %p422_p3, %p76_p0  ;;  %s5291_s29 = smov [#allocation8]  }
  0x1e   : > { %s6449_s26 = scalar_select %p5442_p4, 1, 0 }
  0x1f   : > { %s6450_s27 = scalar_select %p5447_p6, 1, 0 }
  0x20   : > { %p5452_p8 = pnand %p4120_p5, %p429_p7  ;;  %s453_s30 = sshll.u32 %s5291_s29, 4  ;;  %s5456_s30 = int_to_ptr.vmem [resolvable:$true] %s453_s30 }
  0x21   : > { %6451 = sst [smem:[#allocation24_spill]] %s6450_s27  ;;  %s5292_s17 = smov [#allocation11]  }
  0x22   : > { %s6452_s28 = scalar_select %p5452_p8, 1, 0 }
  0x23   : > { %p4509_p9 = pneg %p5452_p8  ;;  %s485_s25 = sshll.u32 %s5292_s17, 4  ;;  %s5467_s25 = int_to_ptr.vmem [resolvable:$true] %s485_s25 }
  0x24   : > { %s6454_s7 = sld [smem:[#allocation33_spill]] }
  0x25   : > { %p5463_p11 = pnand %p4509_p9, %p6404_p1 }
  0x27   : > { %s6453_s16 = scalar_select %p5463_p11, 1, 0 }
  0x28   : > { %p5477_p13 = pneg %p5463_p11 }
  0x2a   : > { %s4993_s15 = scalar_lea.hbm %s6454_s7, 1536 }
  0x2b   : > { %p4994_p12 = scmp.ne.s32.totalorder %s6454_s7, %s4993_s15  ;;  %p5000_p5 = scmp.lt.u32.totalorder %s4993_s15, %s6454_s7 }
  0x2c   : > { %s6455_s14 = scalar_select %p5477_p13, 1, 0 }
  0x2d   : > { %p4996_p0 = pnand %p5477_p13, %p4994_p12 }
  0x2f   : > { %p4997_p3 = pneg %p4996_p0 }
  0x31   : > { %p5002_p7 = pnand %p5000_p5, %p4997_p3 }
  0x33   : > { %5005 = shalt.err (!%p5002_p7)
}
  0x34   : > { %s5006_s18 = scalar_lea.vmem %s5456_s30, 1536  ;;  %p5014_p2 = scmp.lt.s32.totalorder %s5456_s30, %s5456_s30 }
  0x35   : > { %p5007_p9 = scmp.ne.s32.totalorder %s5456_s30, %s5006_s18  ;;  %p5015_p6 = scmp.lt.s32.totalorder %s5006_s18, %s5006_s18 }
  0x37   : > { %p5009_p10 = pnand %p5007_p9, %p5477_p13  ;;  %p5016_p12 = por %p5015_p6, %p5014_p2 }
  0x39   : > { %p5010_p1 = pneg %p5009_p10 }
  0x3b   : > { %p5017_p0 = pnand %p5016_p12, %p5010_p1 }
  0x3d   : > { %5020 = shalt.err (!%p5017_p0)
}
  0x3e   : > { %s6409_s21 = smov 128   ;;  %s6411_s12 = smov 8  }
  0x3f   : > { %4512 = dma.hbm_to_vmem [thread:$0]  (!%p5463_p11), %s6454_s7, 1536, %s5456_s30, [#allocation9], %s6409_s21, %s6409_s21, %s6411_s12  }
  0x40   : > { %s6456_s11 = sld [smem:[#allocation36_spill]] }
  0x46   : > { %s5021_s18 = scalar_lea.hbm %s6456_s11, 1536 }
  0x47   : > { %p5022_p1 = scmp.ne.s32.totalorder %s6456_s11, %s5021_s18  ;;  %p5028_p10 = scmp.lt.u32.totalorder %s5021_s18, %s6456_s11 }
  0x49   : > { %p5024_p2 = pnand %p5022_p1, %p5477_p13 }
  0x4b   : > { %p5025_p6 = pneg %p5024_p2 }
  0x4d   : > { %p5030_p3 = pnand %p5028_p10, %p5025_p6 }
  0x4f   : > { %5033 = shalt.err (!%p5030_p3)
}
  0x50   : > { %s5034_s30 = scalar_lea.vmem %s5467_s25, 1536  ;;  %p5042_p12 = scmp.lt.s32.totalorder %s5467_s25, %s5467_s25 }
  0x51   : > { %p5035_p5 = scmp.ne.s32.totalorder %s5467_s25, %s5034_s30  ;;  %p5043_p0 = scmp.lt.s32.totalorder %s5034_s30, %s5034_s30 }
  0x53   : > { %p5037_p7 = pnand %p5035_p5, %p5477_p13  ;;  %p5044_p1 = por %p5043_p0, %p5042_p12 }
  0x55   : > { %p5038_p9 = pneg %p5037_p7 }
  0x57   : > { %p5045_p2 = pnand %p5044_p1, %p5038_p9 }
  0x59   : > { %5048 = shalt.err (!%p5045_p2)
}
  0x5a   : > { %4518 = dma.hbm_to_vmem [thread:$0]  (!%p5463_p11), %s6456_s11, 1536, %s5467_s25, [#allocation12], %s6409_s21, %s6409_s21, %s6411_s12  }
  0x5b   : > { %s48_s8 = sadd.s32 1, %s5285_s22  ;;  %s63_s10 = sadd.s32 1, %s5277_s20 }
  0x5c   : > { %p50_p6 = scmp.ge.s32.totalorder %s48_s8, 2  ;;  %p70_p10 = scmp.ne.s32.totalorder %s5277_s20, %s5273_s19 }
  0x5d   : > { %p71_p3 = scmp.eq.s32.totalorder %s5289_s23, 0  ;;  %p4540_p5 = scmp.lt.s32.totalorder %s5289_s23, 2 }
  0x5e   : > { %s6506_s8 = smov (%p50_p6, %s48_s8), 0  ;;  %p6458_p9 = scmp.eq.s32.totalorder %s5433_s24, 1 }
  0x5f   : > { %6457 = sst [smem:[#allocation25_spill]] %s6506_s8  ;;  %p72_p7 = por %p71_p3, %p70_p10 }
  0x60   : > { %p5537_p12 = por %p6458_p9, %p70_p10  ;;  %s58_s27 = ssub.s32 %s5285_s22, %s6506_s8 }
  0x61   : > { %s6413_s29 = sand.u32 1, %s5277_s20   ;;  %p61_p0 = scmp.eq.s32.totalorder %s58_s27, 0 }
  0x62   : > { %s6459_s15 = scalar_select %p5537_p12, 1, 0 }
  0x63   : > { %s5546_s25 = sshll.u32 %s6413_s29, 5  ;;  %s5549_s17 = sshll.u32 %s5285_s22, 9 }
  0x64   : > { %6460 = sst [smem:[#allocation26_spill]] %s6459_s15  ;;  %p5551_p1 = pnand %p4540_p5, %p72_p7 }
  0x65   : > { %s5556_s30 = scalar_select %p61_p0, %s5277_s20, %s63_s10  }
  0x66   : > { %s6461_s18 = scalar_select %p5551_p1, 1, 0 }
  0x67   : > { %6462 = sst [smem:[#allocation27_spill]] %s5556_s30  ;;  %s543_s5 = sand.u32 1, %s5289_s23  }
  0x68   : > { %s6463_s1 = sld [smem:[#allocation28_spill]]  ;;  %s547_s27 = scalar_lea.vmem [#allocation5], %s5546_s25 }
  0x69   : > { %s555_s29 = sshll.u32 %s547_s27, 4  ;;  %s5568_s7 = scalar_lea.sflag [#allocation6], %s543_s5  ;;  %s5566_s29 = int_to_ptr.vmem [resolvable:$true] %s555_s29 }
  0x6a   : > { %p5574_p6 = pneg %p5551_p1 }
  0x6c   : > { %s6464_s10 = scalar_select %p5574_p6, 1, 0 }
  0x6e   : > { %s5563_s12 = scalar_lea.hbm %s6463_s1, %s5549_s17  ;;  %s5054_s8 = scalar_lea.hbm %s6463_s1, 1024 }
  0x6f   : > { %s5049_s11 = scalar_lea.hbm %s5563_s12, 512  ;;  %p5055_p5 = scmp.lt.u32.totalorder %s5563_s12, %s6463_s1 }
  0x70   : > { %p5050_p2 = scmp.ne.s32.totalorder %s5563_s12, %s5049_s11  ;;  %p5056_p7 = scmp.lt.u32.totalorder %s5054_s8, %s5049_s11 }
  0x71   : > { %p5058_p0 = scmp.lt.u32.totalorder %s5049_s11, %s5563_s12 }
  0x72   : > { %p5052_p10 = pnand %p5574_p6, %p5050_p2  ;;  %p5057_p9 = por %p5056_p7, %p5055_p5 }
  0x74   : > { %p5053_p3 = pneg %p5052_p10  ;;  %p5059_p12 = por %p5058_p0, %p5057_p9 }
  0x76   : > { %p5060_p4 = pnand %p5059_p12, %p5053_p3 }
  0x78   : > { %5063 = shalt.err (!%p5060_p4)
}
  0x79   : > { %s5064_s5 = scalar_lea.vmem %s5566_s29, 512  ;;  %s5295_s21 = smov [#allocation5]  }
  0x7a   : > { %p5065_p2 = scmp.ne.s32.totalorder %s5566_s29, %s5064_s5  ;;  %s5069_s6 = sshll.u32 %s5295_s21, 4  ;;  %s5070_s6 = int_to_ptr.vmem [resolvable:$false] %s5069_s6 }
  0x7b   : > { %s5071_s22 = scalar_lea.vmem %s5070_s6, 1024  ;;  %p5072_p11 = scmp.lt.s32.totalorder %s5566_s29, %s5070_s6 }
  0x7c   : > { %p5067_p10 = pnand %p5065_p2, %p5574_p6  ;;  %p5073_p13 = scmp.lt.s32.totalorder %s5071_s22, %s5064_s5 }
  0x7e   : > { %p5068_p8 = pneg %p5067_p10  ;;  %p5074_p5 = por %p5073_p13, %p5072_p11 }
  0x80   : > { %p5075_p7 = pnand %p5074_p5, %p5068_p8 }
  0x82   : > { %5078 = shalt.err (!%p5075_p7)
}
  0x83   : > { %s6465_s11 = smov 8   ;;  %s6466_s8 = smov 128  }
  0x84   : > { %4528 = dma.hbm_to_vmem [thread:$0]  (!%p5551_p1), %s5563_s12, 512, %s5566_s29, %s5568_s7, %s6466_s8, %s6466_s8, %s6465_s11  }
  0x85   : > { %s5296_s27 = smov [#allocation10]   ;;  %s5297_s21 = smov [#allocation13]  }
  0x86   : > { %s469_s1 = sshll.u32 %s5296_s27, 4  ;;  %s501_s30 = sshll.u32 %s5297_s21, 4  ;;  %s470_s1 = int_to_ptr.vmem [resolvable:$true] %s469_s1  ;;  %s502_s30 = int_to_ptr.vmem [resolvable:$true] %s501_s30 }
  0x87   : > { %s5079_s22 = scalar_lea.hbm %s6392_s9, 1536  ;;  %p6467_p8 = scmp.ne.s32.totalorder %s6455_s14, 0 }
  0x88   : > { %p5080_p4 = scmp.ne.s32.totalorder %s6392_s9, %s5079_s22  ;;  %p5086_p12 = scmp.lt.u32.totalorder %s5079_s22, %s6392_s9 }
  0x8a   : > { %p5082_p11 = pnand %p5080_p4, %p6467_p8 }
  0x8c   : > { %p5083_p13 = pneg %p5082_p11 }
  0x8e   : > { %p5088_p3 = pnand %p5086_p12, %p5083_p13 }
  0x90   : > { %5091 = shalt.err (!%p5088_p3)
}
  0x91   : > { %s5092_s12 = scalar_lea.vmem %s470_s1, 1536  ;;  %p5100_p10 = scmp.lt.s32.totalorder %s470_s1, %s470_s1 }
  0x92   : > { %p5093_p9 = scmp.ne.s32.totalorder %s470_s1, %s5092_s12  ;;  %p5101_p5 = scmp.lt.s32.totalorder %s5092_s12, %s5092_s12 }
  0x94   : > { %p5095_p0 = pnand %p5093_p9, %p6467_p8  ;;  %p5102_p7 = por %p5101_p5, %p5100_p10 }
  0x96   : > { %p5096_p2 = pneg %p5095_p0 }
  0x98   : > { %p5103_p1 = pnand %p5102_p7, %p5096_p2 }
  0x9a   : > { %5106 = shalt.err (!%p5103_p1)
}
  0x9b   : > { %p6468_p4 = scmp.ne.s32.totalorder %s6453_s16, 0  ;;  %s5107_s29 = scalar_lea.hbm %s6396_s13, 1536 }
  0x9c   : > { %p5108_p11 = scmp.ne.s32.totalorder %s6396_s13, %s5107_s29  ;;  %p5114_p12 = scmp.lt.u32.totalorder %s5107_s29, %s6396_s13 }
  0x9d   : > { %4515 = dma.hbm_to_vmem [thread:$0]  (!%p6468_p4), %s6392_s9, 1536, %s470_s1, [#allocation9], %s6466_s8, %s6466_s8, %s6465_s11  }
  0x9e   : > { %p5110_p1 = pnand %p5108_p11, %p6467_p8 }
  0xa0   : > { %p5111_p13 = pneg %p5110_p1 }
  0xa2   : > { %p5116_p3 = pnand %p5114_p12, %p5111_p13 }
  0xa4   : > { %5119 = shalt.err (!%p5116_p3)
}
  0xa5   : > { %s5120_s22 = scalar_lea.vmem %s502_s30, 1536  ;;  %p5128_p10 = scmp.lt.s32.totalorder %s502_s30, %s502_s30 }
  0xa6   : > { %p5121_p9 = scmp.ne.s32.totalorder %s502_s30, %s5120_s22  ;;  %p5129_p5 = scmp.lt.s32.totalorder %s5120_s22, %s5120_s22 }
  0xa8   : > { %p5123_p0 = pnand %p5121_p9, %p6467_p8  ;;  %p5130_p7 = por %p5129_p5, %p5128_p10 }
  0xaa   : > { %p5124_p2 = pneg %p5123_p0 }
  0xac   : > { %p5131_p6 = pnand %p5130_p7, %p5124_p2 }
  0xae   : > { %5134 = shalt.err (!%p5131_p6)
}
  0xaf   : > { %4521 = dma.hbm_to_vmem [thread:$0]  (!%p6468_p4), %s6396_s13, 1536, %s502_s30, [#allocation12], %s6466_s8, %s6466_s8, %s6465_s11  }
  0xb0   : > { %s5647_s4 = scalar_lea.hbm %s6383_s0, %s5549_s17  ;;  %s522_s16 = scalar_lea.vmem [#allocation2], %s5546_s25 }
  0xb1   : > { %s533_s23 = sshll.u32 %s522_s16, 4  ;;  %s5656_s27 = scalar_lea.hbm %s6385_s2, %s5549_s17  ;;  %s5650_s23 = int_to_ptr.vmem [resolvable:$true] %s533_s23 }
  0xb2   : > { %s6469_s21 = sand.u32 1, %s5277_s20   ;;  %s5135_s6 = scalar_lea.hbm %s5647_s4, 512 }
  0xb3   : > { %s5660_s30 = scalar_lea.sflag [#allocation3], %s6469_s21  ;;  %p5136_p6 = scmp.ne.s32.totalorder %s5647_s4, %s5135_s6 }
  0xb4   : > { %p6470_p8 = scmp.ne.s32.totalorder %s6464_s10, 0  ;;  %s5140_s1 = scalar_lea.hbm %s6383_s0, 1024 }
  0xb5   : > { %p5141_p1 = scmp.lt.u32.totalorder %s5647_s4, %s6383_s0  ;;  %p5142_p13 = scmp.lt.u32.totalorder %s5140_s1, %s5135_s6 }
  0xb6   : > { %p5138_p4 = pnand %p5136_p6, %p6470_p8  ;;  %p5144_p3 = scmp.lt.u32.totalorder %s5135_s6, %s5647_s4 }
  0xb7   : > { %p5143_p12 = por %p5142_p13, %p5141_p1 }
  0xb8   : > { %p5139_p11 = pneg %p5138_p4 }
  0xb9   : > { %p5145_p9 = por %p5144_p3, %p5143_p12 }
  0xbb   : > { %p5146_p0 = pnand %p5145_p9, %p5139_p11 }
  0xbd   : > { %5149 = shalt.err (!%p5146_p0)
}
  0xbe   : > { %s5150_s17 = scalar_lea.vmem %s5650_s23, 512  ;;  %s5298_s3 = smov [#allocation2]  }
  0xbf   : > { %p5151_p2 = scmp.ne.s32.totalorder %s5650_s23, %s5150_s17  ;;  %s5155_s16 = sshll.u32 %s5298_s3, 4  ;;  %s5156_s16 = int_to_ptr.vmem [resolvable:$false] %s5155_s16 }
  0xc0   : > { %s5157_s15 = scalar_lea.vmem %s5156_s16, 1024  ;;  %p5158_p7 = scmp.lt.s32.totalorder %s5650_s23, %s5156_s16 }
  0xc1   : > { %p5153_p10 = pnand %p5151_p2, %p6470_p8  ;;  %p5159_p6 = scmp.lt.s32.totalorder %s5157_s15, %s5150_s17 }
  0xc3   : > { %p5154_p5 = pneg %p5153_p10  ;;  %p5160_p4 = por %p5159_p6, %p5158_p7 }
  0xc5   : > { %p5161_p1 = pnand %p5160_p4, %p5154_p5 }
  0xc7   : > { %5164 = shalt.err (!%p5161_p1)
}
  0xc8   : > { %p6471_p11 = scmp.ne.s32.totalorder %s6461_s18, 0  ;;  %s569_s29 = scalar_lea.vmem [#allocation7], %s5546_s25 }
  0xc9   : > { %s580_s21 = sshll.u32 %s569_s29, 4  ;;  %s5165_s6 = scalar_lea.hbm %s5656_s27, 512  ;;  %s5688_s21 = int_to_ptr.vmem [resolvable:$true] %s580_s21 }
  0xca   : > { %4525 = dma.hbm_to_vmem [thread:$0]  (!%p6471_p11), %s5647_s4, 512, %s5650_s23, %s5660_s30, %s6466_s8, %s6466_s8, %s6465_s11  }
  0xcb   : > { %p5166_p13 = scmp.ne.s32.totalorder %s5656_s27, %s5165_s6  ;;  %s5170_s1 = scalar_lea.hbm %s6385_s2, 1024 }
  0xcc   : > { %p5171_p9 = scmp.lt.u32.totalorder %s5656_s27, %s6385_s2  ;;  %p5172_p0 = scmp.lt.u32.totalorder %s5170_s1, %s5165_s6 }
  0xcd   : > { %p5168_p12 = pnand %p5166_p13, %p6470_p8  ;;  %p5174_p10 = scmp.lt.u32.totalorder %s5165_s6, %s5656_s27 }
  0xce   : > { %p5173_p2 = por %p5172_p0, %p5171_p9 }
  0xcf   : > { %p5169_p3 = pneg %p5168_p12 }
  0xd0   : > { %p5175_p5 = por %p5174_p10, %p5173_p2 }
  0xd2   : > { %p5176_p7 = pnand %p5175_p5, %p5169_p3 }
  0xd4   : > { %5179 = shalt.err (!%p5176_p7)
}
  0xd5   : > { %s5180_s25 = scalar_lea.vmem %s5688_s21, 512  ;;  %s5299_s4 = smov [#allocation7]  }
  0xd6   : > { %p5181_p6 = scmp.ne.s32.totalorder %s5688_s21, %s5180_s25  ;;  %s5185_s23 = sshll.u32 %s5299_s4, 4  ;;  %s5186_s23 = int_to_ptr.vmem [resolvable:$false] %s5185_s23 }
  0xd7   : > { %s5187_s30 = scalar_lea.vmem %s5186_s23, 1024  ;;  %p5188_p13 = scmp.lt.s32.totalorder %s5688_s21, %s5186_s23 }
  0xd8   : > { %p5183_p4 = pnand %p5181_p6, %p6470_p8  ;;  %p5189_p12 = scmp.lt.s32.totalorder %s5187_s30, %s5180_s25 }
  0xda   : > { %p5184_p1 = pneg %p5183_p4  ;;  %p5190_p9 = por %p5189_p12, %p5188_p13 }
  0xdc   : > { %p5191_p0 = pnand %p5190_p9, %p5184_p1 }
  0xde   : > { %5194 = shalt.err (!%p5191_p0)
}
  0xdf   : > { %4531 = dma.hbm_to_vmem [thread:$0]  (!%p6471_p11), %s5656_s27, 512, %s5688_s21, %s5568_s7, %s6466_s8, %s6466_s8, %s6465_s11  }
  0xe0   : > { %p6472_p8 = scmp.ne.s32.totalorder %s6452_s28, 0 }
  0xe1   : > { %s5718_s10 = sand.u32 (!%p6472_p8), 1, %s5273_s19   ;;  %p6473_p3 = scmp.ne.s32.totalorder (!%p6472_p8), %s6449_s26, 0 }
  0xe2   : > { %592 = sbr.rel (%p6472_p8) target bundleno = 3204 (0xc84), region = 80  ;;  %s5721_s17 = sshll.u32 (!%p6472_p8), %s5718_s10, 5 }
  0xe3   : > { %s595_s18 = scalar_lea.sflag (!%p6472_p8), [#allocation3], %s5718_s10  ;;  %s598_s3 = scalar_lea.vmem (!%p6472_p8), [#allocation2], %s5721_s17 }
  0xe9   : > { %5248 = dma.done.wait (%p6473_p3), %s595_s18, 512  }
  0xea   : > { %5250 = vsyncadd (%p6473_p3), %s595_s18, 4294966784  ;;  %s603_s7 = sand.u32 1, %s5433_s24   ;;  %s607_s11 = scalar_lea.vmem [#allocation5], %s5721_s17 }
  0xeb   : > { %s604_s28 = scalar_lea.sflag [#allocation6], %s603_s7 }
  0xec   : > { %5252 = dma.done.wait (%p6473_p3), %s604_s28, 1024  }
  0xed   : > { %5254 = vsyncadd (%p6473_p3), %s604_s28, 4294966272  ;;  %p6474_p11 = scmp.eq.s32.totalorder %s5433_s24, 0 }
  0xef   : > { %5256 = dma.done.wait (%p6474_p11), [#allocation9], 3072   ;;  %p6475_p2 = pmov %p6474_p11 }
  0xf1   : > { %5258 = vsyncadd (%p6475_p2), [#allocation9], 4294964224  ;;  %p6476_p10 = pmov %p6475_p2 }
  0xf2   : > { %p6477_p5 = pmov %p6475_p2 }
  0xf3   : > { %5260 = dma.done.wait (%p6476_p10), [#allocation12], 3072  }
  0xf4   : > { %5262 = vsyncadd (%p6477_p5), [#allocation12], 4294964224  ;;  %v5300_v0 = vmov 0.0   ;;  %v700_v1 = vld [vmem:[%s607_s11] sm:$0xff]  ;;  %s5301_s26 = smov 12   ;;  %v701_v3 = vld [vmem:[%s607_s11 + $0x8] sm:$0xff]  ;;  %v766_v9 = vlaneseq }
  0xf5   : > { %949 = vmatprep.mubr.f32.mxu1 %v5300_v0  ;;  %937 = vmatprep.mubr.f32.mxu0 %v5300_v0  ;;  %v696_v2 = vld [vmem:[%s598_s3] sm:$0xff]  ;;  %v697_v4 = vld [vmem:[%s598_s3 + $0x8] sm:$0xff]  ;;  %v699_v5 = vld [vmem:[%s598_s3 + $0x18] sm:$0xff]  ;;  %vm756_vm2 = vcmask 97280   ;;  %s5302_s24 = smov 127   ;;  %s5303_s8 = smov 126  }
  0xf6   : > { %728 = vrot.lane.b32.xlu1 %v700_v1, %s5301_s26  ;;  %712 = vrot.lane.b32.xlu0 %v696_v2, %s5301_s26  ;;  %v698_v6 = vld [vmem:[%s598_s3 + $0x10] sm:$0xff]  ;;  %v703_v7 = vld [vmem:[%s607_s11 + $0x18] sm:$0xff]  ;;  %v767_v10 = vand.u32 127, %v766_v9  ;;  %s6480_s15 = sld [smem:[#allocation30_spill]]  ;;  %v5304_v45 = vmov 0   ;;  %vm847_vm8 = vcmask 1039360  }
  0xf7   : > { %v702_v8 = vld [vmem:[%s607_s11 + $0x10] sm:$0xff]  ;;  %4661 = vset.pattern.permute.xlu0 %v5304_v45  ;;  %4662 = vset.pattern.permute.xlu1 %v5304_v45  ;;  %s6481_s25 = sld [smem:[#allocation29_spill]]  ;;  %vm860_vm9 = vcmask 261120   ;;  %vm1084_vm10 = vcmask 1031168   ;;  %s5305_s18 = smov 1   ;;  %vm1603_vm15 = vcmask 1022976  }
  0xf8   : > { %v770_v11 = vadd.s32 4294967284, %v767_v10  ;;  %s5306_s3 = smov 125   ;;  %s6482_s11 = sld [smem:[#allocation32_spill]] }
  0xf9   : > { %s6483_s22 = sld [smem:[#allocation31_spill]]  ;;  %s5307_s30 = smov 2  }
  0xfa   : > { %730 = vrot.lane.b32.xlu1 %v701_v3, %s5301_s26  ;;  %714 = vrot.lane.b32.xlu0 %v697_v4, %s5301_s26  ;;  %vm772_vm0 = vcmp.ge.s32.totalorder %v770_v11, 0  ;;  %vm774_vm1 = vcmp.lt.s32.totalorder %v770_v11, 64  ;;  %s5311_s5 = smov 122   ;;  %s6486_s4 = sld [smem:[#allocation35_spill]] }
  0xfb   : > { %vm5745_vm3 = vmand %vm772_vm0, %vm774_vm1  ;;  %s5314_s16 = smov 117   ;;  %s5315_s29 = smov 112  }
  0xfc   : > { %v1206_v43 = vld [vmem:[%s6480_s15] sm:$0xff]  ;;  %v1207_v44 = vld [vmem:[%s6480_s15 + $0x8] sm:$0xff]  ;;  %v1208_v46 = vld [vmem:[%s6480_s15 + $0x10] sm:$0xff]  ;;  %s5318_s7 = smov 115   ;;  %s6490_s14 = sld [smem:[#allocation21_spill]] }
  0xfd   : > { %v1209_v47 = vld [vmem:[%s6480_s15 + $0x18] sm:$0xff]  ;;  %s688_s23 = scalar_lea.vmem [#allocation14], %s5721_s17  ;;  %s6492_s28 = sld [smem:[#allocation39_spill]] }
  0xfe   : > { %718 = vrot.lane.b32.xlu1 %v699_v5, %s5301_s26  ;;  %716 = vrot.lane.b32.xlu0 %v698_v6, %s5301_s26  ;;  %s5319_s6 = smov [#allocation14]  }
  0xff   : > { %s6484_s1 = smov %s6483_s22 }
 0x102   : > { %734 = vrot.lane.b32.xlu1 %v703_v7, %s5301_s26  ;;  %732 = vrot.lane.b32.xlu0 %v702_v8, %s5301_s26  ;;  %v4146_v7 = vld [vmem:[%s6481_s25 + $0x30] sm:$0xff]  ;;  %v4144_v8 = vld [vmem:[%s6481_s25 + $0x20] sm:$0xff]  ;;  %s6485_s26 = sld [smem:[#allocation34_spill]] }
 0x168   : > { %v729_v13 = vpop.permute.xlu1 %728  ;;  %v713_v14 = vpop.permute.xlu0 %712 }
 0x169   : > { %v757_v15 = vsel %vm756_vm2, %v713_v14, %v729_v13 }
 0x16a   : > { %v5752_v16 = vsel %vm5745_vm3, %v757_v15, 0.0 }
 0x16b   : > { %vm790_vm4 = vcmp.ge.f32.partialorder %v5752_v16, 0.0  ;;  %v798_v17 = vmul.f32 0.1, %v5752_v16 }
 0x16c   : > { %v731_v18 = vpop.permute.xlu1 %730  ;;  %v715_v19 = vpop.permute.xlu0 %714 }
 0x16d   : > { %v758_v20 = vsel %vm756_vm2, %v715_v19, %v731_v18  ;;  %v806_v21 = vsel %vm790_vm4, %v5752_v16, %v798_v17  ;;  %v4147_v17 = vld [vmem:[%s6481_s25 + $0x38] sm:$0xff]  ;;  %v4145_v18 = vld [vmem:[%s6481_s25 + $0x28] sm:$0xff]  ;;  %v814_v19 = vld [vmem:[%s6481_s25] sm:$0xff] }
 0x16e   : > { %v5760_v22 = vsel %vm5745_vm3, %v758_v20, 0.0  ;;  %v4621_v23 = vpack.i.bf16 %v5300_v0, %v806_v21 }
 0x16f   : > { %vm792_vm5 = vcmp.ge.f32.partialorder %v5760_v22, 0.0  ;;  %v800_v24 = vmul.f32 0.1, %v5760_v22 }
 0x170   : > { %v719_v25 = vpop.permute.xlu1 %718  ;;  %4622 = vrot.lane.b32.xlu0 %v4621_v23, %s5302_s24  ;;  %v717_v26 = vpop.permute.xlu0 %716 }
 0x171   : > { %v808_v27 = vsel %vm792_vm5, %v5760_v22, %v800_v24  ;;  %vm1903_vm5 = vcmask 1006592  }
 0x172   : > { %v4626_v28 = vpack.i.bf16 %v5300_v0, %v808_v27  ;;  %v5768_v29 = vpack.c.bf16 %v808_v27, %v806_v21 }
 0x174   : > { %v735_v30 = vpop.permute.xlu1 %734  ;;  %4627 = vrot.lane.b32.xlu1 %v4626_v28, %s5302_s24  ;;  %v733_v31 = vpop.permute.xlu0 %732 }
 0x175   : > { %v760_v32 = vsel %vm756_vm2, %v719_v25, %v735_v30  ;;  %v759_v33 = vsel %vm756_vm2, %v717_v26, %v733_v31 }
 0x176   : > { %v5775_v34 = vsel %vm5745_vm3, %v760_v32, 0.0  ;;  %v5779_v35 = vsel %vm5745_vm3, %v759_v33, 0.0 }
 0x177   : > { %vm796_vm6 = vcmp.ge.f32.partialorder %v5775_v34, 0.0  ;;  %v804_v36 = vmul.f32 0.1, %v5775_v34  ;;  %vm794_vm7 = vcmp.ge.f32.partialorder %v5779_v35, 0.0  ;;  %v802_v37 = vmul.f32 0.1, %v5779_v35 }
 0x179   : > { %v812_v38 = vsel %vm796_vm6, %v5775_v34, %v804_v36  ;;  %v810_v39 = vsel %vm794_vm7, %v5779_v35, %v802_v37  ;;  %v817_v36 = vld [vmem:[%s6481_s25 + $0x18] sm:$0xff]  ;;  %vm2167_vm6 = vcmask 982016  }
 0x17a   : > { %v4636_v40 = vpack.i.bf16 %v5300_v0, %v812_v38  ;;  %v4631_v41 = vpack.i.bf16 %v5300_v0, %v810_v39  ;;  %v5789_v42 = vpack.c.bf16 %v812_v38, %v810_v39  ;;  %v4156_v38 = vld [vmem:[%s6481_s25 + $0x40] sm:$0xff]  ;;  %v4157_v39 = vld [vmem:[%s6481_s25 + $0x48] sm:$0xff] }
 0x17c   : > { %4637 = vrot.lane.b32.xlu1 %v4636_v40, %s5302_s24  ;;  %4632 = vrot.lane.b32.xlu0 %v4631_v41, %s5302_s24 }
 0x180   : > { %4647 = vrot.lane.b32.xlu1 %v4626_v28, %s5303_s8  ;;  %4642 = vrot.lane.b32.xlu0 %v4621_v23, %s5303_s8  ;;  %v815_v28 = vld [vmem:[%s6481_s25 + $0x8] sm:$0xff] }
 0x184   : > { %4657 = vrot.lane.b32.xlu1 %v4636_v40, %s5303_s8  ;;  %4652 = vrot.lane.b32.xlu0 %v4631_v41, %s5303_s8  ;;  %v4158_v40 = vld [vmem:[%s6481_s25 + $0x50] sm:$0xff]  ;;  %v4159_v41 = vld [vmem:[%s6481_s25 + $0x58] sm:$0xff] }
 0x188   : > { %1212 = vperm.xlu0 %4661, %v1206_v43   ;;  %1217 = vperm.xlu1 %4662, %v1207_v44  }
 0x18c   : > { %1222 = vperm.xlu1 %4662, %v1208_v46   ;;  %1227 = vperm.xlu0 %4661, %v1209_v47  }
 0x1e2   : > { %v4623_v48 = vpop.permute.xlu0 %4622 }
 0x1e3   : > { %v4624_v49 = vunpack.i.l.bf16 %v4623_v48  ;;  %v4625_v50 = vunpack.i.h.bf16 %v4623_v48 }
 0x1e5   : > { %v848_v55 = vsel %vm847_vm8, %v4624_v49, %v4625_v50 }
 0x1e6   : > { %v4628_v51 = vpop.permute.xlu1 %4627 }
 0x1e7   : > { %v4629_v52 = vunpack.i.l.bf16 %v4628_v51  ;;  %v4630_v53 = vunpack.i.h.bf16 %v4628_v51 }
 0x1e9   : > { %v4329_v54 = vpack.c.bf16 %v4630_v53, %v4625_v50  ;;  %v849_v56 = vsel %vm847_vm8, %v4629_v52, %v4630_v53 }
 0x1ea   : > { %v4331_v57 = vpack.c.bf16 %v849_v56, %v848_v55 }
 0x1eb   : > { %4330 = vmatprep.subr.bf16.mxu0 %v4329_v54  ;;  %4473 = vmatprep.subr.bf16.mxu1 %v4329_v54 }
 0x1ec   : > { %4332 = vmatpush1.bf16.msra.mxu0 %v4331_v57  ;;  %4475 = vmatpush1.bf16.msra.mxu1 %v4331_v57 }
 0x1ee   : > { %v4638_v58 = vpop.permute.xlu1 %4637  ;;  %v4633_v59 = vpop.permute.xlu0 %4632 }
 0x1ef   : > { %v4640_v60 = vunpack.i.h.bf16 %v4638_v58  ;;  %v4639_v61 = vunpack.i.l.bf16 %v4638_v58  ;;  %v4635_v62 = vunpack.i.h.bf16 %v4633_v59  ;;  %v4634_v63 = vunpack.i.l.bf16 %v4633_v59 }
 0x1f1   : > { %v4333_v1 = vpack.c.bf16 %v4640_v60, %v4635_v62  ;;  %v850_v2 = vsel %vm847_vm8, %v4634_v63, %v4635_v62  ;;  %v851_v3 = vsel %vm847_vm8, %v4639_v61, %v4640_v60 }
 0x1f2   : > { %v4648_v4 = vpop.permute.xlu1 %4647  ;;  %v4643_v5 = vpop.permute.xlu0 %4642  ;;  %v4335_v6 = vpack.c.bf16 %v851_v3, %v850_v2 }
 0x1f3   : > { %4334 = vmatprep.subr.bf16.mxu0 %v4333_v1  ;;  %4474 = vmatprep.subr.bf16.mxu1 %v4333_v1  ;;  %v4650_v9 = vunpack.i.h.bf16 %v4648_v4  ;;  %v4649_v10 = vunpack.i.l.bf16 %v4648_v4  ;;  %v4645_v11 = vunpack.i.h.bf16 %v4643_v5  ;;  %v4644_v13 = vunpack.i.l.bf16 %v4643_v5 }
 0x1f4   : > { %4336 = vmatpush1.bf16.msra.mxu0 %v4335_v6  ;;  %4476 = vmatpush1.bf16.msra.mxu1 %v4335_v6 }
 0x1f5   : > { %4338 = vmatprep.subr.bf16.mxu1 %v5768_v29  ;;  %v1086_v20 = vsel %vm1084_vm10, %v4649_v10, %v4650_v9  ;;  %v1085_v21 = vsel %vm1084_vm10, %v4644_v13, %v4645_v11  ;;  %v4345_v23 = vpack.c.bf16 %v4650_v9, %v4645_v11 }
 0x1f6   : > { %v4658_v14 = vpop.permute.xlu1 %4657  ;;  %v4653_v15 = vpop.permute.xlu0 %4652  ;;  %v4347_v30 = vpack.c.bf16 %v1086_v20, %v1085_v21 }
 0x1f7   : > { %4150 = vmatmul.mubr.msk.f32.vlgmr.msra.gmra.mrb[0].mxu1 %vm860_vm9, %v4146_v7  ;;  %4148 = vmatmul.mubr.msk.f32.vlgmr.msra.gmra.mrb[0].mxu0 %vm860_vm9, %v4144_v8  ;;  %v4660_v24 = vunpack.i.h.bf16 %v4658_v14  ;;  %v4659_v25 = vunpack.i.l.bf16 %v4658_v14  ;;  %v4655_v26 = vunpack.i.h.bf16 %v4653_v15  ;;  %v4654_v27 = vunpack.i.l.bf16 %v4653_v15 }
 0x1f8   : > { %4340 = vmatpush3.bf16.msra.mxu1 %v5768_v29  ;;  %955 = vmatprep.mubr.f32.mxu1 %v5300_v0  ;;  %v816_v29 = vld [vmem:[%s6481_s25 + $0x10] sm:$0xff] }
 0x1f9   : > { %4342 = vmatprep.subr.bf16.mxu1 %v5789_v42  ;;  %943 = vmatprep.mubr.f32.mxu0 %v5300_v0  ;;  %v1088_v31 = vsel %vm1084_vm10, %v4659_v25, %v4660_v24  ;;  %v1087_v32 = vsel %vm1084_vm10, %v4654_v27, %v4655_v26  ;;  %v4349_v33 = vpack.c.bf16 %v4660_v24, %v4655_v26 }
 0x1fa   : > { %v4351_v37 = vpack.c.bf16 %v1088_v31, %v1087_v32 }
 0x1fb   : > { %4151 = vmatmul.mubr.msk.f32.gmra.mrb[2].mxu1 %vm860_vm9, %v4147_v17  ;;  %4149 = vmatmul.mubr.msk.f32.gmra.mrb[2].mxu0 %vm860_vm9, %v4145_v18 }
 0x1fc   : > { %4344 = vmatpush3.bf16.msra.mxu1 %v5789_v42  ;;  %4281 = vmatprep.mubr.msk.f32.mxu1 %vm860_vm9, %v814_v19 }
 0x1fd   : > { %4346 = vmatprep.subr.bf16.mxu1 %v4345_v23  ;;  %1428 = vmatprep.mubr.f32.mxu0 %v5300_v0 }
 0x1ff   : > { %4282 = vmatmul.mubr.msk.f32.vlgmr.msra.gmra.mrb[4].mxu1 %vm860_vm9, %v815_v28 }
 0x200   : > { %4348 = vmatpush1.bf16.msra.mxu1 %v4347_v30  ;;  %4284 = vmatprep.mubr.msk.f32.mxu1 %vm860_vm9, %v816_v29 }
 0x201   : > { %4350 = vmatprep.subr.bf16.mxu1 %v4349_v33 }
 0x203   : > { %4285 = vmatmul.mubr.msk.f32.gmra.mrb[6].mxu1 %vm860_vm9, %v817_v36 }
 0x204   : > { %4352 = vmatpush1.bf16.msra.mxu1 %v4351_v37  ;;  %1173 = vmatprep.mubr.f32.mxu1 %v5300_v0 }
 0x207   : > { %4160 = vmatmul.mubr.msk.f32.vlgmr.msra.gmra.mrb[8].mxu1 %vm860_vm9, %v4156_v38  ;;  %v1213_v59 = vpop.permute.xlu0 %1212  ;;  %v1218_v62 = vpop.permute.xlu1 %1217 }
 0x208   : > { %1179 = vmatprep.mubr.f32.mxu1 %v5300_v0 }
 0x20b   : > { %4161 = vmatmul.mubr.msk.f32.gmra.mrb[10].mxu1 %vm860_vm9, %v4157_v39  ;;  %v1223_v6 = vpop.permute.xlu1 %1222  ;;  %v1228_v14 = vpop.permute.xlu0 %1227 }
 0x20c   : > { %1185 = vmatprep.mubr.f32.mxu1 %v5300_v0 }
 0x20f   : > { %4162 = vmatmul.mubr.msk.f32.gmra.mrb[12].mxu1 %vm860_vm9, %v4158_v40  ;;  %v1725_v40 = vld [vmem:[%s6482_s11] sm:$0xff] }
 0x210   : > { %1191 = vmatprep.mubr.f32.mxu1 %v5300_v0 }
 0x213   : > { %4163 = vmatmul.mubr.msk.f32.gmra.mrb[14].mxu1 %vm860_vm9, %v4159_v41  ;;  %v1727_v41 = vld [vmem:[%s6482_s11 + $0x10] sm:$0xff] }
 0x214   : > { %1557 = vmatprep.mubr.f32.mxu1 %v5300_v0 }
 0x2ca   : > { %v951_v42 = vpop.f32.mrb[0].mxu1  ;;  %v939_v43 = vpop.f32.mrb[0].mxu0 }
 0x2cb   : > { %v953_v44 = vpop.f32.mrb[1].mxu1  ;;  %v941_v45 = vpop.f32.mrb[1].mxu0 }
 0x2ce   : > { %v957_v46 = vpop.f32.mrb[2].mxu1  ;;  %v945_v47 = vpop.f32.mrb[2].mxu0 }
 0x2cf   : > { %v959_v48 = vpop.f32.mrb[3].mxu1  ;;  %v947_v49 = vpop.f32.mrb[3].mxu0 }
 0x2d2   : > { %v4283_v50 = vpop.f32.mrb[4].mxu1 }
 0x2d3   : > { %v1047_v51 = vadd.f32 %v4283_v50, %v945_v47  ;;  %v1040_v52 = vpop.f32.mrb[5].mxu1 }
 0x2d4   : > { %v1041_v53 = vadd.f32 %v1040_v52, %v939_v43  ;;  %v1728_v43 = vld [vmem:[%s6482_s11 + $0x18] sm:$0xff] }
 0x2d6   : > { %v4286_v54 = vpop.f32.mrb[6].mxu1 }
 0x2d7   : > { %v1059_v55 = vadd.f32 %v4286_v54, %v957_v46  ;;  %v1052_v56 = vpop.f32.mrb[7].mxu1 }
 0x2d8   : > { %v1053_v57 = vadd.f32 %v1052_v56, %v951_v42  ;;  %v1726_v42 = vld [vmem:[%s6482_s11 + $0x8] sm:$0xff] }
 0x2da   : > { %v1175_v58 = vpop.f32.mrb[8].mxu1 }
 0x2db   : > { %v1198_v60 = vadd.f32 %v1175_v58, %v1041_v53  ;;  %v1177_v61 = vpop.f32.mrb[9].mxu1 }
 0x2dd   : > { %v1230_v63 = vadd.f32 %v1213_v59, %v1198_v60 }
 0x2de   : > { %v1181_v1 = vpop.f32.mrb[10].mxu1 }
 0x2df   : > { %v1200_v2 = vadd.f32 %v1181_v1, %v1047_v51  ;;  %v1183_v3 = vpop.f32.mrb[11].mxu1  ;;  %1246 = vrot.lane.b32.xlu1 %v1230_v63, %s5305_s18 }
 0x2e1   : > { %v1232_v4 = vadd.f32 %v1218_v62, %v1200_v2 }
 0x2e2   : > { %v1187_v5 = vpop.f32.mrb[12].mxu1 }
 0x2e3   : > { %v1202_v7 = vadd.f32 %v1187_v5, %v1053_v57  ;;  %v1189_v8 = vpop.f32.mrb[13].mxu1  ;;  %1250 = vrot.lane.b32.xlu0 %v1232_v4, %s5305_s18  ;;  %v4164_v5 = vld [vmem:[%s6483_s22 + $0x20] sm:$0xff]  ;;  %s5312_s22 = smov 121  }
 0x2e5   : > { %v1234_v9 = vadd.f32 %v1223_v6, %v1202_v7 }
 0x2e6   : > { %v1193_v10 = vpop.f32.mrb[14].mxu1 }
 0x2e7   : > { %v1204_v11 = vadd.f32 %v1193_v10, %v1059_v55  ;;  %v1195_v13 = vpop.f32.mrb[15].mxu1  ;;  %1254 = vrot.lane.b32.xlu1 %v1234_v9, %s5305_s18 }
 0x2e9   : > { %v1236_v15 = vadd.f32 %v1228_v14, %v1204_v11 }
 0x2eb   : > { %1258 = vrot.lane.b32.xlu0 %v1236_v15, %s5305_s18  ;;  %s5308_s18 = smov 123  }
 0x351   : > { %v1247_v17 = vpop.permute.xlu1 %1246 }
 0x352   : > { %v1275_v18 = vsel %vm5745_vm3, %v1247_v17, 0.0 }
 0x353   : > { %vm1283_vm11 = vcmp.ge.f32.partialorder %v1275_v18, 0.0  ;;  %v1291_v19 = vmul.f32 0.1, %v1275_v18 }
 0x355   : > { %v1299_v20 = vsel %vm1283_vm11, %v1275_v18, %v1291_v19  ;;  %v1251_v21 = vpop.permute.xlu0 %1250  ;;  %v4165_v19 = vld [vmem:[%s6484_s1 + $0x28] sm:$0xff] }
 0x356   : > { %v1277_v23 = vsel %vm5745_vm3, %v1251_v21, 0.0  ;;  %v4663_v24 = vpack.i.bf16 %v5300_v0, %v1299_v20 }
 0x357   : > { %vm1285_vm12 = vcmp.ge.f32.partialorder %v1277_v23, 0.0  ;;  %v1293_v25 = vmul.f32 0.1, %v1277_v23 }
 0x358   : > { %4664 = vrot.lane.b32.xlu1 %v4663_v24, %s5303_s8 }
 0x359   : > { %v1301_v26 = vsel %vm1285_vm12, %v1277_v23, %v1293_v25  ;;  %v1255_v27 = vpop.permute.xlu1 %1254  ;;  %vm2423_vm12 = vcmask 998400  }
 0x35a   : > { %v1279_v28 = vsel %vm5745_vm3, %v1255_v27, 0.0  ;;  %v4668_v29 = vpack.i.bf16 %v5300_v0, %v1301_v26 }
 0x35b   : > { %vm1287_vm13 = vcmp.ge.f32.partialorder %v1279_v28, 0.0  ;;  %v1295_v30 = vmul.f32 0.1, %v1279_v28 }
 0x35c   : > { %4669 = vrot.lane.b32.xlu0 %v4668_v29, %s5303_s8 }
 0x35d   : > { %v1303_v31 = vsel %vm1287_vm13, %v1279_v28, %v1295_v30  ;;  %v1259_v32 = vpop.permute.xlu0 %1258  ;;  %v4166_v30 = vld [vmem:[%s6484_s1 + $0x30] sm:$0xff]  ;;  %vm2687_vm13 = vcmask 990208  }
 0x35e   : > { %v1281_v33 = vsel %vm5745_vm3, %v1259_v32, 0.0  ;;  %v4673_v36 = vpack.i.bf16 %v5300_v0, %v1303_v31 }
 0x35f   : > { %vm1289_vm14 = vcmp.ge.f32.partialorder %v1281_v33, 0.0  ;;  %v1297_v37 = vmul.f32 0.1, %v1281_v33 }
 0x360   : > { %4674 = vrot.lane.b32.xlu1 %v4673_v36, %s5303_s8 }
 0x361   : > { %v1305_v38 = vsel %vm1289_vm14, %v1281_v33, %v1297_v37 }
 0x362   : > { %v4683_v39 = vpack.i.bf16 %v5300_v0, %v1305_v38 }
 0x364   : > { %4679 = vrot.lane.b32.xlu1 %v4663_v24, %s5302_s24  ;;  %4684 = vrot.lane.b32.xlu0 %v4683_v39, %s5303_s8 }
 0x368   : > { %4694 = vrot.lane.b32.xlu1 %v4663_v24, %s5306_s3  ;;  %4689 = vrot.lane.b32.xlu0 %v4668_v29, %s5302_s24 }
 0x36c   : > { %4704 = vrot.lane.b32.xlu1 %v4673_v36, %s5302_s24  ;;  %4699 = vrot.lane.b32.xlu0 %v4668_v29, %s5306_s3 }
 0x370   : > { %4709 = vrot.lane.b32.xlu1 %v4673_v36, %s5306_s3  ;;  %4714 = vrot.lane.b32.xlu0 %v4683_v39, %s5302_s24  ;;  %s6487_s24 = sld [smem:[#allocation37_spill]] }
 0x374   : > { %1731 = vperm.xlu1 %4662, %v1725_v40   ;;  %4719 = vrot.lane.b32.xlu0 %v4683_v39, %s5306_s3  ;;  %s5309_s3 = smov 120  }
 0x378   : > { %1741 = vperm.xlu1 %4662, %v1727_v41   ;;  %1736 = vperm.xlu0 %4661, %v1726_v42   ;;  %v4167_v41 = vld [vmem:[%s6484_s1 + $0x38] sm:$0xff]  ;;  %v1307_v42 = vld [vmem:[%s6484_s1] sm:$0xff] }
 0x37c   : > { %1765 = vrot.lane.b32.xlu1 %v5752_v16, %s5303_s8  ;;  %1746 = vperm.xlu0 %4661, %v1728_v43  }
 0x380   : > { %1769 = vrot.lane.b32.xlu1 %v5760_v22, %s5303_s8  ;;  %4724 = vrot.lane.b32.xlu0 %v5300_v0, %s5303_s8 }
 0x384   : > { %1773 = vrot.lane.b32.xlu0 %v5779_v35, %s5303_s8  ;;  %4729 = vrot.lane.b32.xlu1 %v5300_v0, %s5303_s8 }
 0x388   : > { %1777 = vrot.lane.b32.xlu0 %v5775_v34, %s5303_s8 }
 0x3ca   : > { %v4665_v44 = vpop.permute.xlu1 %4664 }
 0x3cb   : > { %v4667_v45 = vunpack.i.h.bf16 %v4665_v44  ;;  %v4666_v46 = vunpack.i.l.bf16 %v4665_v44 }
 0x3cd   : > { %v1340_v22 = vsel %vm1084_vm10, %v4666_v46, %v4667_v45 }
 0x3ce   : > { %v4670_v16 = vpop.permute.xlu0 %4669 }
 0x3cf   : > { %v4672_v47 = vunpack.i.h.bf16 %v4670_v16  ;;  %v4671_v48 = vunpack.i.l.bf16 %v4670_v16  ;;  %v1308_v16 = vld [vmem:[%s6484_s1 + $0x8] sm:$0xff] }
 0x3d1   : > { %v1341_v49 = vsel %vm1084_vm10, %v4671_v48, %v4672_v47  ;;  %v4353_v50 = vpack.c.bf16 %v4672_v47, %v4667_v45  ;;  %v4176_v47 = vld [vmem:[%s6484_s1 + $0x40] sm:$0xff]  ;;  %v1309_v48 = vld [vmem:[%s6484_s1 + $0x10] sm:$0xff] }
 0x3d2   : > { %v4675_v51 = vpop.permute.xlu1 %4674  ;;  %v4355_v52 = vpack.c.bf16 %v1341_v49, %v1340_v22  ;;  %v4177_v22 = vld [vmem:[%s6484_s1 + $0x48] sm:$0xff]  ;;  %v1310_v49 = vld [vmem:[%s6484_s1 + $0x18] sm:$0xff] }
 0x3d3   : > { %4354 = vmatprep.subr.bf16.mxu0 %v4353_v50  ;;  %v4677_v35 = vunpack.i.h.bf16 %v4675_v51  ;;  %v4676_v53 = vunpack.i.l.bf16 %v4675_v51  ;;  %v4178_v50 = vld [vmem:[%s6484_s1 + $0x50] sm:$0xff]  ;;  %v4179_v51 = vld [vmem:[%s6484_s1 + $0x58] sm:$0xff] }
 0x3d4   : > { %4356 = vmatpush1.bf16.msra.mxu0 %v4355_v52 }
 0x3d5   : > { %v1342_v59 = vsel %vm1084_vm10, %v4676_v53, %v4677_v35 }
 0x3d6   : > { %v4680_v54 = vpop.permute.xlu1 %4679  ;;  %v4685_v55 = vpop.permute.xlu0 %4684 }
 0x3d7   : > { %v4687_v34 = vunpack.i.h.bf16 %v4685_v55  ;;  %v4686_v56 = vunpack.i.l.bf16 %v4685_v55  ;;  %v4682_v57 = vunpack.i.h.bf16 %v4680_v54  ;;  %v4681_v58 = vunpack.i.l.bf16 %v4680_v54 }
 0x3d9   : > { %v1343_v60 = vsel %vm1084_vm10, %v4686_v56, %v4687_v34  ;;  %v4357_v61 = vpack.c.bf16 %v4687_v34, %v4677_v35  ;;  %v1469_v4 = vsel %vm847_vm8, %v4681_v58, %v4682_v57 }
 0x3da   : > { %v4695_v62 = vpop.permute.xlu1 %4694  ;;  %v4690_v63 = vpop.permute.xlu0 %4689  ;;  %v4359_v1 = vpack.c.bf16 %v1343_v60, %v1342_v59 }
 0x3db   : > { %v4692_v2 = vunpack.i.h.bf16 %v4690_v63  ;;  %v4691_v3 = vunpack.i.l.bf16 %v4690_v63  ;;  %4358 = vmatprep.subr.bf16.mxu0 %v4357_v61  ;;  %v4697_v6 = vunpack.i.h.bf16 %v4695_v62  ;;  %v4696_v7 = vunpack.i.l.bf16 %v4695_v62 }
 0x3dc   : > { %4360 = vmatpush1.bf16.msra.mxu0 %v4359_v1 }
 0x3dd   : > { %v1470_v8 = vsel %vm847_vm8, %v4691_v3, %v4692_v2  ;;  %v4361_v9 = vpack.c.bf16 %v4692_v2, %v4682_v57  ;;  %v1604_v20 = vsel %vm1603_vm15, %v4696_v7, %v4697_v6 }
 0x3de   : > { %v4705_v10 = vpop.permute.xlu1 %4704  ;;  %v4700_v11 = vpop.permute.xlu0 %4699  ;;  %v4363_v13 = vpack.c.bf16 %v1470_v8, %v1469_v4 }
 0x3df   : > { %v4702_v14 = vunpack.i.h.bf16 %v4700_v11  ;;  %v4701_v15 = vunpack.i.l.bf16 %v4700_v11  ;;  %4168 = vmatmul.mubr.msk.f32.vlgmr.msra.gmra.mrb[4].mxu0 %vm860_vm9, %v4164_v5  ;;  %4362 = vmatprep.subr.bf16.mxu1 %v4361_v9  ;;  %v4707_v17 = vunpack.i.h.bf16 %v4705_v10  ;;  %v4706_v18 = vunpack.i.l.bf16 %v4705_v10 }
 0x3e0   : > { %4364 = vmatpush1.bf16.msra.mxu1 %v4363_v13  ;;  %1434 = vmatprep.mubr.f32.mxu0 %v5300_v0 }
 0x3e1   : > { %v1605_v21 = vsel %vm1603_vm15, %v4701_v15, %v4702_v14  ;;  %v4369_v23 = vpack.c.bf16 %v4702_v14, %v4697_v6  ;;  %v1471_v29 = vsel %vm847_vm8, %v4706_v18, %v4707_v17 }
 0x3e2   : > { %v4710_v24 = vpop.permute.xlu1 %4709  ;;  %v4715_v25 = vpop.permute.xlu0 %4714  ;;  %v4371_v26 = vpack.c.bf16 %v1605_v21, %v1604_v20 }
 0x3e3   : > { %v4717_v27 = vunpack.i.h.bf16 %v4715_v25  ;;  %v4716_v28 = vunpack.i.l.bf16 %v4715_v25  ;;  %4169 = vmatmul.mubr.msk.f32.gmra.mrb[6].mxu0 %vm860_vm9, %v4165_v19  ;;  %4370 = vmatprep.subr.bf16.mxu0 %v4369_v23  ;;  %v4712_v31 = vunpack.i.h.bf16 %v4710_v24  ;;  %v4711_v32 = vunpack.i.l.bf16 %v4710_v24 }
 0x3e4   : > { %4372 = vmatpush1.bf16.msra.mxu0 %v4371_v26  ;;  %1440 = vmatprep.mubr.f32.mxu0 %v5300_v0 }
 0x3e5   : > { %v1472_v33 = vsel %vm847_vm8, %v4716_v28, %v4717_v27  ;;  %v4365_v36 = vpack.c.bf16 %v4717_v27, %v4707_v17  ;;  %v1606_v43 = vsel %vm1603_vm15, %v4711_v32, %v4712_v31 }
 0x3e6   : > { %v4720_v37 = vpop.permute.xlu0 %4719  ;;  %v4367_v38 = vpack.c.bf16 %v1472_v33, %v1471_v29 }
 0x3e7   : > { %v4722_v39 = vunpack.i.h.bf16 %v4720_v37  ;;  %v4721_v40 = vunpack.i.l.bf16 %v4720_v37  ;;  %4170 = vmatmul.mubr.msk.f32.gmra.mrb[8].mxu0 %vm860_vm9, %v4166_v30  ;;  %4366 = vmatprep.subr.bf16.mxu1 %v4365_v36 }
 0x3e8   : > { %4368 = vmatpush1.bf16.msra.mxu1 %v4367_v38  ;;  %1446 = vmatprep.mubr.f32.mxu0 %v5300_v0 }
 0x3e9   : > { %v1607_v44 = vsel %vm1603_vm15, %v4721_v40, %v4722_v39  ;;  %v4373_v45 = vpack.c.bf16 %v4722_v39, %v4712_v31 }
 0x3ea   : > { %v4375_v46 = vpack.c.bf16 %v1607_v44, %v1606_v43 }
 0x3eb   : > { %4171 = vmatmul.mubr.msk.f32.gmra.mrb[10].mxu0 %vm860_vm9, %v4167_v41  ;;  %4172 = vmatmul.mubr.msk.f32.vlgmr.msra.gmra.mrb[16].mxu1 %vm860_vm9, %v1307_v42 }
 0x3ec   : > { %4374 = vmatprep.subr.bf16.mxu0 %v4373_v45  ;;  %1563 = vmatprep.mubr.f32.mxu1 %v5300_v0 }
 0x3ed   : > { %4376 = vmatpush1.bf16.msra.mxu0 %v4375_v46  ;;  %1692 = vmatprep.mubr.f32.mxu0 %v5300_v0 }
 0x3ef   : > { %4173 = vmatmul.mubr.msk.f32.gmra.mrb[18].mxu1 %vm860_vm9, %v1308_v16 }
 0x3f0   : > { %4180 = vmatmul.mubr.msk.f32.vlgmr.msra.gmra.mrb[12].mxu0 %vm860_vm9, %v4176_v47  ;;  %1569 = vmatprep.mubr.f32.mxu1 %v5300_v0 }
 0x3f1   : > { %1698 = vmatprep.mubr.f32.mxu0 %v5300_v0 }
 0x3f3   : > { %4174 = vmatmul.mubr.msk.f32.gmra.mrb[20].mxu1 %vm860_vm9, %v1309_v48  ;;  %v1732_v52 = vpop.permute.xlu1 %1731 }
 0x3f4   : > { %4181 = vmatmul.mubr.msk.f32.gmra.mrb[14].mxu0 %vm860_vm9, %v4177_v22  ;;  %1575 = vmatprep.mubr.f32.mxu1 %v5300_v0 }
 0x3f5   : > { %1704 = vmatprep.mubr.f32.mxu0 %v5300_v0 }
 0x3f7   : > { %4175 = vmatmul.mubr.msk.f32.gmra.mrb[22].mxu1 %vm860_vm9, %v1310_v49  ;;  %v1737_v54 = vpop.permute.xlu0 %1736  ;;  %v1742_v55 = vpop.permute.xlu1 %1741 }
 0x3f8   : > { %4182 = vmatmul.mubr.msk.f32.gmra.mrb[16].mxu0 %vm860_vm9, %v4178_v50  ;;  %1992 = vmatprep.mubr.f32.mxu1 %v5300_v0 }
 0x3f9   : > { %1710 = vmatprep.mubr.f32.mxu0 %v5300_v0 }
 0x3fb   : > { %v1747_v57 = vpop.permute.xlu0 %1746  ;;  %v1766_v60 = vpop.permute.xlu1 %1765 }
 0x3fc   : > { %4183 = vmatmul.mubr.msk.f32.gmra.mrb[18].mxu0 %vm860_vm9, %v4179_v51 }
 0x3fd   : > { %2121 = vmatprep.mubr.f32.mxu0 %v5300_v0 }
 0x3ff   : > { %v4725_v3 = vpop.permute.xlu0 %4724  ;;  %v1770_v4 = vpop.permute.xlu1 %1769 }
 0x400   : > { %v4726_v6 = vunpack.i.l.bf16 %v4725_v3  ;;  %v4727_v15 = vunpack.i.h.bf16 %v4725_v3  ;;  %v2289_v3 = vld [vmem:[%s6485_s26] sm:$0xff] }
 0x402   : > { %v1781_v20 = vsel %vm1084_vm10, %v1766_v60, %v4726_v6  ;;  %v1782_v33 = vsel %vm1084_vm10, %v1770_v4, %v4727_v15  ;;  %v2291_v4 = vld [vmem:[%s6485_s26 + $0x10] sm:$0xff]  ;;  %v2292_v6 = vld [vmem:[%s6485_s26 + $0x18] sm:$0xff] }
 0x403   : > { %v4730_v21 = vpop.permute.xlu1 %4729  ;;  %v1774_v26 = vpop.permute.xlu0 %1773 }
 0x404   : > { %v4731_v29 = vunpack.i.l.bf16 %v4730_v21  ;;  %v4732_v40 = vunpack.i.h.bf16 %v4730_v21 }
 0x406   : > { %v1783_v41 = vsel %vm1084_vm10, %v1774_v26, %v4731_v29 }
 0x407   : > { %v1778_v43 = vpop.permute.xlu0 %1777 }
 0x408   : > { %v1784_v47 = vsel %vm1084_vm10, %v1778_v43, %v4732_v40  ;;  %v1875_v40 = vld [vmem:[#allocation8 + $0x20] sm:$0xff] }
 0x4b2   : > { %v1430_v35 = vpop.f32.mrb[4].mxu0 }
 0x4b3   : > { %v1432_v53 = vpop.f32.mrb[5].mxu0 }
 0x4b6   : > { %v1436_v34 = vpop.f32.mrb[6].mxu0 }
 0x4b7   : > { %v1438_v56 = vpop.f32.mrb[7].mxu0 }
 0x4ba   : > { %v1442_v58 = vpop.f32.mrb[8].mxu0 }
 0x4bb   : > { %v1444_v59 = vpop.f32.mrb[9].mxu0 }
 0x4be   : > { %v1448_v61 = vpop.f32.mrb[10].mxu0  ;;  %v1559_v62 = vpop.f32.mrb[16].mxu1 }
 0x4bf   : > { %v1560_v63 = vadd.f32 %v1559_v62, %v1430_v35  ;;  %v1450_v1 = vpop.f32.mrb[11].mxu0  ;;  %v1561_v2 = vpop.f32.mrb[17].mxu1 }
 0x4c2   : > { %v1565_v5 = vpop.f32.mrb[18].mxu1 }
 0x4c3   : > { %v1566_v7 = vadd.f32 %v1565_v5, %v1436_v34  ;;  %v1694_v8 = vpop.f32.mrb[12].mxu0  ;;  %v1567_v9 = vpop.f32.mrb[19].mxu1  ;;  %v2290_v5 = vld [vmem:[%s6485_s26 + $0x8] sm:$0xff] }
 0x4c4   : > { %v1717_v10 = vadd.f32 %v1694_v8, %v1560_v63  ;;  %v1696_v11 = vpop.f32.mrb[13].mxu0 }
 0x4c6   : > { %v1749_v13 = vadd.f32 %v1732_v52, %v1717_v10  ;;  %v1571_v14 = vpop.f32.mrb[20].mxu1 }
 0x4c7   : > { %v1572_v17 = vadd.f32 %v1571_v14, %v1442_v58  ;;  %v1700_v18 = vpop.f32.mrb[14].mxu0  ;;  %v1573_v19 = vpop.f32.mrb[21].mxu1 }
 0x4c8   : > { %v1719_v23 = vadd.f32 %v1700_v18, %v1566_v7  ;;  %v1702_v24 = vpop.f32.mrb[15].mxu0  ;;  %v1793_v25 = vadd.f32 %v1781_v20, %v1749_v13 }
 0x4ca   : > { %v1751_v27 = vadd.f32 %v1737_v54, %v1719_v23  ;;  %1809 = vrot.lane.b32.xlu1 %v1793_v25, %s5307_s30  ;;  %v1577_v28 = vpop.f32.mrb[22].mxu1 }
 0x4cb   : > { %v1578_v30 = vadd.f32 %v1577_v28, %v1448_v61  ;;  %v1706_v31 = vpop.f32.mrb[16].mxu0  ;;  %v1579_v32 = vpop.f32.mrb[23].mxu1 }
 0x4cc   : > { %v1721_v36 = vadd.f32 %v1706_v31, %v1572_v17  ;;  %v1708_v37 = vpop.f32.mrb[17].mxu0  ;;  %v1795_v38 = vadd.f32 %v1782_v33, %v1751_v27 }
 0x4ce   : > { %v1753_v39 = vadd.f32 %v1742_v55, %v1721_v36  ;;  %1813 = vrot.lane.b32.xlu0 %v1795_v38, %s5307_s30 }
 0x4cf   : > { %v1712_v42 = vpop.f32.mrb[18].mxu0 }
 0x4d0   : > { %v1723_v44 = vadd.f32 %v1712_v42, %v1578_v30  ;;  %v1714_v45 = vpop.f32.mrb[19].mxu0  ;;  %v1797_v46 = vadd.f32 %v1783_v41, %v1753_v39 }
 0x4d2   : > { %v1755_v16 = vadd.f32 %v1747_v57, %v1723_v44  ;;  %1817 = vrot.lane.b32.xlu1 %v1797_v46, %s5307_s30 }
 0x4d4   : > { %v1799_v48 = vadd.f32 %v1784_v47, %v1755_v16 }
 0x4d6   : > { %1821 = vrot.lane.b32.xlu0 %v1799_v48, %s5307_s30  ;;  %s3948_s30 = sshll.u32 %s688_s23, 4  ;;  %s6328_s30 = int_to_ptr.vmem [resolvable:$true] %s3948_s30 }
 0x4d7   : > { %s5195_s21 = scalar_lea.vmem %s6328_s30, 512 }
 0x4d8   : > { %p5196_p7 = scmp.ne.s32.totalorder %s6328_s30, %s5195_s21 }
 0x53c   : > { %v1810_v22 = vpop.permute.xlu1 %1809 }
 0x53d   : > { %v5999_v49 = vsel %vm5745_vm3, %v1810_v22, 0.0 }
 0x53e   : > { %vm1846_vm0 = vcmp.ge.f32.partialorder %v5999_v49, 0.0  ;;  %v1854_v50 = vmul.f32 0.1, %v5999_v49 }
 0x540   : > { %v1862_v51 = vsel %vm1846_vm0, %v5999_v49, %v1854_v50  ;;  %v1814_v52 = vpop.permute.xlu0 %1813 }
 0x541   : > { %v6006_v35 = vsel %vm5745_vm3, %v1814_v52, 0.0  ;;  %v4733_v53 = vpack.i.bf16 %v5300_v0, %v1862_v51  ;;  %v1876_v51 = vld [vmem:[#allocation8 + $0x28] sm:$0xff] }
 0x542   : > { %vm1848_vm1 = vcmp.ge.f32.partialorder %v6006_v35, 0.0  ;;  %v1856_v54 = vmul.f32 0.1, %v6006_v35 }
 0x543   : > { %4734 = vrot.lane.b32.xlu1 %v4733_v53, %s5308_s18 }
 0x544   : > { %v1864_v55 = vsel %vm1848_vm1, %v6006_v35, %v1856_v54  ;;  %v1818_v34 = vpop.permute.xlu1 %1817 }
 0x545   : > { %v6015_v56 = vsel %vm5745_vm3, %v1818_v34, 0.0  ;;  %v4738_v57 = vpack.i.bf16 %v5300_v0, %v1864_v55 }
 0x546   : > { %vm1850_vm2 = vcmp.ge.f32.partialorder %v6015_v56, 0.0  ;;  %v1858_v58 = vmul.f32 0.1, %v6015_v56 }
 0x547   : > { %4739 = vrot.lane.b32.xlu0 %v4738_v57, %s5308_s18 }
 0x548   : > { %v1866_v59 = vsel %vm1850_vm2, %v6015_v56, %v1858_v58  ;;  %v1822_v60 = vpop.permute.xlu0 %1821  ;;  %vm2987_vm2 = vcmask 957440  }
 0x549   : > { %v6024_v61 = vsel %vm5745_vm3, %v1822_v60, 0.0  ;;  %v4743_v62 = vpack.i.bf16 %v5300_v0, %v1866_v59 }
 0x54a   : > { %vm1852_vm4 = vcmp.ge.f32.partialorder %v6024_v61, 0.0  ;;  %v1860_v63 = vmul.f32 0.1, %v6024_v61 }
 0x54b   : > { %4744 = vrot.lane.b32.xlu1 %v4743_v62, %s5308_s18 }
 0x54c   : > { %v1868_v1 = vsel %vm1852_vm4, %v6024_v61, %v1860_v63  ;;  %vm3251_vm4 = vcmask 916480  }
 0x54d   : > { %v4753_v2 = vpack.i.bf16 %v5300_v0, %v1868_v1 }
 0x54f   : > { %4749 = vrot.lane.b32.xlu1 %v4733_v53, %s5303_s8  ;;  %4754 = vrot.lane.b32.xlu0 %v4753_v2, %s5308_s18 }
 0x553   : > { %4764 = vrot.lane.b32.xlu1 %v4733_v53, %s5309_s3  ;;  %4759 = vrot.lane.b32.xlu0 %v4738_v57, %s5303_s8 }
 0x557   : > { %4774 = vrot.lane.b32.xlu1 %v4743_v62, %s5303_s8  ;;  %4769 = vrot.lane.b32.xlu0 %v4738_v57, %s5309_s3 }
 0x55b   : > { %4779 = vrot.lane.b32.xlu1 %v4743_v62, %s5309_s3  ;;  %4784 = vrot.lane.b32.xlu0 %v4753_v2, %s5303_s8  ;;  %v1877_v62 = vld [vmem:[#allocation8 + $0x30] sm:$0xff]  ;;  %s5310_s8 = smov 5  }
 0x55f   : > { %2295 = vperm.xlu1 %4662, %v2289_v3   ;;  %4789 = vrot.lane.b32.xlu0 %v4753_v2, %s5309_s3  ;;  %s5317_s3 = smov 116  }
 0x563   : > { %2305 = vperm.xlu1 %4662, %v2291_v4   ;;  %2300 = vperm.xlu0 %4661, %v2290_v5  }
 0x567   : > { %2310 = vperm.xlu0 %4661, %v2292_v6  }
 0x5b5   : > { %v4735_v7 = vpop.permute.xlu1 %4734 }
 0x5b6   : > { %v4737_v8 = vunpack.i.h.bf16 %v4735_v7  ;;  %v4736_v9 = vunpack.i.l.bf16 %v4735_v7 }
 0x5b8   : > { %v1904_v14 = vsel %vm1903_vm5, %v4736_v9, %v4737_v8  ;;  %v1870_v9 = vld [vmem:[#allocation8] sm:$0xff] }
 0x5b9   : > { %v4740_v10 = vpop.permute.xlu0 %4739 }
 0x5ba   : > { %v4742_v11 = vunpack.i.h.bf16 %v4740_v10  ;;  %v4741_v13 = vunpack.i.l.bf16 %v4740_v10 }
 0x5bc   : > { %v4377_v15 = vpack.c.bf16 %v4742_v11, %v4737_v8  ;;  %v1905_v17 = vsel %vm1903_vm5, %v4741_v13, %v4742_v11  ;;  %v1878_v8 = vld [vmem:[#allocation8 + $0x38] sm:$0xff] }
 0x5bd   : > { %v4379_v18 = vpack.c.bf16 %v1905_v17, %v1904_v14  ;;  %v4745_v19 = vpop.permute.xlu1 %4744  ;;  %v2147_v17 = vld [vmem:[#allocation8 + $0x40] sm:$0xff] }
 0x5be   : > { %4378 = vmatprep.subr.bf16.mxu1 %v4377_v15  ;;  %v4747_v20 = vunpack.i.h.bf16 %v4745_v19  ;;  %v4746_v21 = vunpack.i.l.bf16 %v4745_v19  ;;  %v1871_v15 = vld [vmem:[#allocation8 + $0x8] sm:$0xff] }
 0x5bf   : > { %4380 = vmatpush1.bf16.msra.mxu1 %v4379_v18  ;;  %v1872_v18 = vld [vmem:[#allocation8 + $0x10] sm:$0xff]  ;;  %v2148_v19 = vld [vmem:[#allocation8 + $0x48] sm:$0xff] }
 0x5c0   : > { %v1906_v29 = vsel %vm1903_vm5, %v4746_v21, %v4747_v20  ;;  %v2149_v21 = vld [vmem:[#allocation8 + $0x50] sm:$0xff] }
 0x5c1   : > { %v4750_v23 = vpop.permute.xlu1 %4749  ;;  %v4755_v24 = vpop.permute.xlu0 %4754 }
 0x5c2   : > { %v4757_v25 = vunpack.i.h.bf16 %v4755_v24  ;;  %v4756_v26 = vunpack.i.l.bf16 %v4755_v24  ;;  %v4752_v27 = vunpack.i.h.bf16 %v4750_v23  ;;  %v4751_v28 = vunpack.i.l.bf16 %v4750_v23  ;;  %v2150_v23 = vld [vmem:[#allocation8 + $0x58] sm:$0xff] }
 0x5c4   : > { %v4381_v30 = vpack.c.bf16 %v4757_v25, %v4747_v20  ;;  %v1907_v31 = vsel %vm1903_vm5, %v4756_v26, %v4757_v25  ;;  %v2033_v39 = vsel %vm1084_vm10, %v4751_v28, %v4752_v27  ;;  %v1873_v20 = vld [vmem:[#allocation8 + $0x18] sm:$0xff] }
 0x5c5   : > { %v4383_v32 = vpack.c.bf16 %v1907_v31, %v1906_v29  ;;  %v4765_v33 = vpop.permute.xlu1 %4764  ;;  %v4760_v36 = vpop.permute.xlu0 %4759 }
 0x5c6   : > { %v4762_v37 = vunpack.i.h.bf16 %v4760_v36  ;;  %v4761_v38 = vunpack.i.l.bf16 %v4760_v36  ;;  %4382 = vmatprep.subr.bf16.mxu1 %v4381_v30  ;;  %v4767_v41 = vunpack.i.h.bf16 %v4765_v33  ;;  %v4766_v42 = vunpack.i.l.bf16 %v4765_v33 }
 0x5c7   : > { %4384 = vmatpush1.bf16.msra.mxu1 %v4383_v32 }
 0x5c8   : > { %v4385_v43 = vpack.c.bf16 %v4762_v37, %v4752_v27  ;;  %v2034_v44 = vsel %vm1084_vm10, %v4761_v38, %v4762_v37  ;;  %v2168_v52 = vsel %vm2167_vm6, %v4766_v42, %v4767_v41 }
 0x5c9   : > { %v4387_v45 = vpack.c.bf16 %v2034_v44, %v2033_v39  ;;  %v4775_v46 = vpop.permute.xlu1 %4774  ;;  %v4770_v16 = vpop.permute.xlu0 %4769 }
 0x5ca   : > { %v4772_v47 = vunpack.i.h.bf16 %v4770_v16  ;;  %v4771_v48 = vunpack.i.l.bf16 %v4770_v16  ;;  %4184 = vmatmul.mubr.msk.f32.vlgmr.msra.gmra.mrb[24].mxu1 %vm860_vm9, %v1875_v40  ;;  %4386 = vmatprep.subr.bf16.mxu0 %v4385_v43  ;;  %v4777_v22 = vunpack.i.h.bf16 %v4775_v46  ;;  %v4776_v50 = vunpack.i.l.bf16 %v4775_v46 }
 0x5cb   : > { %4388 = vmatpush1.bf16.msra.mxu0 %v4387_v45  ;;  %1998 = vmatprep.mubr.f32.mxu1 %v5300_v0 }
 0x5cc   : > { %v4393_v53 = vpack.c.bf16 %v4772_v47, %v4767_v41  ;;  %v2169_v54 = vsel %vm2167_vm6, %v4771_v48, %v4772_v47  ;;  %v2035_v60 = vsel %vm1084_vm10, %v4776_v50, %v4777_v22 }
 0x5cd   : > { %v4395_v55 = vpack.c.bf16 %v2169_v54, %v2168_v52  ;;  %v4780_v34 = vpop.permute.xlu1 %4779  ;;  %v4785_v57 = vpop.permute.xlu0 %4784 }
 0x5ce   : > { %v4787_v58 = vunpack.i.h.bf16 %v4785_v57  ;;  %v4786_v59 = vunpack.i.l.bf16 %v4785_v57  ;;  %4185 = vmatmul.mubr.msk.f32.gmra.mrb[26].mxu1 %vm860_vm9, %v1876_v51  ;;  %4394 = vmatprep.subr.bf16.mxu1 %v4393_v53  ;;  %v4782_v63 = vunpack.i.h.bf16 %v4780_v34  ;;  %v4781_v1 = vunpack.i.l.bf16 %v4780_v34 }
 0x5cf   : > { %4396 = vmatpush1.bf16.msra.mxu1 %v4395_v55  ;;  %2004 = vmatprep.mubr.f32.mxu1 %v5300_v0 }
 0x5d0   : > { %v4389_v2 = vpack.c.bf16 %v4787_v58, %v4777_v22  ;;  %v2036_v3 = vsel %vm1084_vm10, %v4786_v59, %v4787_v58  ;;  %v2170_v10 = vsel %vm2167_vm6, %v4781_v1, %v4782_v63 }
 0x5d1   : > { %v4391_v4 = vpack.c.bf16 %v2036_v3, %v2035_v60  ;;  %v4790_v5 = vpop.permute.xlu0 %4789 }
 0x5d2   : > { %v4792_v6 = vunpack.i.h.bf16 %v4790_v5  ;;  %v4791_v7 = vunpack.i.l.bf16 %v4790_v5  ;;  %4186 = vmatmul.mubr.msk.f32.gmra.mrb[28].mxu1 %vm860_vm9, %v1877_v62  ;;  %4390 = vmatprep.subr.bf16.mxu0 %v4389_v2 }
 0x5d3   : > { %4392 = vmatpush1.bf16.msra.mxu0 %v4391_v4  ;;  %2010 = vmatprep.mubr.f32.mxu1 %v5300_v0 }
 0x5d4   : > { %v4397_v11 = vpack.c.bf16 %v4792_v6, %v4782_v63  ;;  %v2171_v13 = vsel %vm2167_vm6, %v4791_v7, %v4792_v6 }
 0x5d5   : > { %v4399_v14 = vpack.c.bf16 %v2171_v13, %v2170_v10 }
 0x5d6   : > { %4187 = vmatmul.mubr.msk.f32.gmra.mrb[30].mxu1 %vm860_vm9, %v1878_v8  ;;  %4188 = vmatmul.mubr.msk.f32.vlgmr.msra.gmra.mrb[20].mxu0 %vm860_vm9, %v1870_v9 }
 0x5d7   : > { %4398 = vmatprep.subr.bf16.mxu1 %v4397_v11  ;;  %2127 = vmatprep.mubr.f32.mxu0 %v5300_v0 }
 0x5d8   : > { %4400 = vmatpush1.bf16.msra.mxu1 %v4399_v14  ;;  %2256 = vmatprep.mubr.f32.mxu1 %v5300_v0 }
 0x5da   : > { %4189 = vmatmul.mubr.msk.f32.gmra.mrb[22].mxu0 %vm860_vm9, %v1871_v15 }
 0x5db   : > { %4192 = vmatmul.mubr.msk.f32.vlgmr.msra.gmra.mrb[32].mxu1 %vm860_vm9, %v2147_v17  ;;  %2133 = vmatprep.mubr.f32.mxu0 %v5300_v0 }
 0x5dc   : > { %2262 = vmatprep.mubr.f32.mxu1 %v5300_v0 }
 0x5de   : > { %4190 = vmatmul.mubr.msk.f32.gmra.mrb[24].mxu0 %vm860_vm9, %v1872_v18  ;;  %v2296_v43 = vpop.permute.xlu1 %2295 }
 0x5df   : > { %4193 = vmatmul.mubr.msk.f32.gmra.mrb[34].mxu1 %vm860_vm9, %v2148_v19  ;;  %2139 = vmatprep.mubr.f32.mxu0 %v5300_v0 }
 0x5e0   : > { %2268 = vmatprep.mubr.f32.mxu1 %v5300_v0 }
 0x5e2   : > { %4191 = vmatmul.mubr.msk.f32.gmra.mrb[26].mxu0 %vm860_vm9, %v1873_v20  ;;  %v2301_v50 = vpop.permute.xlu0 %2300  ;;  %v2306_v58 = vpop.permute.xlu1 %2305 }
 0x5e3   : > { %4194 = vmatmul.mubr.msk.f32.gmra.mrb[36].mxu1 %vm860_vm9, %v2149_v21  ;;  %2512 = vmatprep.mubr.f32.mxu0 %v5300_v0 }
 0x5e4   : > { %2274 = vmatprep.mubr.f32.mxu1 %v5300_v0 }
 0x5e6   : > { %v2311_v1 = vpop.permute.xlu0 %2310 }
 0x5e7   : > { %4195 = vmatmul.mubr.msk.f32.gmra.mrb[38].mxu1 %vm860_vm9, %v2150_v23 }
 0x5e8   : > { %2641 = vmatprep.mubr.f32.mxu1 %v5300_v0 }
 0x69d   : > { %v1994_v24 = vpop.f32.mrb[24].mxu1 }
 0x69e   : > { %v1996_v25 = vpop.f32.mrb[25].mxu1 }
 0x6a1   : > { %v2000_v26 = vpop.f32.mrb[26].mxu1 }
 0x6a2   : > { %v2002_v27 = vpop.f32.mrb[27].mxu1 }
 0x6a3   : > { %v2810_v27 = vld [vmem:[%s6486_s4 + $0x8] sm:$0xff] }
 0x6a5   : > { %v2006_v28 = vpop.f32.mrb[28].mxu1 }
 0x6a6   : > { %v2008_v29 = vpop.f32.mrb[29].mxu1 }
 0x6a7   : > { %v2812_v29 = vld [vmem:[%s6486_s4 + $0x18] sm:$0xff] }
 0x6a9   : > { %v2012_v30 = vpop.f32.mrb[30].mxu1  ;;  %v2123_v31 = vpop.f32.mrb[20].mxu0 }
 0x6aa   : > { %v2124_v32 = vadd.f32 %v2123_v31, %v1994_v24  ;;  %v2014_v33 = vpop.f32.mrb[31].mxu1  ;;  %v2125_v36 = vpop.f32.mrb[21].mxu0 }
 0x6ad   : > { %v2129_v37 = vpop.f32.mrb[22].mxu0 }
 0x6ae   : > { %v2130_v38 = vadd.f32 %v2129_v37, %v2000_v26  ;;  %v2258_v39 = vpop.f32.mrb[32].mxu1  ;;  %v2131_v40 = vpop.f32.mrb[23].mxu0  ;;  %v2809_v26 = vld [vmem:[%s6486_s4] sm:$0xff] }
 0x6af   : > { %v2281_v41 = vadd.f32 %v2258_v39, %v2124_v32  ;;  %v2260_v42 = vpop.f32.mrb[33].mxu1 }
 0x6b1   : > { %v2313_v44 = vadd.f32 %v2296_v43, %v2281_v41  ;;  %v2135_v45 = vpop.f32.mrb[24].mxu0 }
 0x6b2   : > { %v2136_v46 = vadd.f32 %v2135_v45, %v2006_v28  ;;  %v2264_v16 = vpop.f32.mrb[34].mxu1  ;;  %v2137_v47 = vpop.f32.mrb[25].mxu0  ;;  %v2811_v28 = vld [vmem:[%s6486_s4 + $0x10] sm:$0xff] }
 0x6b3   : > { %v2283_v48 = vadd.f32 %v2264_v16, %v2130_v38  ;;  %v2266_v22 = vpop.f32.mrb[35].mxu1  ;;  %2329 = vrot.lane.b32.xlu1 %v2313_v44, %s5310_s8 }
 0x6b5   : > { %v2315_v51 = vadd.f32 %v2301_v50, %v2283_v48  ;;  %v2141_v52 = vpop.f32.mrb[26].mxu0 }
 0x6b6   : > { %v2142_v53 = vadd.f32 %v2141_v52, %v2012_v30  ;;  %v2270_v54 = vpop.f32.mrb[36].mxu1  ;;  %v2143_v55 = vpop.f32.mrb[27].mxu0 }
 0x6b7   : > { %v2285_v34 = vadd.f32 %v2270_v54, %v2136_v46  ;;  %v2272_v57 = vpop.f32.mrb[37].mxu1  ;;  %2333 = vrot.lane.b32.xlu0 %v2315_v51, %s5310_s8  ;;  %v2395_v55 = vld [vmem:[#allocation10 + $0x20] sm:$0xff] }
 0x6b9   : > { %v2317_v59 = vadd.f32 %v2306_v58, %v2285_v34 }
 0x6ba   : > { %v2276_v60 = vpop.f32.mrb[38].mxu1 }
 0x6bb   : > { %v2287_v62 = vadd.f32 %v2276_v60, %v2142_v53  ;;  %v2278_v63 = vpop.f32.mrb[39].mxu1  ;;  %2337 = vrot.lane.b32.xlu1 %v2317_v59, %s5310_s8 }
 0x6bd   : > { %v2319_v2 = vadd.f32 %v2311_v1, %v2287_v62 }
 0x6bf   : > { %2341 = vrot.lane.b32.xlu0 %v2319_v2, %s5310_s8  ;;  %s5199_s8 = sshll.u32 %s5319_s6, 4  ;;  %s5200_s8 = int_to_ptr.vmem [resolvable:$false] %s5199_s8 }
 0x6c0   : > { %p5202_p13 = scmp.lt.s32.totalorder %s6328_s30, %s5200_s8 }
 0x725   : > { %v2330_v3 = vpop.permute.xlu1 %2329 }
 0x726   : > { %v2358_v4 = vsel %vm5745_vm3, %v2330_v3, 0.0 }
 0x727   : > { %vm2366_vm7 = vcmp.ge.f32.partialorder %v2358_v4, 0.0  ;;  %v2374_v5 = vmul.f32 0.1, %v2358_v4 }
 0x729   : > { %v2382_v6 = vsel %vm2366_vm7, %v2358_v4, %v2374_v5  ;;  %v2334_v7 = vpop.permute.xlu0 %2333  ;;  %v2396_v5 = vld [vmem:[#allocation10 + $0x28] sm:$0xff] }
 0x72a   : > { %v2360_v8 = vsel %vm5745_vm3, %v2334_v7, 0.0  ;;  %v4793_v9 = vpack.i.bf16 %v5300_v0, %v2382_v6 }
 0x72b   : > { %vm2368_vm8 = vcmp.ge.f32.partialorder %v2360_v8, 0.0  ;;  %v2376_v10 = vmul.f32 0.1, %v2360_v8 }
 0x72c   : > { %4794 = vrot.lane.b32.xlu1 %v4793_v9, %s5311_s5 }
 0x72d   : > { %v2384_v11 = vsel %vm2368_vm8, %v2360_v8, %v2376_v10  ;;  %v2338_v13 = vpop.permute.xlu1 %2337 }
 0x72e   : > { %v2362_v14 = vsel %vm5745_vm3, %v2338_v13, 0.0  ;;  %v4798_v15 = vpack.i.bf16 %v5300_v0, %v2384_v11 }
 0x72f   : > { %vm2370_vm10 = vcmp.ge.f32.partialorder %v2362_v14, 0.0  ;;  %v2378_v17 = vmul.f32 0.1, %v2362_v14 }
 0x730   : > { %4799 = vrot.lane.b32.xlu0 %v4798_v15, %s5311_s5 }
 0x731   : > { %v2386_v18 = vsel %vm2370_vm10, %v2362_v14, %v2378_v17  ;;  %v2342_v19 = vpop.permute.xlu0 %2341  ;;  %v2397_v17 = vld [vmem:[#allocation10 + $0x30] sm:$0xff]  ;;  %vm3755_vm10 = vcmask 941056  }
 0x732   : > { %v2364_v20 = vsel %vm5745_vm3, %v2342_v19, 0.0  ;;  %v4803_v21 = vpack.i.bf16 %v5300_v0, %v2386_v18 }
 0x733   : > { %vm2372_vm11 = vcmp.ge.f32.partialorder %v2364_v20, 0.0  ;;  %v2380_v23 = vmul.f32 0.1, %v2364_v20 }
 0x734   : > { %4804 = vrot.lane.b32.xlu1 %v4803_v21, %s5311_s5 }
 0x735   : > { %v2388_v24 = vsel %vm2372_vm11, %v2364_v20, %v2380_v23 }
 0x736   : > { %v4813_v25 = vpack.i.bf16 %v5300_v0, %v2388_v24 }
 0x738   : > { %4814 = vrot.lane.b32.xlu0 %v4813_v25, %s5311_s5  ;;  %4809 = vrot.lane.b32.xlu1 %v4793_v9, %s5308_s18 }
 0x73c   : > { %4819 = vrot.lane.b32.xlu0 %v4798_v15, %s5308_s18  ;;  %4824 = vrot.lane.b32.xlu1 %v4793_v9, %s5312_s22 }
 0x740   : > { %4829 = vrot.lane.b32.xlu0 %v4798_v15, %s5312_s22  ;;  %4834 = vrot.lane.b32.xlu1 %v4803_v21, %s5308_s18 }
 0x744   : > { %4844 = vrot.lane.b32.xlu0 %v4813_v25, %s5308_s18  ;;  %4839 = vrot.lane.b32.xlu1 %v4803_v21, %s5312_s22  ;;  %s5313_s18 = smov 6  }
 0x748   : > { %4849 = vrot.lane.b32.xlu0 %v4813_v25, %s5312_s22  ;;  %2815 = vperm.xlu1 %4662, %v2809_v26   ;;  %s5201_s22 = scalar_lea.vmem %s5200_s8, 1024 }
 0x749   : > { %p5203_p12 = scmp.lt.s32.totalorder %s5201_s22, %s5195_s21 }
 0x74b   : > { %p5204_p9 = por %p5203_p12, %p5202_p13 }
 0x74c   : > { %2820 = vperm.xlu0 %4661, %v2810_v27   ;;  %2825 = vperm.xlu1 %4662, %v2811_v28   ;;  %v2398_v27 = vld [vmem:[#allocation10 + $0x38] sm:$0xff]  ;;  %v2390_v28 = vld [vmem:[#allocation10] sm:$0xff] }
 0x750   : > { %2830 = vperm.xlu0 %4661, %v2812_v29   ;;  %2849 = vrot.lane.b32.xlu1 %v5999_v49, %s5311_s5 }
 0x754   : > { %4854 = vrot.lane.b32.xlu0 %v5300_v0, %s5311_s5  ;;  %2853 = vrot.lane.b32.xlu1 %v6006_v35, %s5311_s5 }
 0x758   : > { %2857 = vrot.lane.b32.xlu0 %v6015_v56, %s5311_s5  ;;  %4859 = vrot.lane.b32.xlu1 %v5300_v0, %s5311_s5 }
 0x75c   : > { %2861 = vrot.lane.b32.xlu0 %v6024_v61, %s5311_s5 }
 0x79e   : > { %v4795_v30 = vpop.permute.xlu1 %4794 }
 0x79f   : > { %v4797_v31 = vunpack.i.h.bf16 %v4795_v30  ;;  %v4796_v32 = vunpack.i.l.bf16 %v4795_v30 }
 0x7a1   : > { %v2424_v37 = vsel %vm2423_vm12, %v4796_v32, %v4797_v31 }
 0x7a2   : > { %v4800_v49 = vpop.permute.xlu0 %4799 }
 0x7a3   : > { %v4802_v33 = vunpack.i.h.bf16 %v4800_v49  ;;  %v4801_v36 = vunpack.i.l.bf16 %v4800_v49  ;;  %v2391_v49 = vld [vmem:[#allocation10 + $0x8] sm:$0xff] }
 0x7a5   : > { %v2425_v35 = vsel %vm2423_vm12, %v4801_v36, %v4802_v33  ;;  %v4401_v38 = vpack.c.bf16 %v4802_v33, %v4797_v31  ;;  %v2667_v33 = vld [vmem:[#allocation10 + $0x40] sm:$0xff]  ;;  %v2392_v36 = vld [vmem:[#allocation10 + $0x10] sm:$0xff] }
 0x7a6   : > { %v4403_v39 = vpack.c.bf16 %v2425_v35, %v2424_v37  ;;  %v4805_v56 = vpop.permute.xlu1 %4804  ;;  %v2668_v37 = vld [vmem:[#allocation10 + $0x48] sm:$0xff]  ;;  %v2393_v35 = vld [vmem:[#allocation10 + $0x18] sm:$0xff] }
 0x7a7   : > { %4402 = vmatprep.subr.bf16.mxu0 %v4401_v38  ;;  %v4807_v40 = vunpack.i.h.bf16 %v4805_v56  ;;  %v4806_v41 = vunpack.i.l.bf16 %v4805_v56  ;;  %v2669_v38 = vld [vmem:[#allocation10 + $0x50] sm:$0xff] }
 0x7a8   : > { %4404 = vmatpush1.bf16.msra.mxu0 %v4403_v39  ;;  %v2670_v39 = vld [vmem:[#allocation10 + $0x58] sm:$0xff] }
 0x7a9   : > { %v2426_v16 = vsel %vm2423_vm12, %v4806_v41, %v4807_v40 }
 0x7aa   : > { %v4815_v42 = vpop.permute.xlu0 %4814  ;;  %v4810_v61 = vpop.permute.xlu1 %4809 }
 0x7ab   : > { %v4817_v43 = vunpack.i.h.bf16 %v4815_v42  ;;  %v4816_v44 = vunpack.i.l.bf16 %v4815_v42  ;;  %v4812_v45 = vunpack.i.h.bf16 %v4810_v61  ;;  %v4811_v46 = vunpack.i.l.bf16 %v4810_v61 }
 0x7ad   : > { %v2427_v47 = vsel %vm2423_vm12, %v4816_v44, %v4817_v43  ;;  %v4405_v48 = vpack.c.bf16 %v4817_v43, %v4807_v40  ;;  %v2553_v54 = vsel %vm1903_vm5, %v4811_v46, %v4812_v45 }
 0x7ae   : > { %v4407_v22 = vpack.c.bf16 %v2427_v47, %v2426_v16  ;;  %v4820_v50 = vpop.permute.xlu0 %4819  ;;  %v4825_v51 = vpop.permute.xlu1 %4824 }
 0x7af   : > { %v4822_v52 = vunpack.i.h.bf16 %v4820_v50  ;;  %v4821_v53 = vunpack.i.l.bf16 %v4820_v50  ;;  %4406 = vmatprep.subr.bf16.mxu0 %v4405_v48  ;;  %v4827_v58 = vunpack.i.h.bf16 %v4825_v51  ;;  %v4826_v59 = vunpack.i.l.bf16 %v4825_v51 }
 0x7b0   : > { %4408 = vmatpush1.bf16.msra.mxu0 %v4407_v22 }
 0x7b1   : > { %v2554_v34 = vsel %vm1903_vm5, %v4821_v53, %v4822_v52  ;;  %v4409_v57 = vpack.c.bf16 %v4822_v52, %v4812_v45  ;;  %v2688_v6 = vsel %vm2687_vm13, %v4826_v59, %v4827_v58 }
 0x7b2   : > { %v4411_v60 = vpack.c.bf16 %v2554_v34, %v2553_v54  ;;  %v4830_v62 = vpop.permute.xlu0 %4829  ;;  %v4835_v63 = vpop.permute.xlu1 %4834 }
 0x7b3   : > { %v4832_v1 = vunpack.i.h.bf16 %v4830_v62  ;;  %v4831_v2 = vunpack.i.l.bf16 %v4830_v62  ;;  %4196 = vmatmul.mubr.msk.f32.vlgmr.msra.gmra.mrb[28].mxu0 %vm860_vm9, %v2395_v55  ;;  %4410 = vmatprep.subr.bf16.mxu1 %v4409_v57  ;;  %v4837_v3 = vunpack.i.h.bf16 %v4835_v63  ;;  %v4836_v4 = vunpack.i.l.bf16 %v4835_v63 }
 0x7b4   : > { %4412 = vmatpush1.bf16.msra.mxu1 %v4411_v60  ;;  %2518 = vmatprep.mubr.f32.mxu0 %v5300_v0 }
 0x7b5   : > { %v2689_v7 = vsel %vm2687_vm13, %v4831_v2, %v4832_v1  ;;  %v4417_v8 = vpack.c.bf16 %v4832_v1, %v4827_v58  ;;  %v2555_v15 = vsel %vm1903_vm5, %v4836_v4, %v4837_v3 }
 0x7b6   : > { %v4419_v9 = vpack.c.bf16 %v2689_v7, %v2688_v6  ;;  %v4845_v10 = vpop.permute.xlu0 %4844  ;;  %v4840_v11 = vpop.permute.xlu1 %4839 }
 0x7b7   : > { %v4847_v13 = vunpack.i.h.bf16 %v4845_v10  ;;  %v4846_v14 = vunpack.i.l.bf16 %v4845_v10  ;;  %4197 = vmatmul.mubr.msk.f32.gmra.mrb[30].mxu0 %vm860_vm9, %v2396_v5  ;;  %4418 = vmatprep.subr.bf16.mxu0 %v4417_v8  ;;  %v4842_v20 = vunpack.i.h.bf16 %v4840_v11  ;;  %v4841_v21 = vunpack.i.l.bf16 %v4840_v11 }
 0x7b8   : > { %4420 = vmatpush1.bf16.msra.mxu0 %v4419_v9  ;;  %2524 = vmatprep.mubr.f32.mxu0 %v5300_v0 }
 0x7b9   : > { %v2556_v18 = vsel %vm1903_vm5, %v4846_v14, %v4847_v13  ;;  %v4413_v19 = vpack.c.bf16 %v4847_v13, %v4837_v3  ;;  %v2690_v29 = vsel %vm2687_vm13, %v4841_v21, %v4842_v20 }
 0x7ba   : > { %v4415_v23 = vpack.c.bf16 %v2556_v18, %v2555_v15  ;;  %v4850_v24 = vpop.permute.xlu0 %4849 }
 0x7bb   : > { %v4852_v25 = vunpack.i.h.bf16 %v4850_v24  ;;  %v4851_v26 = vunpack.i.l.bf16 %v4850_v24  ;;  %4198 = vmatmul.mubr.msk.f32.gmra.mrb[32].mxu0 %vm860_vm9, %v2397_v17  ;;  %4414 = vmatprep.subr.bf16.mxu1 %v4413_v19 }
 0x7bc   : > { %4416 = vmatpush1.bf16.msra.mxu1 %v4415_v23  ;;  %2530 = vmatprep.mubr.f32.mxu0 %v5300_v0 }
 0x7bd   : > { %v2691_v30 = vsel %vm2687_vm13, %v4851_v26, %v4852_v25  ;;  %v4421_v31 = vpack.c.bf16 %v4852_v25, %v4842_v20 }
 0x7be   : > { %v4423_v32 = vpack.c.bf16 %v2691_v30, %v2690_v29 }
 0x7bf   : > { %4199 = vmatmul.mubr.msk.f32.gmra.mrb[34].mxu0 %vm860_vm9, %v2398_v27  ;;  %4200 = vmatmul.mubr.msk.f32.vlgmr.msra.gmra.mrb[40].mxu1 %vm860_vm9, %v2390_v28 }
 0x7c0   : > { %4422 = vmatprep.subr.bf16.mxu0 %v4421_v31  ;;  %2647 = vmatprep.mubr.f32.mxu1 %v5300_v0 }
 0x7c1   : > { %4424 = vmatpush1.bf16.msra.mxu0 %v4423_v32  ;;  %2776 = vmatprep.mubr.f32.mxu0 %v5300_v0 }
 0x7c3   : > { %4201 = vmatmul.mubr.msk.f32.gmra.mrb[42].mxu1 %vm860_vm9, %v2391_v49 }
 0x7c4   : > { %4204 = vmatmul.mubr.msk.f32.vlgmr.msra.gmra.mrb[36].mxu0 %vm860_vm9, %v2667_v33  ;;  %2653 = vmatprep.mubr.f32.mxu1 %v5300_v0 }
 0x7c5   : > { %2782 = vmatprep.mubr.f32.mxu0 %v5300_v0 }
 0x7c7   : > { %4202 = vmatmul.mubr.msk.f32.gmra.mrb[44].mxu1 %vm860_vm9, %v2392_v36  ;;  %v2816_v56 = vpop.permute.xlu1 %2815 }
 0x7c8   : > { %4205 = vmatmul.mubr.msk.f32.gmra.mrb[38].mxu0 %vm860_vm9, %v2668_v37  ;;  %2659 = vmatprep.mubr.f32.mxu1 %v5300_v0 }
 0x7c9   : > { %2788 = vmatprep.mubr.f32.mxu0 %v5300_v0 }
 0x7cb   : > { %4203 = vmatmul.mubr.msk.f32.gmra.mrb[46].mxu1 %vm860_vm9, %v2393_v35  ;;  %v2821_v42 = vpop.permute.xlu0 %2820  ;;  %v2826_v61 = vpop.permute.xlu1 %2825 }
 0x7cc   : > { %4206 = vmatmul.mubr.msk.f32.gmra.mrb[40].mxu0 %vm860_vm9, %v2669_v38  ;;  %3076 = vmatprep.mubr.f32.mxu1 %v5300_v0 }
 0x7cd   : > { %2794 = vmatprep.mubr.f32.mxu0 %v5300_v0 }
 0x7cf   : > { %v2831_v45 = vpop.permute.xlu0 %2830  ;;  %v2850_v47 = vpop.permute.xlu1 %2849 }
 0x7d0   : > { %4207 = vmatmul.mubr.msk.f32.gmra.mrb[42].mxu0 %vm860_vm9, %v2670_v39 }
 0x7d1   : > { %3205 = vmatprep.mubr.f32.mxu0 %v5300_v0 }
 0x7d3   : > { %v4855_v53 = vpop.permute.xlu0 %4854  ;;  %v2854_v54 = vpop.permute.xlu1 %2853 }
 0x7d4   : > { %v4856_v34 = vunpack.i.l.bf16 %v4855_v53  ;;  %v4857_v2 = vunpack.i.h.bf16 %v4855_v53  ;;  %v3373_v53 = vld [vmem:[%s6487_s24] sm:$0xff] }
 0x7d6   : > { %v2865_v6 = vsel %vm2423_vm12, %v2850_v47, %v4856_v34  ;;  %v2866_v15 = vsel %vm2423_vm12, %v2854_v54, %v4857_v2  ;;  %v3375_v54 = vld [vmem:[%s6487_s24 + $0x10] sm:$0xff]  ;;  %v3376_v34 = vld [vmem:[%s6487_s24 + $0x18] sm:$0xff] }
 0x7d7   : > { %v4860_v7 = vpop.permute.xlu1 %4859  ;;  %v2858_v11 = vpop.permute.xlu0 %2857 }
 0x7d8   : > { %v4861_v17 = vunpack.i.l.bf16 %v4860_v7  ;;  %v4862_v26 = vunpack.i.h.bf16 %v4860_v7 }
 0x7da   : > { %v2867_v28 = vsel %vm2423_vm12, %v2858_v11, %v4861_v17 }
 0x7db   : > { %v2862_v29 = vpop.permute.xlu0 %2861 }
 0x7dc   : > { %v2868_v33 = vsel %vm2423_vm12, %v2862_v29, %v4862_v26  ;;  %v2959_v26 = vld [vmem:[#allocation11 + $0x20] sm:$0xff] }
 0x886   : > { %v2514_v40 = vpop.f32.mrb[28].mxu0 }
 0x887   : > { %v2516_v41 = vpop.f32.mrb[29].mxu0 }
 0x88a   : > { %v2520_v43 = vpop.f32.mrb[30].mxu0 }
 0x88b   : > { %v2522_v44 = vpop.f32.mrb[31].mxu0 }
 0x88e   : > { %v2526_v46 = vpop.f32.mrb[32].mxu0 }
 0x88f   : > { %v2528_v16 = vpop.f32.mrb[33].mxu0 }
 0x892   : > { %v2532_v48 = vpop.f32.mrb[34].mxu0  ;;  %v2643_v22 = vpop.f32.mrb[40].mxu1 }
 0x893   : > { %v2644_v50 = vadd.f32 %v2643_v22, %v2514_v40  ;;  %v2534_v51 = vpop.f32.mrb[35].mxu0  ;;  %v2645_v52 = vpop.f32.mrb[41].mxu1 }
 0x896   : > { %v2649_v55 = vpop.f32.mrb[42].mxu1 }
 0x897   : > { %v2650_v57 = vadd.f32 %v2649_v55, %v2520_v43  ;;  %v2778_v58 = vpop.f32.mrb[36].mxu0  ;;  %v2651_v59 = vpop.f32.mrb[43].mxu1  ;;  %v3374_v55 = vld [vmem:[%s6487_s24 + $0x8] sm:$0xff] }
 0x898   : > { %v2801_v60 = vadd.f32 %v2778_v58, %v2644_v50  ;;  %v2780_v62 = vpop.f32.mrb[37].mxu0 }
 0x89a   : > { %v2833_v63 = vadd.f32 %v2816_v56, %v2801_v60  ;;  %v2655_v1 = vpop.f32.mrb[44].mxu1 }
 0x89b   : > { %v2656_v3 = vadd.f32 %v2655_v1, %v2526_v46  ;;  %v2784_v4 = vpop.f32.mrb[38].mxu0  ;;  %v2657_v5 = vpop.f32.mrb[45].mxu1 }
 0x89c   : > { %v2803_v8 = vadd.f32 %v2784_v4, %v2650_v57  ;;  %v2786_v9 = vpop.f32.mrb[39].mxu0  ;;  %v2877_v10 = vadd.f32 %v2865_v6, %v2833_v63 }
 0x89e   : > { %v2835_v13 = vadd.f32 %v2821_v42, %v2803_v8  ;;  %2893 = vrot.lane.b32.xlu1 %v2877_v10, %s5313_s18  ;;  %v2661_v14 = vpop.f32.mrb[46].mxu1 }
 0x89f   : > { %v2662_v18 = vadd.f32 %v2661_v14, %v2532_v48  ;;  %v2790_v19 = vpop.f32.mrb[40].mxu0  ;;  %v2663_v20 = vpop.f32.mrb[47].mxu1 }
 0x8a0   : > { %v2805_v21 = vadd.f32 %v2790_v19, %v2656_v3  ;;  %v2792_v23 = vpop.f32.mrb[41].mxu0  ;;  %v2879_v24 = vadd.f32 %v2866_v15, %v2835_v13 }
 0x8a2   : > { %v2837_v25 = vadd.f32 %v2826_v61, %v2805_v21  ;;  %2897 = vrot.lane.b32.xlu0 %v2879_v24, %s5313_s18 }
 0x8a3   : > { %v2796_v27 = vpop.f32.mrb[42].mxu0 }
 0x8a4   : > { %v2807_v30 = vadd.f32 %v2796_v27, %v2662_v18  ;;  %v2798_v31 = vpop.f32.mrb[43].mxu0  ;;  %v2881_v32 = vadd.f32 %v2867_v28, %v2837_v25 }
 0x8a6   : > { %v2839_v49 = vadd.f32 %v2831_v45, %v2807_v30  ;;  %2901 = vrot.lane.b32.xlu1 %v2881_v32, %s5313_s18 }
 0x8a8   : > { %v2883_v36 = vadd.f32 %v2868_v33, %v2839_v49 }
 0x8aa   : > { %2905 = vrot.lane.b32.xlu0 %v2883_v36, %s5313_s18  ;;  %s6488_s18 = sld [smem:[#allocation38_spill]] }
 0x8b0   : > { %v3865_v12 = vld [vmem:[%s6488_s18] sm:$0xff] }
 0x910   : > { %v2894_v37 = vpop.permute.xlu1 %2893 }
 0x911   : > { %v6171_v35 = vsel %vm5745_vm3, %v2894_v37, 0.0 }
 0x912   : > { %vm2930_vm14 = vcmp.ge.f32.partialorder %v6171_v35, 0.0  ;;  %v2938_v38 = vmul.f32 0.1, %v6171_v35 }
 0x914   : > { %v2946_v39 = vsel %vm2930_vm14, %v6171_v35, %v2938_v38  ;;  %v2898_v56 = vpop.permute.xlu0 %2897 }
 0x915   : > { %v6178_v40 = vsel %vm5745_vm3, %v2898_v56, 0.0  ;;  %v4863_v41 = vpack.i.bf16 %v5300_v0, %v2946_v39  ;;  %v2960_v39 = vld [vmem:[#allocation11 + $0x28] sm:$0xff] }
 0x916   : > { %vm2932_vm15 = vcmp.ge.f32.partialorder %v6178_v40, 0.0  ;;  %v2940_v42 = vmul.f32 0.1, %v6178_v40 }
 0x917   : > { %4864 = vrot.lane.b32.xlu1 %v4863_v41, %s5314_s16 }
 0x918   : > { %v2948_v61 = vsel %vm2932_vm15, %v6178_v40, %v2940_v42  ;;  %v2902_v43 = vpop.permute.xlu1 %2901 }
 0x919   : > { %v6187_v44 = vsel %vm5745_vm3, %v2902_v43, 0.0  ;;  %v4868_v45 = vpack.i.bf16 %v5300_v0, %v2948_v61 }
 0x91a   : > { %vm2934_vm0 = vcmp.ge.f32.partialorder %v6187_v44, 0.0  ;;  %v2942_v46 = vmul.f32 0.1, %v6187_v44 }
 0x91b   : > { %4869 = vrot.lane.b32.xlu0 %v4868_v45, %s5314_s16 }
 0x91c   : > { %v2950_v16 = vsel %vm2934_vm0, %v6187_v44, %v2942_v46  ;;  %v2906_v47 = vpop.permute.xlu0 %2905 }
 0x91d   : > { %v4873_v48 = vpack.i.bf16 %v5300_v0, %v2950_v16  ;;  %v6197_v22 = vsel %vm5745_vm3, %v2906_v47, 0.0 }
 0x91e   : > { %vm2936_vm1 = vcmp.ge.f32.partialorder %v6197_v22, 0.0  ;;  %v2944_v50 = vmul.f32 0.1, %v6197_v22 }
 0x91f   : > { %4874 = vrot.lane.b32.xlu1 %v4873_v48, %s5314_s16 }
 0x920   : > { %v2952_v51 = vsel %vm2936_vm1, %v6197_v22, %v2944_v50 }
 0x921   : > { %v4883_v52 = vpack.i.bf16 %v5300_v0, %v2952_v51 }
 0x923   : > { %4879 = vrot.lane.b32.xlu1 %v4863_v41, %s5311_s5  ;;  %4884 = vrot.lane.b32.xlu0 %v4883_v52, %s5314_s16 }
 0x927   : > { %4894 = vrot.lane.b32.xlu1 %v4863_v41, %s5315_s29  ;;  %4889 = vrot.lane.b32.xlu0 %v4868_v45, %s5311_s5 }
 0x92b   : > { %4904 = vrot.lane.b32.xlu1 %v4873_v48, %s5311_s5  ;;  %4899 = vrot.lane.b32.xlu0 %v4868_v45, %s5315_s29 }
 0x92f   : > { %4909 = vrot.lane.b32.xlu1 %v4873_v48, %s5315_s29  ;;  %4914 = vrot.lane.b32.xlu0 %v4883_v52, %s5311_s5  ;;  %v2961_v48 = vld [vmem:[#allocation11 + $0x30] sm:$0xff]  ;;  %s5316_s5 = smov 11  }
 0x933   : > { %3379 = vperm.xlu1 %4662, %v3373_v53   ;;  %4919 = vrot.lane.b32.xlu0 %v4883_v52, %s5315_s29  ;;  %s6489_s29 = smov %s6488_s18  ;;  %s3934_s18 = scalar_lea.sflag [#allocation4], %s5718_s10 }
 0x937   : > { %3389 = vperm.xlu1 %4662, %v3375_v54   ;;  %3384 = vperm.xlu0 %4661, %v3374_v55  }
 0x93b   : > { %3394 = vperm.xlu0 %4661, %v3376_v34  }
 0x989   : > { %v4865_v57 = vpop.permute.xlu1 %4864 }
 0x98a   : > { %v4867_v58 = vunpack.i.h.bf16 %v4865_v57  ;;  %v4866_v59 = vunpack.i.l.bf16 %v4865_v57 }
 0x98c   : > { %v2988_v1 = vsel %vm2987_vm2, %v4866_v59, %v4867_v58  ;;  %v2954_v59 = vld [vmem:[#allocation11] sm:$0xff] }
 0x98d   : > { %v4870_v60 = vpop.permute.xlu0 %4869 }
 0x98e   : > { %v4872_v62 = vunpack.i.h.bf16 %v4870_v60  ;;  %v4871_v63 = vunpack.i.l.bf16 %v4870_v60 }
 0x990   : > { %v4425_v2 = vpack.c.bf16 %v4872_v62, %v4867_v58  ;;  %v2989_v3 = vsel %vm2987_vm2, %v4871_v63, %v4872_v62  ;;  %v2962_v58 = vld [vmem:[#allocation11 + $0x38] sm:$0xff] }
 0x991   : > { %v4427_v4 = vpack.c.bf16 %v2989_v3, %v2988_v1  ;;  %v4875_v5 = vpop.permute.xlu1 %4874  ;;  %v3231_v3 = vld [vmem:[#allocation11 + $0x40] sm:$0xff] }
 0x992   : > { %4426 = vmatprep.subr.bf16.mxu1 %v4425_v2  ;;  %v4877_v6 = vunpack.i.h.bf16 %v4875_v5  ;;  %v4876_v7 = vunpack.i.l.bf16 %v4875_v5  ;;  %v2955_v2 = vld [vmem:[#allocation11 + $0x8] sm:$0xff] }
 0x993   : > { %4428 = vmatpush1.bf16.msra.mxu1 %v4427_v4  ;;  %v2956_v4 = vld [vmem:[#allocation11 + $0x10] sm:$0xff]  ;;  %v3232_v5 = vld [vmem:[#allocation11 + $0x48] sm:$0xff] }
 0x994   : > { %v2990_v15 = vsel %vm2987_vm2, %v4876_v7, %v4877_v6  ;;  %v3233_v7 = vld [vmem:[#allocation11 + $0x50] sm:$0xff] }
 0x995   : > { %v4880_v8 = vpop.permute.xlu1 %4879  ;;  %v4885_v9 = vpop.permute.xlu0 %4884 }
 0x996   : > { %v4887_v10 = vunpack.i.h.bf16 %v4885_v9  ;;  %v4886_v11 = vunpack.i.l.bf16 %v4885_v9  ;;  %v4882_v13 = vunpack.i.h.bf16 %v4880_v8  ;;  %v4881_v14 = vunpack.i.l.bf16 %v4880_v8  ;;  %v3234_v8 = vld [vmem:[#allocation11 + $0x58] sm:$0xff] }
 0x998   : > { %v4429_v17 = vpack.c.bf16 %v4887_v10, %v4877_v6  ;;  %v2991_v18 = vsel %vm2987_vm2, %v4886_v11, %v4887_v10  ;;  %v3117_v25 = vsel %vm2423_vm12, %v4881_v14, %v4882_v13  ;;  %v2957_v6 = vld [vmem:[#allocation11 + $0x18] sm:$0xff] }
 0x999   : > { %v4431_v19 = vpack.c.bf16 %v2991_v18, %v2990_v15  ;;  %v4895_v20 = vpop.permute.xlu1 %4894  ;;  %v4890_v21 = vpop.permute.xlu0 %4889 }
 0x99a   : > { %v4892_v23 = vunpack.i.h.bf16 %v4890_v21  ;;  %v4891_v24 = vunpack.i.l.bf16 %v4890_v21  ;;  %4430 = vmatprep.subr.bf16.mxu1 %v4429_v17  ;;  %v4897_v27 = vunpack.i.h.bf16 %v4895_v20  ;;  %v4896_v28 = vunpack.i.l.bf16 %v4895_v20 }
 0x99b   : > { %4432 = vmatpush1.bf16.msra.mxu1 %v4431_v19 }
 0x99c   : > { %v4433_v29 = vpack.c.bf16 %v4892_v23, %v4882_v13  ;;  %v3118_v30 = vsel %vm2423_vm12, %v4891_v24, %v4892_v23  ;;  %v3252_v56 = vsel %vm3251_vm4, %v4896_v28, %v4897_v27 }
 0x99d   : > { %v4435_v31 = vpack.c.bf16 %v3118_v30, %v3117_v25  ;;  %v4905_v32 = vpop.permute.xlu1 %4904  ;;  %v4900_v49 = vpop.permute.xlu0 %4899 }
 0x99e   : > { %v4902_v33 = vunpack.i.h.bf16 %v4900_v49  ;;  %v4901_v36 = vunpack.i.l.bf16 %v4900_v49  ;;  %4208 = vmatmul.mubr.msk.f32.vlgmr.msra.gmra.mrb[48].mxu1 %vm860_vm9, %v2959_v26  ;;  %4434 = vmatprep.subr.bf16.mxu0 %v4433_v29  ;;  %v4907_v37 = vunpack.i.h.bf16 %v4905_v32  ;;  %v4906_v38 = vunpack.i.l.bf16 %v4905_v32 }
 0x99f   : > { %4436 = vmatpush1.bf16.msra.mxu0 %v4435_v31  ;;  %3082 = vmatprep.mubr.f32.mxu1 %v5300_v0 }
 0x9a0   : > { %v4441_v41 = vpack.c.bf16 %v4902_v33, %v4897_v27  ;;  %v3253_v42 = vsel %vm3251_vm4, %v4901_v36, %v4902_v33  ;;  %v3119_v47 = vsel %vm2423_vm12, %v4906_v38, %v4907_v37 }
 0x9a1   : > { %v4443_v61 = vpack.c.bf16 %v3253_v42, %v3252_v56  ;;  %v4910_v43 = vpop.permute.xlu1 %4909  ;;  %v4915_v45 = vpop.permute.xlu0 %4914 }
 0x9a2   : > { %v4917_v46 = vunpack.i.h.bf16 %v4915_v45  ;;  %v4916_v16 = vunpack.i.l.bf16 %v4915_v45  ;;  %4209 = vmatmul.mubr.msk.f32.gmra.mrb[50].mxu1 %vm860_vm9, %v2960_v39  ;;  %4442 = vmatprep.subr.bf16.mxu1 %v4441_v41  ;;  %v4912_v50 = vunpack.i.h.bf16 %v4910_v43  ;;  %v4911_v51 = vunpack.i.l.bf16 %v4910_v43 }
 0x9a3   : > { %4444 = vmatpush1.bf16.msra.mxu1 %v4443_v61  ;;  %3088 = vmatprep.mubr.f32.mxu1 %v5300_v0 }
 0x9a4   : > { %v4437_v52 = vpack.c.bf16 %v4917_v46, %v4907_v37  ;;  %v3120_v53 = vsel %vm2423_vm12, %v4916_v16, %v4917_v46  ;;  %v3254_v60 = vsel %vm3251_vm4, %v4911_v51, %v4912_v50 }
 0x9a5   : > { %v4439_v54 = vpack.c.bf16 %v3120_v53, %v3119_v47  ;;  %v4920_v55 = vpop.permute.xlu0 %4919 }
 0x9a6   : > { %v4922_v34 = vunpack.i.h.bf16 %v4920_v55  ;;  %v4921_v57 = vunpack.i.l.bf16 %v4920_v55  ;;  %4210 = vmatmul.mubr.msk.f32.gmra.mrb[52].mxu1 %vm860_vm9, %v2961_v48  ;;  %4438 = vmatprep.subr.bf16.mxu0 %v4437_v52 }
 0x9a7   : > { %4440 = vmatpush1.bf16.msra.mxu0 %v4439_v54  ;;  %3094 = vmatprep.mubr.f32.mxu1 %v5300_v0 }
 0x9a8   : > { %v4445_v62 = vpack.c.bf16 %v4922_v34, %v4912_v50  ;;  %v3255_v63 = vsel %vm3251_vm4, %v4921_v57, %v4922_v34 }
 0x9a9   : > { %v4447_v1 = vpack.c.bf16 %v3255_v63, %v3254_v60 }
 0x9aa   : > { %4211 = vmatmul.mubr.msk.f32.gmra.mrb[54].mxu1 %vm860_vm9, %v2962_v58  ;;  %4212 = vmatmul.mubr.msk.f32.vlgmr.msra.gmra.mrb[44].mxu0 %vm860_vm9, %v2954_v59 }
 0x9ab   : > { %4446 = vmatprep.subr.bf16.mxu1 %v4445_v62  ;;  %3211 = vmatprep.mubr.f32.mxu0 %v5300_v0 }
 0x9ac   : > { %4448 = vmatpush1.bf16.msra.mxu1 %v4447_v1  ;;  %3340 = vmatprep.mubr.f32.mxu1 %v5300_v0 }
 0x9ae   : > { %4213 = vmatmul.mubr.msk.f32.gmra.mrb[46].mxu0 %vm860_vm9, %v2955_v2 }
 0x9af   : > { %4216 = vmatmul.mubr.msk.f32.vlgmr.msra.gmra.mrb[56].mxu1 %vm860_vm9, %v3231_v3  ;;  %3217 = vmatprep.mubr.f32.mxu0 %v5300_v0 }
 0x9b0   : > { %3346 = vmatprep.mubr.f32.mxu1 %v5300_v0 }
 0x9b2   : > { %4214 = vmatmul.mubr.msk.f32.gmra.mrb[48].mxu0 %vm860_vm9, %v2956_v4  ;;  %v3380_v29 = vpop.permute.xlu1 %3379 }
 0x9b3   : > { %4217 = vmatmul.mubr.msk.f32.gmra.mrb[58].mxu1 %vm860_vm9, %v3232_v5  ;;  %3223 = vmatprep.mubr.f32.mxu0 %v5300_v0 }
 0x9b4   : > { %3352 = vmatprep.mubr.f32.mxu1 %v5300_v0 }
 0x9b6   : > { %4215 = vmatmul.mubr.msk.f32.gmra.mrb[50].mxu0 %vm860_vm9, %v2957_v6  ;;  %v3385_v38 = vpop.permute.xlu0 %3384  ;;  %v3390_v46 = vpop.permute.xlu1 %3389 }
 0x9b7   : > { %4218 = vmatmul.mubr.msk.f32.gmra.mrb[60].mxu1 %vm860_vm9, %v3233_v7 }
 0x9b8   : > { %3358 = vmatprep.mubr.f32.mxu1 %v5300_v0 }
 0x9ba   : > { %v3395_v51 = vpop.permute.xlu0 %3394 }
 0x9bb   : > { %4219 = vmatmul.mubr.msk.f32.gmra.mrb[62].mxu1 %vm860_vm9, %v3234_v8  ;;  %v3479_v8 = vld [vmem:[#allocation13 + $0x20] sm:$0xff] }
 0x9bc   : > { %4295 = vmatprep.mubr.msk.f32.mxu0 %vm860_vm9, %v3479_v8 }
 0xa71   : > { %v3078_v9 = vpop.f32.mrb[48].mxu1 }
 0xa72   : > { %v3080_v10 = vpop.f32.mrb[49].mxu1 }
 0xa75   : > { %v3084_v11 = vpop.f32.mrb[50].mxu1 }
 0xa76   : > { %v3086_v13 = vpop.f32.mrb[51].mxu1 }
 0xa77   : > { %v3866_v13 = vld [vmem:[%s6489_s29 + $0x8] sm:$0xff] }
 0xa79   : > { %v3090_v14 = vpop.f32.mrb[52].mxu1 }
 0xa7a   : > { %v3092_v15 = vpop.f32.mrb[53].mxu1 }
 0xa7b   : > { %v3868_v15 = vld [vmem:[%s6489_s29 + $0x18] sm:$0xff] }
 0xa7d   : > { %v3096_v17 = vpop.f32.mrb[54].mxu1  ;;  %v3207_v18 = vpop.f32.mrb[44].mxu0 }
 0xa7e   : > { %v3208_v19 = vadd.f32 %v3207_v18, %v3078_v9  ;;  %v3098_v20 = vpop.f32.mrb[55].mxu1  ;;  %v3209_v21 = vpop.f32.mrb[45].mxu0 }
 0xa81   : > { %v3213_v23 = vpop.f32.mrb[46].mxu0 }
 0xa82   : > { %v3214_v24 = vadd.f32 %v3213_v23, %v3084_v11  ;;  %v3342_v25 = vpop.f32.mrb[56].mxu1  ;;  %v3215_v26 = vpop.f32.mrb[47].mxu0 }
 0xa83   : > { %v3365_v27 = vadd.f32 %v3342_v25, %v3208_v19  ;;  %v3344_v28 = vpop.f32.mrb[57].mxu1 }
 0xa85   : > { %v3397_v30 = vadd.f32 %v3380_v29, %v3365_v27  ;;  %v3219_v31 = vpop.f32.mrb[48].mxu0 }
 0xa86   : > { %v3220_v32 = vadd.f32 %v3219_v31, %v3090_v14  ;;  %v3348_v49 = vpop.f32.mrb[58].mxu1  ;;  %v3221_v33 = vpop.f32.mrb[49].mxu0  ;;  %v3867_v14 = vld [vmem:[%s6489_s29 + $0x10] sm:$0xff] }
 0xa87   : > { %v3367_v36 = vadd.f32 %v3348_v49, %v3214_v24  ;;  %v3350_v37 = vpop.f32.mrb[59].mxu1  ;;  %3413 = vrot.lane.b32.xlu1 %v3397_v30, %s5316_s5 }
 0xa89   : > { %v3399_v39 = vadd.f32 %v3385_v38, %v3367_v36  ;;  %v3225_v56 = vpop.f32.mrb[50].mxu0 }
 0xa8a   : > { %v3226_v41 = vadd.f32 %v3225_v56, %v3096_v17  ;;  %v3354_v42 = vpop.f32.mrb[60].mxu1  ;;  %v3227_v61 = vpop.f32.mrb[51].mxu0 }
 0xa8b   : > { %v3369_v43 = vadd.f32 %v3354_v42, %v3220_v32  ;;  %v3356_v45 = vpop.f32.mrb[61].mxu1  ;;  %3417 = vrot.lane.b32.xlu0 %v3399_v39, %s5316_s5 }
 0xa8d   : > { %v3401_v16 = vadd.f32 %v3390_v46, %v3369_v43 }
 0xa8e   : > { %v3360_v47 = vpop.f32.mrb[62].mxu1 }
 0xa8f   : > { %v3371_v48 = vadd.f32 %v3360_v47, %v3226_v41  ;;  %v3362_v50 = vpop.f32.mrb[63].mxu1  ;;  %3421 = vrot.lane.b32.xlu1 %v3401_v16, %s5316_s5  ;;  %v3480_v41 = vld [vmem:[#allocation13 + $0x28] sm:$0xff]  ;;  %v3481_v16 = vld [vmem:[#allocation13 + $0x30] sm:$0xff] }
 0xa91   : > { %v3403_v52 = vadd.f32 %v3395_v51, %v3371_v48 }
 0xa93   : > { %3425 = vrot.lane.b32.xlu0 %v3403_v52, %s5316_s5  ;;  %v3482_v52 = vld [vmem:[#allocation13 + $0x38] sm:$0xff]  ;;  %s4240_s5 = sshll.u32 %s6490_s14, 9 }
 0xa94   : > { %s6334_s27 = scalar_lea.hbm %s6492_s28, %s4240_s5 }
 0xaf9   : > { %v3414_v53 = vpop.permute.xlu1 %3413 }
 0xafa   : > { %v3442_v54 = vsel %vm5745_vm3, %v3414_v53, 0.0 }
 0xafb   : > { %vm3450_vm5 = vcmp.ge.f32.partialorder %v3442_v54, 0.0  ;;  %v3458_v55 = vmul.f32 0.1, %v3442_v54 }
 0xafd   : > { %v3466_v34 = vsel %vm3450_vm5, %v3442_v54, %v3458_v55  ;;  %v3418_v57 = vpop.permute.xlu0 %3417 }
 0xafe   : > { %v4923_v58 = vpack.i.bf16 %v5300_v0, %v3466_v34  ;;  %v3444_v59 = vsel %vm5745_vm3, %v3418_v57, 0.0 }
 0xaff   : > { %vm3452_vm6 = vcmp.ge.f32.partialorder %v3444_v59, 0.0  ;;  %v3460_v60 = vmul.f32 0.1, %v3444_v59 }
 0xb00   : > { %4924 = vrot.lane.b32.xlu1 %v4923_v58, %s5317_s3 }
 0xb01   : > { %v3468_v62 = vsel %vm3452_vm6, %v3444_v59, %v3460_v60  ;;  %v3422_v63 = vpop.permute.xlu1 %3421 }
 0xb02   : > { %v4928_v1 = vpack.i.bf16 %v5300_v0, %v3468_v62  ;;  %v3446_v2 = vsel %vm5745_vm3, %v3422_v63, 0.0 }
 0xb03   : > { %vm3454_vm7 = vcmp.ge.f32.partialorder %v3446_v2, 0.0  ;;  %v3462_v3 = vmul.f32 0.1, %v3446_v2 }
 0xb04   : > { %4929 = vrot.lane.b32.xlu0 %v4928_v1, %s5317_s3 }
 0xb05   : > { %v3470_v4 = vsel %vm3454_vm7, %v3446_v2, %v3462_v3  ;;  %v3426_v5 = vpop.permute.xlu0 %3425 }
 0xb06   : > { %v4933_v6 = vpack.i.bf16 %v5300_v0, %v3470_v4  ;;  %v3448_v7 = vsel %vm5745_vm3, %v3426_v5, 0.0  ;;  %vm3507_vm3 = vcmask 949248  }
 0xb07   : > { %vm3456_vm8 = vcmp.ge.f32.partialorder %v3448_v7, 0.0  ;;  %v3464_v9 = vmul.f32 0.1, %v3448_v7 }
 0xb08   : > { %4934 = vrot.lane.b32.xlu1 %v4933_v6, %s5317_s3 }
 0xb09   : > { %v3472_v10 = vsel %vm3456_vm8, %v3448_v7, %v3464_v9  ;;  %v3477_v9 = vld [vmem:[#allocation13 + $0x18] sm:$0xff] }
 0xb0a   : > { %v4943_v11 = vpack.i.bf16 %v5300_v0, %v3472_v10 }
 0xb0c   : > { %4944 = vrot.lane.b32.xlu0 %v4943_v11, %s5317_s3  ;;  %4939 = vrot.lane.b32.xlu1 %v4923_v58, %s5314_s16 }
 0xb10   : > { %4949 = vrot.lane.b32.xlu0 %v4928_v1, %s5314_s16  ;;  %4954 = vrot.lane.b32.xlu1 %v4933_v6, %s5314_s16 }
 0xb14   : > { %4964 = vrot.lane.b32.xlu0 %v4943_v11, %s5314_s16  ;;  %4959 = vrot.lane.b32.xlu1 %v4923_v58, %s5318_s7  ;;  %v3474_v58 = vld [vmem:[#allocation13] sm:$0xff] }
 0xb18   : > { %4969 = vrot.lane.b32.xlu0 %v4928_v1, %s5318_s7  ;;  %4974 = vrot.lane.b32.xlu1 %v4933_v6, %s5318_s7  ;;  %v3475_v1 = vld [vmem:[#allocation13 + $0x8] sm:$0xff]  ;;  %v3476_v6 = vld [vmem:[#allocation13 + $0x10] sm:$0xff] }
 0xb1c   : > { %4979 = vrot.lane.b32.xlu0 %v4943_v11, %s5318_s7  ;;  %3871 = vperm.xlu1 %4662, %v3865_v12  }
 0xb20   : > { %3876 = vperm.xlu0 %4661, %v3866_v13   ;;  %3881 = vperm.xlu1 %4662, %v3867_v14   ;;  %v3735_v13 = vld [vmem:[#allocation13 + $0x40] sm:$0xff]  ;;  %v3736_v14 = vld [vmem:[#allocation13 + $0x48] sm:$0xff] }
 0xb24   : > { %3886 = vperm.xlu0 %4661, %v3868_v15   ;;  %3901 = vrot.lane.b32.xlu1 %v6171_v35, %s5317_s3  ;;  %v3737_v15 = vld [vmem:[#allocation13 + $0x50] sm:$0xff] }
 0xb28   : > { %4984 = vrot.lane.b32.xlu0 %v5300_v0, %s5317_s3  ;;  %3905 = vrot.lane.b32.xlu1 %v6178_v40, %s5317_s3 }
 0xb2c   : > { %3909 = vrot.lane.b32.xlu0 %v6187_v44, %s5317_s3  ;;  %4989 = vrot.lane.b32.xlu1 %v5300_v0, %s5317_s3 }
 0xb30   : > { %3913 = vrot.lane.b32.xlu0 %v6197_v22, %s5317_s3  ;;  %s6491_s3 = sld [smem:[#allocation26_spill]] }
 0xb36   : > { %p6493_p6 = scmp.ne.s32.totalorder %s6491_s3, 0 }
 0xb38   : > { %p5197_p4 = pnand %p5196_p7, %p6493_p6 }
 0xb3a   : > { %p5198_p1 = pneg %p5197_p4 }
 0xb3c   : > { %p5205_p0 = pnand %p5204_p9, %p5198_p1 }
 0xb72   : > { %v4925_v17 = vpop.permute.xlu1 %4924 }
 0xb73   : > { %v4927_v18 = vunpack.i.h.bf16 %v4925_v17  ;;  %v4926_v19 = vunpack.i.l.bf16 %v4925_v17  ;;  %v3738_v17 = vld [vmem:[#allocation13 + $0x58] sm:$0xff] }
 0xb75   : > { %v3508_v23 = vsel %vm3507_vm3, %v4926_v19, %v4927_v18 }
 0xb76   : > { %v4930_v20 = vpop.permute.xlu0 %4929 }
 0xb77   : > { %v4932_v35 = vunpack.i.h.bf16 %v4930_v20  ;;  %v4931_v21 = vunpack.i.l.bf16 %v4930_v20 }
 0xb79   : > { %v3509_v40 = vsel %vm3507_vm3, %v4931_v21, %v4932_v35 }
 0xb7a   : > { %v4935_v24 = vpop.permute.xlu1 %4934  ;;  %v4449_v25 = vpack.c.bf16 %v3509_v40, %v3508_v23 }
 0xb7b   : > { %v4937_v44 = vunpack.i.h.bf16 %v4935_v24  ;;  %v4936_v26 = vunpack.i.l.bf16 %v4935_v24 }
 0xb7c   : > { %4450 = vmatprep.subr.bf16.mxu0 %v4449_v25 }
 0xb7d   : > { %4452 = vmatpush3.bf16.msra.mxu0 %v4449_v25  ;;  %v3510_v31 = vsel %vm3507_vm3, %v4936_v26, %v4937_v44 }
 0xb7e   : > { %v4945_v0 = vpop.permute.xlu0 %4944  ;;  %v4940_v27 = vpop.permute.xlu1 %4939 }
 0xb7f   : > { %v4947_v22 = vunpack.i.h.bf16 %v4945_v0  ;;  %v4946_v28 = vunpack.i.l.bf16 %v4945_v0  ;;  %v4942_v29 = vunpack.i.h.bf16 %v4940_v27  ;;  %v4941_v30 = vunpack.i.l.bf16 %v4940_v27 }
 0xb81   : > { %v3511_v32 = vsel %vm3507_vm3, %v4946_v28, %v4947_v22  ;;  %v3629_v42 = vsel %vm2987_vm2, %v4941_v30, %v4942_v29 }
 0xb82   : > { %v4950_v49 = vpop.permute.xlu0 %4949  ;;  %v4955_v33 = vpop.permute.xlu1 %4954  ;;  %v4453_v36 = vpack.c.bf16 %v3511_v32, %v3510_v31 }
 0xb83   : > { %v4952_v37 = vunpack.i.h.bf16 %v4950_v49  ;;  %v4951_v38 = vunpack.i.l.bf16 %v4950_v49  ;;  %v4957_v39 = vunpack.i.h.bf16 %v4955_v33  ;;  %v4956_v56 = vunpack.i.l.bf16 %v4955_v33 }
 0xb84   : > { %4454 = vmatprep.subr.bf16.mxu0 %v4453_v36 }
 0xb85   : > { %4456 = vmatpush3.bf16.msra.mxu0 %v4453_v36  ;;  %v3630_v61 = vsel %vm2987_vm2, %v4951_v38, %v4952_v37  ;;  %v3631_v53 = vsel %vm2987_vm2, %v4956_v56, %v4957_v39 }
 0xb86   : > { %v4965_v43 = vpop.permute.xlu0 %4964  ;;  %v4960_v45 = vpop.permute.xlu1 %4959  ;;  %v4457_v46 = vpack.c.bf16 %v3630_v61, %v3629_v42 }
 0xb87   : > { %v4967_v47 = vunpack.i.h.bf16 %v4965_v43  ;;  %v4966_v48 = vunpack.i.l.bf16 %v4965_v43  ;;  %v4962_v50 = vunpack.i.h.bf16 %v4960_v45  ;;  %v4961_v51 = vunpack.i.l.bf16 %v4960_v45 }
 0xb88   : > { %4296 = vmatmul.mubr.msk.f32.vlgmr.msra.gmra.mrb[52].mxu0 %vm860_vm9, %v3480_v41  ;;  %4458 = vmatprep.subr.bf16.mxu0 %v4457_v46 }
 0xb89   : > { %4460 = vmatpush3.bf16.msra.mxu0 %v4457_v46  ;;  %4298 = vmatprep.mubr.msk.f32.mxu0 %vm860_vm9, %v3481_v16  ;;  %v3632_v54 = vsel %vm2987_vm2, %v4966_v48, %v4967_v47  ;;  %v3756_v2 = vsel %vm3755_vm10, %v4961_v51, %v4962_v50 }
 0xb8a   : > { %v4970_v55 = vpop.permute.xlu0 %4969  ;;  %v4975_v34 = vpop.permute.xlu1 %4974  ;;  %v4461_v57 = vpack.c.bf16 %v3632_v54, %v3631_v53 }
 0xb8b   : > { %v4972_v59 = vunpack.i.h.bf16 %v4970_v55  ;;  %v4971_v60 = vunpack.i.l.bf16 %v4970_v55  ;;  %v4977_v62 = vunpack.i.h.bf16 %v4975_v34  ;;  %v4976_v63 = vunpack.i.l.bf16 %v4975_v34 }
 0xb8c   : > { %4299 = vmatmul.mubr.msk.f32.gmra.mrb[54].mxu0 %vm860_vm9, %v3482_v52  ;;  %4462 = vmatprep.subr.bf16.mxu0 %v4461_v57 }
 0xb8d   : > { %4464 = vmatpush3.bf16.msra.mxu0 %v4461_v57  ;;  %4309 = vmatprep.mubr.msk.f32.mxu0 %vm860_vm9, %v3474_v58  ;;  %v3757_v3 = vsel %vm3755_vm10, %v4971_v60, %v4972_v59  ;;  %v3758_v10 = vsel %vm3755_vm10, %v4976_v63, %v4977_v62 }
 0xb8e   : > { %v4980_v4 = vpop.permute.xlu0 %4979  ;;  %v4465_v5 = vpack.c.bf16 %v3757_v3, %v3756_v2 }
 0xb8f   : > { %v4982_v7 = vunpack.i.h.bf16 %v4980_v4  ;;  %v4981_v8 = vunpack.i.l.bf16 %v4980_v4 }
 0xb90   : > { %4310 = vmatmul.mubr.msk.f32.vlgmr.msra.gmra.mrb[52].mxu0 %vm860_vm9, %v3475_v1  ;;  %4466 = vmatprep.subr.bf16.mxu0 %v4465_v5 }
 0xb91   : > { %4468 = vmatpush3.bf16.msra.mxu0 %v4465_v5  ;;  %4312 = vmatprep.mubr.msk.f32.mxu0 %vm860_vm9, %v3476_v6  ;;  %v3759_v11 = vsel %vm3755_vm10, %v4981_v8, %v4982_v7 }
 0xb92   : > { %v4469_v12 = vpack.c.bf16 %v3759_v11, %v3758_v10 }
 0xb94   : > { %4313 = vmatmul.mubr.msk.f32.gmra.mrb[54].mxu0 %vm860_vm9, %v3477_v9  ;;  %4470 = vmatprep.subr.bf16.mxu0 %v4469_v12 }
 0xb95   : > { %4472 = vmatpush3.bf16.msra.mxu0 %v4469_v12  ;;  %4323 = vmatprep.mubr.msk.f32.mxu0 %vm860_vm9, %v3735_v13 }
 0xb98   : > { %4324 = vmatmul.mubr.msk.f32.vlgmr.msra.gmra.mrb[52].mxu0 %vm860_vm9, %v3736_v14 }
 0xb99   : > { %4326 = vmatprep.mubr.msk.f32.mxu0 %vm860_vm9, %v3737_v15 }
 0xb9b   : > { %v3872_v18 = vpop.permute.xlu1 %3871 }
 0xb9c   : > { %4327 = vmatmul.mubr.msk.f32.gmra.mrb[54].mxu0 %vm860_vm9, %v3738_v17 }
 0xb9f   : > { %v3877_v19 = vpop.permute.xlu0 %3876  ;;  %v3882_v20 = vpop.permute.xlu1 %3881 }
 0xba3   : > { %v3887_v35 = vpop.permute.xlu0 %3886  ;;  %v3902_v21 = vpop.permute.xlu1 %3901 }
 0xba7   : > { %v4985_v23 = vpop.permute.xlu0 %4984  ;;  %v3906_v40 = vpop.permute.xlu1 %3905 }
 0xba8   : > { %v4987_v25 = vunpack.i.h.bf16 %v4985_v23  ;;  %v4986_v44 = vunpack.i.l.bf16 %v4985_v23 }
 0xbaa   : > { %v3918_v28 = vsel %vm3507_vm3, %v3906_v40, %v4987_v25  ;;  %v3917_v33 = vsel %vm3507_vm3, %v3902_v21, %v4986_v44 }
 0xbab   : > { %v3910_v24 = vpop.permute.xlu0 %3909  ;;  %v4990_v26 = vpop.permute.xlu1 %4989 }
 0xbac   : > { %v4992_v29 = vunpack.i.h.bf16 %v4990_v26  ;;  %v4991_v31 = vunpack.i.l.bf16 %v4990_v26 }
 0xbae   : > { %v3919_v61 = vsel %vm3507_vm3, %v3910_v24, %v4991_v31 }
 0xbaf   : > { %v3914_v32 = vpop.permute.xlu0 %3913 }
 0xbb0   : > { %v3920_v56 = vsel %vm3507_vm3, %v3914_v32, %v4992_v29 }
 0xc6b   : > { %v4325_v0 = vpop.f32.mrb[52].mxu0 }
 0xc6c   : > { %v3890_v27 = vadd.f32 %v4325_v0, %v3877_v19  ;;  %v3842_v22 = vpop.f32.mrb[53].mxu0 }
 0xc6d   : > { %v3889_v30 = vadd.f32 %v3872_v18, %v3842_v22 }
 0xc6e   : > { %v3926_v49 = vadd.f32 %v3918_v28, %v3890_v27 }
 0xc6f   : > { %v3925_v36 = vadd.f32 %v3917_v33, %v3889_v30  ;;  %v4328_v37 = vpop.f32.mrb[54].mxu0 }
 0xc70   : > { %3930 = vst [vmem:[%s688_s23 + $0x8] sm:$0xff] %v3926_v49  ;;  %v3892_v38 = vadd.f32 %v4328_v37, %v3887_v35  ;;  %v3852_v39 = vpop.f32.mrb[55].mxu0 }
 0xc71   : > { %3929 = vst [vmem:[%s688_s23] sm:$0xff] %v3925_v36  ;;  %v3891_v41 = vadd.f32 %v3882_v20, %v3852_v39 }
 0xc72   : > { %v3928_v42 = vadd.f32 %v3920_v56, %v3892_v38 }
 0xc73   : > { %v3927_v43 = vadd.f32 %v3919_v61, %v3891_v41 }
 0xc74   : > { %3932 = vst [vmem:[%s688_s23 + $0x18] sm:$0xff] %v3928_v42 }
 0xc75   : > { %3931 = vst [vmem:[%s688_s23 + $0x10] sm:$0xff] %v3927_v43 }
 0xc76   : > { %5208 = shalt.err (!%p5205_p0)
}
 0xc77   : > { %s5209_s16 = scalar_lea.hbm %s6334_s27, 512  ;;  %s5213_s23 = scalar_lea.hbm %s6492_s28, 1024 }
 0xc78   : > { %p5210_p8 = scmp.ne.s32.totalorder %s6334_s27, %s5209_s16  ;;  %p5214_p2 = scmp.lt.u32.totalorder %s6334_s27, %s6492_s28 }
 0xc79   : > { %p5215_p10 = scmp.lt.u32.totalorder %s5213_s23, %s5209_s16  ;;  %p5217_p7 = scmp.lt.u32.totalorder %s5209_s16, %s6334_s27 }
 0xc7a   : > { %p5211_p3 = pnand %p5210_p8, %p6493_p6 }
 0xc7b   : > { %p5216_p5 = por %p5215_p10, %p5214_p2 }
 0xc7c   : > { %p5212_p11 = pneg %p5211_p3 }
 0xc7d   : > { %p5218_p4 = por %p5217_p7, %p5216_p5 }
 0xc7f   : > { %p5219_p1 = pnand %p5218_p4, %p5212_p11 }
 0xc81   : > { %5222 = shalt.err (!%p5219_p1)
}
 0xc82   : > { %s5320_s7 = smov 128   ;;  %s5321_s21 = smov 8  }
 0xc83   : > { %4507 = dma.vmem_to_hbm [thread:$0]  (%p6493_p6), %s6328_s30, 512, %s6334_s27, %s3934_s18, %s5320_s7, %s5320_s7, %s5321_s21  }
 0xc84 PF: > { %s6494_s6 = sld [smem:[#allocation20_spill]]  ;;  %s6495_s8 = sld [smem:[#allocation24_spill]] }
 0xc85   : > { %s6496_s22 = sld [smem:[#allocation23_spill]] }
 0xc8a   : > { %s3963_s12 = sand.u32 1, %s6494_s6   ;;  %p6497_p13 = scmp.ne.s32.totalorder %s6495_s8, 0 }
 0xc8b   : > { %p6498_p12 = scmp.ge.s32.totalorder %s6496_s22, 2  ;;  %s3964_s16 = scalar_lea.sflag [#allocation4], %s3963_s12 }
 0xc8d   : > { %p4533_p9 = pnand %p6498_p12, %p6497_p13 }
 0xc8f   : > { %5264 = dma.done.wait (!%p4533_p9), %s3964_s16, 512  }
 0xc90   : > { %5266 = vsyncadd (!%p4533_p9), %s3964_s16, 4294966784  ;;  %s36_s23 = sadd.s32 1, %s6496_s22   ;;  %s6499_s14 = sld [smem:[#allocation27_spill]] }
 0xc91   : > { %p33_p0 = scmp.ge.s32.totalorder %s36_s23, 4   ;;  %s6500_s21 = sld [smem:[#allocation22_spill]] }
 0xc92   : > { %s6501_s22 = sld [smem:[#allocation25_spill]]  ;;  %s6502_s18 = smov %s5273_s19 }
 0xc93   : > { %s6503_s19 = smov %s5277_s20  ;;  %35 = sbr.rel (!%p33_p0) target bundleno = 23 (0x17), region = 177 }
 0xc96   : > { %s6504_s20 = smov %s6499_s14 }
 0xc9a   :  { %3969 = vsyncpa [#allocation3], 1 }
 0xc9b   :  { %3971 = vsyncpa [#allocation3 + $0x1], 1 }
 0xc9c   :  { %3972 = vsyncpa [#allocation6], 1 }
 0xc9d   :  { %3974 = vsyncpa [#allocation6 + $0x1], 1 }
 0xc9e   :  { %3975 = vsyncpa [#allocation9], 1 }
 0xc9f   :  { %3976 = vsyncpa [#allocation12], 1 }
 0xca0   :  { %3977 = vsyncpa [#allocation4], 1 }
 0xca1   :  { %3979 = vsyncpa [#allocation4 + $0x1], 1 }

</bundles_post_ra>
